<compile_context>
chip_gen: v7x
topology: tpu7x:2x2x1
jax: 0.10.0
libtpu: 0.0.40
codegen_flags: <defaults>
</compile_context>

<pallas_src>
import jax
import jax.numpy as jnp
from jax.experimental import pallas as pl
from jax.experimental.pallas import tpu as pltpu

NIN = 28 * 28          # 784
NH1 = 28 * 28 * 5      # 3920 (logical)
NH1_PAD = 4096         # padded to a multiple of 128 lanes for clean tiles
NH2 = 40               # logical hidden-2 width
NH2_PAD = 128          # lane-dense padding for W2 columns / layer-2 accumulator
NZ = 2
TN = 2048              # NH1 tile width; 4096 / 2048 = 2 grid steps


def encoder_kernel(x_ref, w1_ref, b1_ref, w2_ref, b2_ref, w3_ref, b3_ref,
                   o_ref, acc_ref):
    k = pl.program_id(0)

    @pl.when(k == 0)
    def _init():
        acc_ref[...] = jnp.zeros_like(acc_ref)

    # b1 is resident; take this step's lane-aligned chunk.
    start = pl.multiple_of(k * TN, TN)
    b1_tile = b1_ref[:, pl.ds(start, TN)]                    # (1, TN) f32

    # Layer 1, one NH1 tile: bf16 x bf16 on the MXU, f32 accumulate.
    h1 = jnp.dot(x_ref[...], w1_ref[...], preferred_element_type=jnp.float32)
    h1 = jnp.maximum(h1 + b1_tile, 0.0)                      # (B, TN) f32

    # Partial layer-2 contraction over this tile's columns (lane-dense 128-wide
    # accumulator; padded columns stay exactly zero).
    acc_ref[...] += jnp.dot(h1, w2_ref[...].astype(jnp.float32),
                            preferred_element_type=jnp.float32)

    # Epilogue: finish layer 2, layer 3, sigmoid; write the output once.
    @pl.when(k == pl.num_programs(0) - 1)
    def _epilogue():
        h2 = jnp.maximum(acc_ref[...] + b2_ref[...], 0.0)    # (B, 128)
        z = jnp.dot(h2, w3_ref[...], preferred_element_type=jnp.float32)
        z = z + b3_ref[...]
        o_ref[...] = 1.0 / (1.0 + jnp.exp(-z))


def init_params(key):
    """Deterministic init mirroring torch.nn.Linear's U(-1/sqrt(fan_in), +)."""
    ks = jax.random.split(key, 6)

    def lin(kw, kb, fan_in, fan_out):
        bound = 1.0 / jnp.sqrt(jnp.float32(fan_in))
        w = jax.random.uniform(kw, (fan_in, fan_out), jnp.float32, -bound, bound)
        b = jax.random.uniform(kb, (1, fan_out), jnp.float32, -bound, bound)
        return w, b

    w1, b1 = lin(ks[0], ks[1], NIN, NH1)
    w2, b2 = lin(ks[2], ks[3], NH1, NH2)
    w3, b3 = lin(ks[4], ks[5], NH2, NZ)

    # Zero-pad NH1 -> NH1_PAD (padded h1 columns are 0, padded W2 rows are 0)
    # and NH2 -> NH2_PAD (padded acc columns stay 0 through bias/ReLU and meet
    # zero rows of the padded W3), so the padded math equals the unpadded math.
    w1p = jnp.zeros((NIN, NH1_PAD), jnp.float32).at[:, :NH1].set(w1)
    b1p = jnp.zeros((1, NH1_PAD), jnp.float32).at[:, :NH1].set(b1)
    w2p = jnp.zeros((NH1_PAD, NH2_PAD), jnp.float32).at[:NH1, :NH2].set(w2)
    b2p = jnp.zeros((1, NH2_PAD), jnp.float32).at[:, :NH2].set(b2)
    w3p = jnp.zeros((NH2_PAD, NZ), jnp.float32).at[:NH2, :].set(w3)

    # W1/W2 stored bf16: halves the dominant HBM weight stream; products are
    # accumulated in f32 on the MXU.
    return (w1p.astype(jnp.bfloat16), b1p, w2p.astype(jnp.bfloat16),
            b2p, w3p, b3)


def encoder_forward(x, params):
    w1, b1, w2, b2, w3, b3 = params
    xf = x.reshape(-1, NIN).astype(jnp.bfloat16)   # glue: view(-1, nin), bf16 MXU input
    B = xf.shape[0]
    n_tiles = NH1_PAD // TN                        # 2 grid steps

    grid_spec = pltpu.PrefetchScalarGridSpec(
        num_scalar_prefetch=0,
        grid=(n_tiles,),
        in_specs=[
            pl.BlockSpec((B, NIN), lambda k: (0, 0)),        # x (resident)
            pl.BlockSpec((NIN, TN), lambda k: (0, k)),       # W1 tile (streamed)
            pl.BlockSpec((1, NH1_PAD), lambda k: (0, 0)),    # b1 (resident, sliced in-kernel)
            pl.BlockSpec((TN, NH2_PAD), lambda k: (k, 0)),   # W2 tile (streamed, lane-dense)
            pl.BlockSpec((1, NH2_PAD), lambda k: (0, 0)),    # b2 (resident)
            pl.BlockSpec((NH2_PAD, NZ), lambda k: (0, 0)),   # W3 (resident)
            pl.BlockSpec((1, NZ), lambda k: (0, 0)),         # b3 (resident)
        ],
        out_specs=pl.BlockSpec((B, NZ), lambda k: (0, 0)),
        scratch_shapes=[pltpu.VMEM((B, NH2_PAD), jnp.float32)],  # layer-2 accumulator
    )

    return pl.pallas_call(
        encoder_kernel,
        out_shape=jax.ShapeDtypeStruct((B, NZ), jnp.float32),
        grid_spec=grid_spec,
        compiler_params=pltpu.CompilerParams(
            # Reduction axis carries the accumulator -> must be sequential.
            dimension_semantics=("arbitrary",),
        ),
    )(xf, w1, b1, w2, b2, w3, b3)


def encoder_reference(x, params):
    """Pure-JAX reference using the same (bf16-stored, padded) parameters."""
    w1, b1, w2, b2, w3, b3 = params
    hp = jax.lax.Precision.HIGHEST
    xf = x.reshape(-1, NIN).astype(jnp.bfloat16).astype(jnp.float32)
    h1 = jnp.maximum(jnp.dot(xf, w1.astype(jnp.float32), precision=hp) + b1, 0.0)
    h2 = jnp.maximum(jnp.dot(h1, w2.astype(jnp.float32), precision=hp) + b2, 0.0)
    return jax.nn.sigmoid(jnp.dot(h2, w3, precision=hp) + b3)


if __name__ == "__main__":
    key = jax.random.PRNGKey(0)
    k_x, k_p = jax.random.split(key)

    # Small batch of MNIST-shaped NCHW inputs; forward flattens to (-1, 784).
    x = jax.random.normal(k_x, (2, 1, 28, 28), dtype=jnp.float32)
    params = init_params(k_p)

    out = jax.block_until_ready(encoder_forward(x, params))
    ref = encoder_reference(x, params)

    assert out.shape == (2, NZ), out.shape
    assert jnp.allclose(out, ref, atol=1e-4, rtol=1e-4), (out, ref)

    print("KERNEL_OK")
</pallas_src>

<mosaic_0001>
module attributes {stable_mosaic.version = 11 : i64} {
  func.func @encoder_kernel(%arg0: i32, %arg1: memref<2x784xbf16, #tpu.memory_space<vmem>>, %arg2: memref<784x2048xbf16, #tpu.memory_space<vmem>>, %arg3: memref<1x4096xf32, #tpu.memory_space<vmem>>, %arg4: memref<2048x128xbf16, #tpu.memory_space<vmem>>, %arg5: memref<1x128xf32, #tpu.memory_space<vmem>>, %arg6: memref<128x2xf32, #tpu.memory_space<vmem>>, %arg7: memref<1x2xf32, #tpu.memory_space<vmem>>, %arg8: memref<2x2xf32, #tpu.memory_space<vmem>>, %arg9: memref<2x128xf32, #tpu.memory_space<vmem>>) attributes {dimension_semantics = [#tpu.dimension_semantics<arbitrary>], iteration_bounds = array<i64: 2>, scalar_prefetch = 0 : i64, scratch_operands = 1 : i64, tpu.core_type = #tpu.core_type<tc>, window_params = [{pipeline_mode = #tpu.pipeline_mode<synchronous>, transform_indices = @transform_0, window_bounds = array<i64: 2, 784>}, {transform_indices = @transform_1, window_bounds = array<i64: 784, 2048>}, {pipeline_mode = #tpu.pipeline_mode<synchronous>, transform_indices = @transform_2, window_bounds = array<i64: 1, 4096>}, {transform_indices = @transform_3, window_bounds = array<i64: 2048, 128>}, {pipeline_mode = #tpu.pipeline_mode<synchronous>, transform_indices = @transform_4, window_bounds = array<i64: 1, 128>}, {pipeline_mode = #tpu.pipeline_mode<synchronous>, transform_indices = @transform_5, window_bounds = array<i64: 128, 2>}, {pipeline_mode = #tpu.pipeline_mode<synchronous>, transform_indices = @transform_6, window_bounds = array<i64: 1, 2>}, {pipeline_mode = #tpu.pipeline_mode<synchronous>, transform_indices = @transform_7, window_bounds = array<i64: 2, 2>}]} {
    %c0_i32 = arith.constant 0 : i32
    %0 = arith.cmpi eq, %arg0, %c0_i32 : i32
    %1 = arith.extui %0 : i1 to i32
    %c0_i32_0 = arith.constant 0 : i32
    %2 = arith.cmpi ne, %1, %c0_i32_0 : i32
    scf.if %2 {
      %cst_14 = arith.constant 0.000000e+00 : f32
      %23 = vector.broadcast %cst_14 : f32 to vector<2x128xf32>
      %c0_15 = arith.constant 0 : index
      %c0_16 = arith.constant 0 : index
      %24 = vector.load %arg9[%c0_15, %c0_16] : memref<2x128xf32, #tpu.memory_space<vmem>>, vector<2x128xf32>
      tpu.vector_store %arg9[%c0_15, %c0_16], %23 {strides = array<i32>} : memref<2x128xf32, #tpu.memory_space<vmem>>, vector<2x128xf32>,
    } else {
    }
    %c2048_i32 = arith.constant 2048 : i32
    %3 = arith.muli %arg0, %c2048_i32 : i32
    %4 = tpu.assume_multiple %3, 2048 : i32
    %c0 = arith.constant 0 : index
    %5 = arith.index_cast %4 : i32 to index
    %6 = vector.load %arg3[%c0, %5] : memref<1x4096xf32, #tpu.memory_space<vmem>>, vector<1x2048xf32>
    %c0_1 = arith.constant 0 : index
    %c0_2 = arith.constant 0 : index
    %7 = vector.load %arg1[%c0_1, %c0_2] : memref<2x784xbf16, #tpu.memory_space<vmem>>, vector<2x784xbf16>
    %c0_3 = arith.constant 0 : index
    %c0_4 = arith.constant 0 : index
    %8 = vector.load %arg2[%c0_3, %c0_4] : memref<784x2048xbf16, #tpu.memory_space<vmem>>, vector<784x2048xbf16>
    %cst = arith.constant dense<0.000000e+00> : vector<2x2048xf32>
    %9 = tpu.matmul %7, %8, %cst {dimension_numbers = #tpu.dot_dimension_numbers<[1], [0], [0], [1], [0, 0, 1, 1], [], []>} : vector<2x784xbf16>, vector<784x2048xbf16>, vector<2x2048xf32> -> vector<2x2048xf32>
    %10 = vector.broadcast %6 : vector<1x2048xf32> to vector<2x2048xf32>
    %11 = arith.addf %9, %10 : vector<2x2048xf32>
    %cst_5 = arith.constant 0.000000e+00 : f32
    %12 = vector.broadcast %cst_5 : f32 to vector<2x2048xf32>
    %13 = arith.maximumf %11, %12 : vector<2x2048xf32>
    %c0_6 = arith.constant 0 : index
    %c0_7 = arith.constant 0 : index
    %14 = vector.load %arg9[%c0_6, %c0_7] : memref<2x128xf32, #tpu.memory_space<vmem>>, vector<2x128xf32>
    %c0_8 = arith.constant 0 : index
    %c0_9 = arith.constant 0 : index
    %15 = vector.load %arg4[%c0_8, %c0_9] : memref<2048x128xbf16, #tpu.memory_space<vmem>>, vector<2048x128xbf16>
    %16 = arith.extf %15 : vector<2048x128xbf16> to vector<2048x128xf32>
    %cst_10 = arith.constant dense<0.000000e+00> : vector<2x128xf32>
    %17 = tpu.matmul %13, %16, %cst_10 {dimension_numbers = #tpu.dot_dimension_numbers<[1], [0], [0], [1], [0, 0, 1, 1], [], []>} : vector<2x2048xf32>, vector<2048x128xf32>, vector<2x128xf32> -> vector<2x128xf32>
    %18 = arith.addf %14, %17 : vector<2x128xf32>
    %c0_11 = arith.constant 0 : index
    %c0_12 = arith.constant 0 : index
    %19 = vector.load %arg9[%c0_11, %c0_12] : memref<2x128xf32, #tpu.memory_space<vmem>>, vector<2x128xf32>
    tpu.vector_store %arg9[%c0_11, %c0_12], %18 {strides = array<i32>} : memref<2x128xf32, #tpu.memory_space<vmem>>, vector<2x128xf32>,
    %c1_i32 = arith.constant 1 : i32
    %20 = arith.cmpi eq, %arg0, %c1_i32 : i32
    %21 = arith.extui %20 : i1 to i32
    %c0_i32_13 = arith.constant 0 : i32
    %22 = arith.cmpi ne, %21, %c0_i32_13 : i32
    scf.if %22 {
      %c0_14 = arith.constant 0 : index
      %c0_15 = arith.constant 0 : index
      %23 = vector.load %arg9[%c0_14, %c0_15] : memref<2x128xf32, #tpu.memory_space<vmem>>, vector<2x128xf32>
      %c0_16 = arith.constant 0 : index
      %c0_17 = arith.constant 0 : index
      %24 = vector.load %arg5[%c0_16, %c0_17] : memref<1x128xf32, #tpu.memory_space<vmem>>, vector<1x128xf32>
      %25 = vector.broadcast %24 : vector<1x128xf32> to vector<2x128xf32>
      %26 = arith.addf %23, %25 : vector<2x128xf32>
      %cst_18 = arith.constant 0.000000e+00 : f32
      %27 = vector.broadcast %cst_18 : f32 to vector<2x128xf32>
      %28 = arith.maximumf %26, %27 : vector<2x128xf32>
      %c0_19 = arith.constant 0 : index
      %c0_20 = arith.constant 0 : index
      %29 = vector.load %arg6[%c0_19, %c0_20] : memref<128x2xf32, #tpu.memory_space<vmem>>, vector<128x2xf32>
      %cst_21 = arith.constant dense<0.000000e+00> : vector<2x2xf32>
      %30 = tpu.matmul %28, %29, %cst_21 {dimension_numbers = #tpu.dot_dimension_numbers<[1], [0], [0], [1], [0, 0, 1, 1], [], []>} : vector<2x128xf32>, vector<128x2xf32>, vector<2x2xf32> -> vector<2x2xf32>
      %c0_22 = arith.constant 0 : index
      %c0_23 = arith.constant 0 : index
      %31 = vector.load %arg7[%c0_22, %c0_23] : memref<1x2xf32, #tpu.memory_space<vmem>>, vector<1x2xf32>
      %32 = vector.broadcast %31 : vector<1x2xf32> to vector<2x2xf32>
      %33 = arith.addf %30, %32 : vector<2x2xf32>
      %cst_24 = arith.constant 0.000000e+00 : f32
      %34 = vector.broadcast %cst_24 : f32 to vector<2x2xf32>
      %35 = arith.subf %34, %33 : vector<2x2xf32>
      %36 = math.exp %35 : vector<2x2xf32>
      %cst_25 = arith.constant 1.000000e+00 : f32
      %37 = vector.broadcast %cst_25 : f32 to vector<2x2xf32>
      %38 = arith.addf %37, %36 : vector<2x2xf32>
      %cst_26 = arith.constant 1.000000e+00 : f32
      %39 = vector.broadcast %cst_26 : f32 to vector<2x2xf32>
      %40 = arith.divf %39, %38 : vector<2x2xf32>
      %c0_27 = arith.constant 0 : index
      %c0_28 = arith.constant 0 : index
      %41 = vector.load %arg8[%c0_27, %c0_28] : memref<2x2xf32, #tpu.memory_space<vmem>>, vector<2x2xf32>
      tpu.vector_store %arg8[%c0_27, %c0_28], %40 {strides = array<i32>} : memref<2x2xf32, #tpu.memory_space<vmem>>, vector<2x2xf32>,
    } else {
    }
    return
  }
  func.func @transform_0(%arg0: i32) -> (i32, i32) {
    %c0_i32 = arith.constant 0 : i32
    %c0_i32_0 = arith.constant 0 : i32
    %c0_i32_1 = arith.constant 0 : i32
    return %c0_i32, %c0_i32_0 : i32, i32
  }
  func.func @transform_1(%arg0: i32) -> (i32, i32) {
    %c0_i32 = arith.constant 0 : i32
    %c0_i32_0 = arith.constant 0 : i32
    return %c0_i32, %arg0 : i32, i32
  }
  func.func @transform_2(%arg0: i32) -> (i32, i32) {
    %c0_i32 = arith.constant 0 : i32
    %c0_i32_0 = arith.constant 0 : i32
    %c0_i32_1 = arith.constant 0 : i32
    return %c0_i32, %c0_i32_0 : i32, i32
  }
  func.func @transform_3(%arg0: i32) -> (i32, i32) {
    %c0_i32 = arith.constant 0 : i32
    %c0_i32_0 = arith.constant 0 : i32
    return %arg0, %c0_i32 : i32, i32
  }
  func.func @transform_4(%arg0: i32) -> (i32, i32) {
    %c0_i32 = arith.constant 0 : i32
    %c0_i32_0 = arith.constant 0 : i32
    %c0_i32_1 = arith.constant 0 : i32
    return %c0_i32, %c0_i32_0 : i32, i32
  }
  func.func @transform_5(%arg0: i32) -> (i32, i32) {
    %c0_i32 = arith.constant 0 : i32
    %c0_i32_0 = arith.constant 0 : i32
    %c0_i32_1 = arith.constant 0 : i32
    return %c0_i32, %c0_i32_0 : i32, i32
  }
  func.func @transform_6(%arg0: i32) -> (i32, i32) {
    %c0_i32 = arith.constant 0 : i32
    %c0_i32_0 = arith.constant 0 : i32
    %c0_i32_1 = arith.constant 0 : i32
    return %c0_i32, %c0_i32_0 : i32, i32
  }
  func.func @transform_7(%arg0: i32) -> (i32, i32) {
    %c0_i32 = arith.constant 0 : i32
    %c0_i32_0 = arith.constant 0 : i32
    %c0_i32_1 = arith.constant 0 : i32
    return %c0_i32, %c0_i32_0 : i32, i32
  }
}

</mosaic_0001>

<bundles_post_ra>
// kernel: tpu_custom_call.1
= control target key start
LH: loop header
LB: loop body
LE: loop exit
PB: predicated region body
PF: predicated region fallthrough
CT: control target
= control target key end

     0   :  { %s11945_s0 = inlined_call_operand.hbm [shape: bf16[2,784], index: 0, kind: input, shape index: {}]   ;;  %s11946_s1 = inlined_call_operand.hbm [shape: bf16[784,4096], index: 1, kind: input, shape index: {}]   ;;  %s11947_s2 = inlined_call_operand.hbm [shape: f32[1,4096], index: 2, kind: input, shape index: {}]   ;;  %s11948_s3 = inlined_call_operand.hbm [shape: bf16[4096,128], index: 3, kind: input, shape index: {}]   ;;  %s11949_s4 = inlined_call_operand.hbm [shape: f32[1,128], index: 4, kind: input, shape index: {}]   ;;  %s11950_s5 = inlined_call_operand.vmem [shape: f32[128,2], index: 5, kind: input, shape index: {}]   ;;  %s11951_s6 = inlined_call_operand.hbm [shape: f32[1,2], index: 6, kind: input, shape index: {}]   ;;  %s11952_s7 = inlined_call_operand.hbm [shape: f32[2,2], index: 7, kind: output, shape index: {}]  }
   0x1   :  { %11957 = sst [smem:[#allocation23_spill]] %s11945_s0 }
   0x2   :  { %12 = vsyncpa [#allocation4], 0 }
   0x3   :  { %13 = vsyncpa [#allocation7], 0 }
   0x4   :  { %15 = vsyncpa [#allocation7 + $0x1], 0 }
   0x5   :  { %16 = vsyncpa [#allocation10], 0 }
   0x6   :  { %18 = vsyncpa [#allocation10 + $0x1], 0 }
   0x7   :  { %19 = vsyncpa [#allocation13], 0 }
   0x8   :  { %20 = vsyncpa [#allocation5], 0  ;;  %s10482_s24 = smov 0   ;;  %s10484_s25 = smov 0  }
   0x9   :  { %s10486_s26 = smov 0   ;;  %s10488_s27 = smov 0  }
   0xa LB: > { %s10501_s28 = sadd.s32 4294967295, %s10423_s27   ;;  %s10504_s29 = sadd.s32 1, %s10423_s27   ;;  %s10423_s27 = sphi %s10488_s27, %s11982_s27   ;;  %s10419_s26 = sphi %s10486_s26, %s11981_s26   ;;  %s10415_s25 = sphi %s10484_s25, %s11980_s25   ;;  %s10411_s24 = sphi %s10482_s24, %s11979_s24  }
   0xb   : > { %s51_s30 = ssub.s32 %s10423_s27, %s10504_s29  ;;  %s54_s8 = sadd.s32 1, %s10419_s26 }
   0xc   : > { %p52_p0 = scmp.eq.s32.totalorder %s51_s30, 0  ;;  %p61_p1 = scmp.ne.s32.totalorder %s10419_s26, %s10415_s25 }
   0xd   : > { %p62_p2 = scmp.eq.s32.totalorder %s10423_s27, 0  ;;  %p67_p3 = scmp.ne.s32.totalorder %s10415_s25, %s10411_s24 }
   0xe   : > { %s10514_s9 = scalar_select %p52_p0, %s10419_s26, %s54_s8  }
   0xf   : > { %p10516_p4 = por %p62_p2, %p61_p1  ;;  %p11953_p5 = scmp.eq.s32.totalorder %s10501_s28, 0 }
  0x10   : > { %11958 = sst [smem:[#allocation22_spill]] %s10514_s9  ;;  %p7875_p6 = scmp.ge.s32.totalorder %s10423_s27, 1 }
  0x11   : > { %p209_p7 = scmp.lt.s32.totalorder %s10423_s27, 3  ;;  %p10525_p8 = por %p11953_p5, %p67_p3 }
  0x12   : > { %s10425_s13 = smov [#allocation8]   ;;  %p10108_p12 = scmp.lt.s32.totalorder %s10423_s27, 2 }
  0x13   : > { %s11960_s11 = scalar_select %p10525_p8, 1, 0 }
  0x14   : > { %p10530_p10 = pnand %p7875_p6, %p209_p7  ;;  %s233_s14 = sshll.u32 %s10425_s13, 4  ;;  %s234_s14 = int_to_ptr.vmem [resolvable:$true] %s233_s14 }
  0x15   : > { %s10426_s16 = smov [#allocation11]   ;;  %p10545_p0 = pnand %p10108_p12, %p10516_p4 }
  0x16   : > { %s11961_s12 = scalar_select %p10530_p10, 1, 0 }
  0x17   : > { %p10084_p11 = pneg %p10530_p10  ;;  %s244_s17 = sshll.u32 %s10426_s16, 4  ;;  %s10549_s17 = int_to_ptr.vmem [resolvable:$true] %s244_s17 }
  0x18   : > { %s11963_s18 = scalar_select %p10545_p0, 1, 0 }
  0x19   : > { %p10539_p13 = pnand %p10084_p11, %p11953_p5  ;;  %s10167_s21 = scalar_lea.hbm %s11947_s2, 512 }
  0x1a   : > { %p10168_p1 = scmp.ne.s32.totalorder %s11947_s2, %s10167_s21  ;;  %p10174_p6 = scmp.lt.u32.totalorder %s10167_s21, %s11947_s2 }
  0x1b   : > { %p10559_p2 = pneg %p10539_p13 }
  0x1d   : > { %p10170_p3 = pnand %p10559_p2, %p10168_p1 }
  0x1f   : > { %p10171_p4 = pneg %p10170_p3 }
  0x21   : > { %p10176_p7 = pnand %p10174_p6, %p10171_p4 }
  0x23   : > { %10179 = shalt.err (!%p10176_p7)
}
  0x24   : > { %s10180_s10 = scalar_lea.vmem %s234_s14, 512  ;;  %p10188_p5 = scmp.lt.s32.totalorder %s234_s14, %s234_s14 }
  0x25   : > { %p10181_p11 = scmp.ne.s32.totalorder %s234_s14, %s10180_s10  ;;  %p10189_p8 = scmp.lt.s32.totalorder %s10180_s10, %s10180_s10 }
  0x27   : > { %p10183_p12 = pnand %p10181_p11, %p10559_p2  ;;  %p10190_p10 = por %p10189_p8, %p10188_p5 }
  0x29   : > { %p10184_p9 = pneg %p10183_p12 }
  0x2b   : > { %p10191_p0 = pnand %p10190_p10, %p10184_p9 }
  0x2d   : > { %10194 = shalt.err (!%p10191_p0)
}
  0x2e   : > { %10090 = dma.hbm_to_vmem [thread:$0]  (!%p10539_p13), %s11947_s2, 512, %s234_s14, [#allocation7]  }
  0x2f   : > { %s10427_s19 = smov [#allocation3]   ;;  %s10195_s23 = scalar_lea.hbm %s11949_s4, 16 }
  0x30   : > { %s222_s20 = sshll.u32 %s10427_s19, 4  ;;  %p10196_p1 = scmp.ne.s32.totalorder %s11949_s4, %s10195_s23  ;;  %s223_s20 = int_to_ptr.vmem [resolvable:$true] %s222_s20 }
  0x31   : > { %p10202_p9 = scmp.lt.u32.totalorder %s10195_s23, %s11949_s4 }
  0x32   : > { %p10198_p5 = pnand %p10196_p1, %p10559_p2 }
  0x34   : > { %p10199_p8 = pneg %p10198_p5 }
  0x36   : > { %p10204_p10 = pnand %p10202_p9, %p10199_p8 }
  0x38   : > { %10207 = shalt.err (!%p10204_p10)
}
  0x39   : > { %s10208_s14 = scalar_lea.vmem %s10549_s17, 16  ;;  %s10215_s13 = scalar_lea.vmem %s10549_s17, 32 }
  0x3a   : > { %p10209_p0 = scmp.ne.s32.totalorder %s10549_s17, %s10208_s14  ;;  %p10216_p6 = scmp.lt.s32.totalorder %s10549_s17, %s10549_s17 }
  0x3b   : > { %p10217_p7 = scmp.lt.s32.totalorder %s10215_s13, %s10208_s14 }
  0x3c   : > { %p10211_p3 = pnand %p10209_p0, %p10559_p2 }
  0x3d   : > { %p10218_p11 = por %p10217_p7, %p10216_p6 }
  0x3e   : > { %p10212_p4 = pneg %p10211_p3 }
  0x40   : > { %p10219_p12 = pnand %p10218_p11, %p10212_p4 }
  0x42   : > { %10222 = shalt.err (!%p10219_p12)
}
  0x43   : > { %10093 = dma.hbm_to_vmem [thread:$0]  (!%p10539_p13), %s11949_s4, 16, %s10549_s17, [#allocation10]  }
  0x44   : > { %s11965_s0 = sld [smem:[#allocation23_spill]] }
  0x4a   : > { %s10223_s22 = scalar_lea.hbm %s11965_s0, 112 }
  0x4b   : > { %p10224_p1 = scmp.ne.s32.totalorder %s11965_s0, %s10223_s22  ;;  %p10230_p9 = scmp.lt.u32.totalorder %s10223_s22, %s11965_s0 }
  0x4d   : > { %p10226_p5 = pnand %p10224_p1, %p10559_p2 }
  0x4f   : > { %p10227_p8 = pneg %p10226_p5 }
  0x51   : > { %p10232_p10 = pnand %p10230_p9, %p10227_p8 }
  0x53   : > { %10235 = shalt.err (!%p10232_p10)
}
  0x54   : > { %s10236_s14 = scalar_lea.vmem %s223_s20, 112  ;;  %s10243_s17 = scalar_lea.vmem %s223_s20, 128 }
  0x55   : > { %p10237_p0 = scmp.ne.s32.totalorder %s223_s20, %s10236_s14  ;;  %p10244_p6 = scmp.lt.s32.totalorder %s223_s20, %s223_s20 }
  0x56   : > { %p10245_p7 = scmp.lt.s32.totalorder %s10243_s17, %s10236_s14 }
  0x57   : > { %p10239_p3 = pnand %p10237_p0, %p10559_p2 }
  0x58   : > { %p10246_p11 = por %p10245_p7, %p10244_p6 }
  0x59   : > { %p10240_p4 = pneg %p10239_p3 }
  0x5b   : > { %p10247_p12 = pnand %p10246_p11, %p10240_p4 }
  0x5d   : > { %10250 = shalt.err (!%p10247_p12)
}
  0x5e   : > { %10087 = dma.hbm_to_vmem [thread:$0]  (!%p10539_p13), %s11965_s0, 112, %s223_s20, [#allocation4]  }
  0x5f   : > { %s10428_s16 = smov [#allocation12]   ;;  %s269_s21 = sand.u32 1, %s10423_s27  }
  0x60   : > { %s258_s19 = sshll.u32 %s10428_s16, 4  ;;  %s10251_s30 = scalar_lea.hbm %s11951_s6, 16  ;;  %s259_s19 = int_to_ptr.vmem [resolvable:$true] %s258_s19 }
  0x61   : > { %p10252_p1 = scmp.ne.s32.totalorder %s11951_s6, %s10251_s30  ;;  %p10258_p9 = scmp.lt.u32.totalorder %s10251_s30, %s11951_s6 }
  0x63   : > { %p10254_p5 = pnand %p10252_p1, %p10559_p2 }
  0x65   : > { %p10255_p8 = pneg %p10254_p5 }
  0x67   : > { %p10260_p10 = pnand %p10258_p9, %p10255_p8 }
  0x69   : > { %10263 = shalt.err (!%p10260_p10)
}
  0x6a   : > { %s10264_s20 = scalar_lea.vmem %s259_s19, 16  ;;  %s10271_s13 = scalar_lea.vmem %s259_s19, 32 }
  0x6b   : > { %p10265_p0 = scmp.ne.s32.totalorder %s259_s19, %s10264_s20  ;;  %p10272_p6 = scmp.lt.s32.totalorder %s259_s19, %s259_s19 }
  0x6c   : > { %p10273_p7 = scmp.lt.s32.totalorder %s10271_s13, %s10264_s20 }
  0x6d   : > { %p10267_p3 = pnand %p10265_p0, %p10559_p2 }
  0x6e   : > { %p10274_p11 = por %p10273_p7, %p10272_p6 }
  0x6f   : > { %p10268_p4 = pneg %p10267_p3 }
  0x71   : > { %p10275_p12 = pnand %p10274_p11, %p10268_p4 }
  0x73   : > { %10278 = shalt.err (!%p10275_p12)
}
  0x74   : > { %10096 = dma.hbm_to_vmem [thread:$0]  (!%p10539_p13), %s11951_s6, 16, %s259_s19, [#allocation13]  }
  0x75   : > { %s271_s24 = sand.u32 1, %s10419_s26   ;;  %s8693_s22 = sshll.u32 %s10423_s27, 10 }
  0x76   : > { %s10058_s23 = smul.u32 6272, %s271_s24  ;;  %s10641_s10 = scalar_lea.hbm %s11946_s1, %s8693_s22 }
  0x77   : > { %s10645_s17 = sshll.u32 %s271_s24, 10  ;;  %s10649_s19 = scalar_lea.sflag [#allocation7], %s269_s21 }
  0x78   : > { %s273_s15 = scalar_lea.vmem [#allocation6], %s10058_s23  ;;  %s10279_s20 = scalar_lea.hbm %s10641_s10, 100352 }
  0x79   : > { %s280_s14 = sshll.u32 %s273_s15, 4  ;;  %p10280_p13 = scmp.ne.s32.totalorder %s10641_s10, %s10279_s20  ;;  %s10643_s14 = int_to_ptr.vmem [resolvable:$true] %s280_s14 }
  0x7a   : > { %p11966_p2 = scmp.ne.s32.totalorder %s11963_s18, 0  ;;  %s10284_s16 = scalar_lea.hbm %s11946_s1, 200704 }
  0x7b   : > { %p10285_p9 = scmp.lt.u32.totalorder %s10641_s10, %s11946_s1  ;;  %p10286_p10 = scmp.lt.u32.totalorder %s10284_s16, %s10279_s20 }
  0x7c   : > { %p10281_p1 = pneg %p11966_p2  ;;  %p10288_p3 = scmp.lt.u32.totalorder %s10279_s20, %s10641_s10 }
  0x7d   : > { %p10287_p0 = por %p10286_p10, %p10285_p9 }
  0x7e   : > { %p10282_p5 = pnand %p10281_p1, %p10280_p13 }
  0x7f   : > { %p10289_p4 = por %p10288_p3, %p10287_p0 }
  0x80   : > { %p10283_p8 = pneg %p10282_p5 }
  0x82   : > { %p10290_p6 = pnand %p10289_p4, %p10283_p8 }
  0x84   : > { %10293 = shalt.err (!%p10290_p6)
}
  0x85   : > { %s10294_s24 = scalar_lea.vmem %s10643_s14, 100352  ;;  %s10429_s30 = smov [#allocation6]  }
  0x86   : > { %p10295_p7 = scmp.ne.s32.totalorder %s10643_s14, %s10294_s24  ;;  %s10299_s8 = sshll.u32 %s10429_s30, 4  ;;  %s10300_s8 = int_to_ptr.vmem [resolvable:$false] %s10299_s8 }
  0x87   : > { %s10301_s15 = scalar_lea.vmem %s10300_s8, 200704  ;;  %p10302_p13 = scmp.lt.s32.totalorder %s10643_s14, %s10300_s8 }
  0x88   : > { %p10297_p11 = pnand %p10295_p7, %p10281_p1  ;;  %p10303_p5 = scmp.lt.s32.totalorder %s10301_s15, %s10294_s24 }
  0x8a   : > { %p10298_p12 = pneg %p10297_p11  ;;  %p10304_p9 = por %p10303_p5, %p10302_p13 }
  0x8c   : > { %p10305_p10 = pnand %p10304_p9, %p10298_p12 }
  0x8e   : > { %10308 = shalt.err (!%p10305_p10)
}
  0x8f   : > { %s10430_s20 = smov 2048   ;;  %s10431_s13 = smov 1024  }
  0x90   : > { %s10432_s9 = smov 64   ;;  %s8694_s16 = sshll.u32 %s10423_s27, 14 }
  0x91   : > { %10100 = dma.hbm_to_vmem [thread:$0]  (!%p11966_p2), %s10641_s10, 100352, %s10643_s14, %s10649_s19, %s10430_s20, %s10431_s13, %s10432_s9  }
  0x92   : > { %s10682_s24 = scalar_lea.hbm %s11948_s3, %s8694_s16  ;;  %s294_s30 = scalar_lea.vmem [#allocation9], %s10645_s17 }
  0x93   : > { %s301_s8 = sshll.u32 %s294_s30, 4  ;;  %s10689_s15 = scalar_lea.sflag [#allocation10], %s269_s21  ;;  %s10685_s8 = int_to_ptr.vmem [resolvable:$true] %s301_s8 }
  0x94   : > { %s10309_s0 = scalar_lea.hbm %s10682_s24, 16384  ;;  %s10314_s19 = scalar_lea.hbm %s11948_s3, 32768 }
  0x95   : > { %p10310_p8 = scmp.ne.s32.totalorder %s10682_s24, %s10309_s0  ;;  %p10315_p4 = scmp.lt.u32.totalorder %s10682_s24, %s11948_s3 }
  0x96   : > { %p10316_p6 = scmp.lt.u32.totalorder %s10314_s19, %s10309_s0  ;;  %p10318_p11 = scmp.lt.u32.totalorder %s10309_s0, %s10682_s24 }
  0x97   : > { %p10312_p0 = pnand %p10310_p8, %p10281_p1 }
  0x98   : > { %p10317_p7 = por %p10316_p6, %p10315_p4 }
  0x99   : > { %p10313_p3 = pneg %p10312_p0 }
  0x9a   : > { %p10319_p12 = por %p10318_p11, %p10317_p7 }
  0x9c   : > { %p10320_p13 = pnand %p10319_p12, %p10313_p3 }
  0x9e   : > { %10323 = shalt.err (!%p10320_p13)
}
  0x9f   : > { %s10324_s27 = scalar_lea.vmem %s10685_s8, 16384  ;;  %s10433_s21 = smov [#allocation9]  }
  0xa0   : > { %p10325_p5 = scmp.ne.s32.totalorder %s10685_s8, %s10324_s27  ;;  %s10329_s17 = sshll.u32 %s10433_s21, 4  ;;  %s10330_s17 = int_to_ptr.vmem [resolvable:$false] %s10329_s17 }
  0xa1   : > { %s10331_s16 = scalar_lea.vmem %s10330_s17, 32768  ;;  %p10332_p8 = scmp.lt.s32.totalorder %s10685_s8, %s10330_s17 }
  0xa2   : > { %p10327_p9 = pnand %p10325_p5, %p10281_p1  ;;  %p10333_p0 = scmp.lt.s32.totalorder %s10331_s16, %s10324_s27 }
  0xa4   : > { %p10328_p10 = pneg %p10327_p9  ;;  %p10334_p4 = por %p10333_p0, %p10332_p8 }
  0xa6   : > { %p10335_p6 = pnand %p10334_p4, %p10328_p10 }
  0xa8   : > { %10338 = shalt.err (!%p10335_p6)
}
  0xa9   : > { %s10434_s0 = smov 4   ;;  %p11967_p1 = scmp.ne.s32.totalorder %s11961_s12, 0 }
  0xaa   : > { %10103 = dma.hbm_to_vmem [thread:$0]  (!%p11966_p2), %s10682_s24, 16384, %s10685_s8, %s10689_s15, %s10432_s9, %s10432_s9, %s10434_s0  }
  0xab   : > { %313 = sbr.rel (%p11967_p1) target bundleno = 1744 (0x6d0), region = 48  ;;  %p11968_p3 = scmp.eq.s32.totalorder (!%p11967_p1), %s10501_s28, 0 }
  0xb2   : > { %10382 = dma.done.wait (%p11968_p3), [#allocation4], 112   ;;  %p11969_p7 = pmov %p11968_p3 }
  0xb3   : > { %s319_s22 = sand.u32 1, %s10501_s28   ;;  %s321_s18 = sand.u32 1, %s10415_s25  }
  0xb4   : > { %10384 = vsyncadd (%p11969_p7), [#allocation4], 4294967184  ;;  %s10059_s23 = smul.u32 6272, %s321_s18  ;;  %s320_s30 = scalar_lea.sflag [#allocation7], %s319_s22 }
  0xb5   : > { %p11970_p11 = scmp.ne.s32.totalorder %s11960_s11, 0 }
  0xb6   : > { %s10725_s10 = scalar_lea.vmem [#allocation6], %s10059_s23 }
  0xb7   : > { %10386 = dma.done.wait (%p11970_p11), %s320_s30, 100352  }
  0xb8   : > { %10388 = vsyncadd (%p11970_p11), %s320_s30, 4294866944  ;;  %p11971_p2 = pmov %p11968_p3 }
  0xba   : > { %10390 = dma.done.wait (%p11971_p2), [#allocation7], 512   ;;  %p11972_p12 = pmov %p11971_p2 }
  0xbb   : > { %s7889_s12 = sshll.u32 %s321_s18, 10  ;;  %s333_s9 = scalar_lea.sflag [#allocation10], %s319_s22 }
  0xbc   : > { %10392 = vsyncadd (%p11972_p12), [#allocation7], 4294966784  ;;  %s10735_s24 = scalar_lea.vmem [#allocation9], %s7889_s12 }
  0xbd   : > { %10394 = dma.done.wait (%p11970_p11), %s333_s9, 16384  }
  0xbe   : > { %10396 = vsyncadd (%p11970_p11), %s333_s9, 4294950912  ;;  %p11973_p13 = pmov %p11971_p2 }
  0xbf   : > { %p11974_p5 = pmov %p11971_p2 }
  0xc0   : > { %10398 = dma.done.wait (%p11973_p13), [#allocation10], 16  }
  0xc1   : > { %10400 = vsyncadd (%p11974_p5), [#allocation10], 4294967280  ;;  %p11975_p9 = pmov %p11971_p2 }
  0xc2   : > { %p11976_p10 = pmov %p11971_p2 }
  0xc3   : > { %10402 = dma.done.wait (%p11975_p9), [#allocation13], 16  }
  0xc4   : > { %10404 = vsyncadd (%p11976_p10), [#allocation13], 4294967280  ;;  %p11977_p8 = scmp.ne.s32.totalorder %s10501_s28, 0 }
  0xc5   : > { %v10435_v0 = vmov (!%p11977_p8), 0.0  }
  0xc6   : > { %381 = sbr.rel (%p11977_p8) target bundleno = 205 (0xcd), region = 76  ;;  %382 = vst [vmem:[#allocation2] sm:$0x3] (!%p11977_p8), %v10435_v0 }
  0xcd PF: > { %v390_v1 = vld [vmem:[%s10725_s10] sm:$0xff]  ;;  %v391_v3 = vld [vmem:[%s10725_s10 + $0x8] sm:$0xff]  ;;  %v1176_v33 = vlaneseq  ;;  %v10436_v34 = vmov 1966171168   ;;  %v10784_v60 = vld [vmem:[#allocation3] sm:$0x7f] }
  0xce   : > { %v398_v2 = vld [vmem:[%s10725_s10 + $0x40] sm:$0xff]  ;;  %v399_v5 = vld [vmem:[%s10725_s10 + $0x48] sm:$0xff]  ;;  %v1259_v35 = vunpack.c.l.s4 %v10436_v34  ;;  %vm5231_vm0 = vcmask 130048   ;;  %s7893_s11 = sshll.u32 %s10501_s28, 11  ;;  %p8686_p0 = scmp.ne.s32.totalorder %s10501_s28, 1 }
  0xcf   : > { %v7895_v4 = vcombine.high %v390_v1, %v398_v2  ;;  %v7894_v6 = vcombine.low %v390_v1, %v398_v2  ;;  %v406_v7 = vld [vmem:[%s10725_s10 + $0x80] sm:$0xff]  ;;  %v7897_v9 = vcombine.high %v391_v3, %v399_v5  ;;  %v7896_v10 = vcombine.low %v391_v3, %v399_v5  ;;  %v407_v12 = vld [vmem:[%s10725_s10 + $0x88] sm:$0xff]  ;;  %s11657_s8 = sshra.s32 %s7893_s11, 7 }
  0xd0   : > { %v414_v8 = vld [vmem:[%s10725_s10 + $0xc0] sm:$0xff]  ;;  %v415_v13 = vld [vmem:[%s10725_s10 + $0xc8] sm:$0xff]  ;;  %v10773_v44 = vshrl.u32 %v1176_v33, 7  ;;  %v1260_v45 = vunpack.c.0.s8 %v1259_v35  ;;  %s386_s15 = scalar_lea.vmem [#allocation8], %s11657_s8  ;;  %vm10439_vm1 = vmmov (!%p8686_p0), 0   ;;  %vm7751_vm2 = vcmask (!%p8686_p0), 9216  }
  0xd1   : > { %v7911_v11 = vcombine.high %v406_v7, %v414_v8  ;;  %v422_v14 = vld [vmem:[%s10725_s10 + $0x100] sm:$0xff]  ;;  %5235 = vmatprep.subr.bf16.mxu0 %v7895_v4  ;;  %v7913_v15 = vcombine.high %v407_v12, %v415_v13  ;;  %v423_v17 = vld [vmem:[%s10725_s10 + $0x108] sm:$0xff]  ;;  %5399 = vmatprep.subr.bf16.mxu1 %v7897_v9  ;;  %v7910_v19 = vcombine.low %v406_v7, %v414_v8 }
  0xd2   : > { %v430_v16 = vld [vmem:[%s10725_s10 + $0x140] sm:$0xff]  ;;  %v431_v18 = vld [vmem:[%s10725_s10 + $0x148] sm:$0xff]  ;;  %5236 = vmatpush1.bf16.msra.mxu0 %v7894_v6  ;;  %5400 = vmatpush1.bf16.msra.mxu1 %v7896_v10  ;;  %v7912_v20 = vcombine.low %v407_v12, %v415_v13  ;;  %v10780_v54 = vsub.s32 %v1260_v45, %v10773_v44 }
  0xd3   : > { %5237 = vmatprep.subr.bf16.mxu0 %v7911_v11  ;;  %v7927_v21 = vcombine.high %v422_v14, %v430_v16  ;;  %5401 = vmatprep.subr.bf16.mxu1 %v7913_v15  ;;  %v7929_v22 = vcombine.high %v423_v17, %v431_v18  ;;  %v438_v23 = vld [vmem:[%s10725_s10 + $0x180] sm:$0xff]  ;;  %v439_v25 = vld [vmem:[%s10725_s10 + $0x188] sm:$0xff]  ;;  %v7926_v27 = vcombine.low %v422_v14, %v430_v16 }
  0xd4   : > { %v446_v24 = vld [vmem:[%s10725_s10 + $0x1c0] sm:$0xff]  ;;  %v447_v26 = vld [vmem:[%s10725_s10 + $0x1c8] sm:$0xff]  ;;  %v7928_v28 = vcombine.low %v423_v17, %v431_v18  ;;  %v10790_v0 = vrot.slane %v10784_v60, %v10780_v54 }
  0xd5   : > { %v7943_v29 = vcombine.high %v438_v23, %v446_v24  ;;  %v7945_v30 = vcombine.high %v439_v25, %v447_v26  ;;  %v454_v31 = vld [vmem:[%s10725_s10 + $0x200] sm:$0xff]  ;;  %v455_v36 = vld [vmem:[%s10725_s10 + $0x208] sm:$0xff]  ;;  %v7942_v38 = vcombine.low %v438_v23, %v446_v24  ;;  %v7944_v39 = vcombine.low %v439_v25, %v447_v26 }
  0xd6   : > { %5238 = vmatpush1.bf16.msra.mxu0 %v7910_v19  ;;  %5402 = vmatpush1.bf16.msra.mxu1 %v7912_v20  ;;  %v462_v32 = vld [vmem:[%s10725_s10 + $0x240] sm:$0xff]  ;;  %v463_v37 = vld [vmem:[%s10725_s10 + $0x248] sm:$0xff]  ;;  %v1272_v4 = vcombine.high %v10790_v0, %v10790_v0 }
  0xd7   : > { %5239 = vmatprep.subr.bf16.mxu0 %v7927_v21  ;;  %5403 = vmatprep.subr.bf16.mxu1 %v7929_v22  ;;  %v7959_v40 = vcombine.high %v454_v31, %v462_v32  ;;  %v7961_v41 = vcombine.high %v455_v36, %v463_v37  ;;  %v470_v42 = vld [vmem:[%s10725_s10 + $0x280] sm:$0xff]  ;;  %v471_v46 = vld [vmem:[%s10725_s10 + $0x288] sm:$0xff]  ;;  %v7958_v48 = vcombine.low %v454_v31, %v462_v32 }
  0xd8   : > { %v478_v43 = vld [vmem:[%s10725_s10 + $0x2c0] sm:$0xff]  ;;  %v479_v47 = vld [vmem:[%s10725_s10 + $0x2c8] sm:$0xff]  ;;  %v7960_v49 = vcombine.low %v455_v36, %v463_v37  ;;  %v10799_v10 = vrot.slane %v1272_v4, %v10780_v54 }
  0xd9   : > { %v7975_v50 = vcombine.high %v470_v42, %v478_v43  ;;  %v7977_v51 = vcombine.high %v471_v46, %v479_v47  ;;  %v486_v52 = vld [vmem:[%s10725_s10 + $0x300] sm:$0xff]  ;;  %v487_v55 = vld [vmem:[%s10725_s10 + $0x308] sm:$0xff]  ;;  %v7974_v57 = vcombine.low %v470_v42, %v478_v43  ;;  %v7976_v58 = vcombine.low %v471_v46, %v479_v47 }
  0xda   : > { %5240 = vmatpush1.bf16.msra.mxu0 %v7926_v27  ;;  %5404 = vmatpush1.bf16.msra.mxu1 %v7928_v28  ;;  %v494_v53 = vld [vmem:[%s10725_s10 + $0x340] sm:$0xff]  ;;  %v495_v56 = vld [vmem:[%s10725_s10 + $0x348] sm:$0xff] }
  0xdb   : > { %5241 = vmatprep.subr.bf16.mxu0 %v7943_v29  ;;  %5405 = vmatprep.subr.bf16.mxu1 %v7945_v30  ;;  %v7991_v59 = vcombine.high %v486_v52, %v494_v53  ;;  %v7993_v61 = vcombine.high %v487_v55, %v495_v56  ;;  %v502_v62 = vld [vmem:[%s10725_s10 + $0x380] sm:$0xff]  ;;  %v503_v1 = vld [vmem:[%s10725_s10 + $0x388] sm:$0xff]  ;;  %v7990_v3 = vcombine.low %v486_v52, %v494_v53 }
  0xdc   : > { %v510_v63 = vld [vmem:[%s10725_s10 + $0x3c0] sm:$0xff]  ;;  %v511_v2 = vld [vmem:[%s10725_s10 + $0x3c8] sm:$0xff]  ;;  %v7992_v5 = vcombine.low %v487_v55, %v495_v56  ;;  %5267 = vmatprep.mubr.bf16.mxu0 %v10799_v10  ;;  %5431 = vmatprep.mubr.bf16.mxu1 %v10799_v10 }
  0xdd   : > { %v8007_v6 = vcombine.high %v502_v62, %v510_v63  ;;  %v8009_v7 = vcombine.high %v503_v1, %v511_v2  ;;  %v518_v8 = vld [vmem:[%s10725_s10 + $0x400] sm:$0xff]  ;;  %v519_v11 = vld [vmem:[%s10725_s10 + $0x408] sm:$0xff]  ;;  %v8006_v13 = vcombine.low %v502_v62, %v510_v63  ;;  %v8008_v14 = vcombine.low %v503_v1, %v511_v2 }
  0xde   : > { %5242 = vmatpush1.bf16.msra.mxu0 %v7942_v38  ;;  %5406 = vmatpush1.bf16.msra.mxu1 %v7944_v39  ;;  %v526_v9 = vld [vmem:[%s10725_s10 + $0x440] sm:$0xff]  ;;  %v527_v12 = vld [vmem:[%s10725_s10 + $0x448] sm:$0xff] }
  0xdf   : > { %5243 = vmatprep.subr.bf16.mxu0 %v7959_v40  ;;  %5407 = vmatprep.subr.bf16.mxu1 %v7961_v41  ;;  %v8023_v15 = vcombine.high %v518_v8, %v526_v9  ;;  %v8025_v16 = vcombine.high %v519_v11, %v527_v12  ;;  %v534_v17 = vld [vmem:[%s10725_s10 + $0x480] sm:$0xff]  ;;  %v535_v19 = vld [vmem:[%s10725_s10 + $0x488] sm:$0xff]  ;;  %v8022_v21 = vcombine.low %v518_v8, %v526_v9 }
  0xe0   : > { %v542_v18 = vld [vmem:[%s10725_s10 + $0x4c0] sm:$0xff]  ;;  %v543_v20 = vld [vmem:[%s10725_s10 + $0x4c8] sm:$0xff]  ;;  %v8024_v22 = vcombine.low %v519_v11, %v527_v12 }
  0xe1   : > { %v8039_v23 = vcombine.high %v534_v17, %v542_v18  ;;  %v8041_v24 = vcombine.high %v535_v19, %v543_v20  ;;  %v550_v25 = vld [vmem:[%s10725_s10 + $0x500] sm:$0xff]  ;;  %v551_v27 = vld [vmem:[%s10725_s10 + $0x508] sm:$0xff]  ;;  %v8038_v29 = vcombine.low %v534_v17, %v542_v18  ;;  %v8040_v30 = vcombine.low %v535_v19, %v543_v20 }
  0xe2   : > { %5244 = vmatpush1.bf16.msra.mxu0 %v7958_v48  ;;  %5408 = vmatpush1.bf16.msra.mxu1 %v7960_v49  ;;  %v558_v26 = vld [vmem:[%s10725_s10 + $0x540] sm:$0xff]  ;;  %v559_v28 = vld [vmem:[%s10725_s10 + $0x548] sm:$0xff]  ;;  %v1257_v19 = vcombine.high %v10784_v60, %v10784_v60 }
  0xe3   : > { %5245 = vmatprep.subr.bf16.mxu0 %v7975_v50  ;;  %5409 = vmatprep.subr.bf16.mxu1 %v7977_v51  ;;  %v8055_v31 = vcombine.high %v550_v25, %v558_v26  ;;  %v8057_v32 = vcombine.high %v551_v27, %v559_v28  ;;  %v566_v33 = vld [vmem:[%s10725_s10 + $0x580] sm:$0xff]  ;;  %v567_v35 = vld [vmem:[%s10725_s10 + $0x588] sm:$0xff]  ;;  %v8054_v37 = vcombine.low %v550_v25, %v558_v26 }
  0xe4   : > { %v574_v34 = vld [vmem:[%s10725_s10 + $0x5c0] sm:$0xff]  ;;  %v575_v36 = vld [vmem:[%s10725_s10 + $0x5c8] sm:$0xff]  ;;  %v8056_v38 = vcombine.low %v551_v27, %v559_v28  ;;  %v1271_v25 = vrot.slane %v1257_v19, %v10780_v54  ;;  %v10844_v26 = vrot.slane %v10790_v0, %v10780_v54 }
  0xe5   : > { %v8071_v39 = vcombine.high %v566_v33, %v574_v34  ;;  %v8073_v40 = vcombine.high %v567_v35, %v575_v36  ;;  %v582_v41 = vld [vmem:[%s10725_s10 + $0x600] sm:$0xff]  ;;  %v583_v43 = vld [vmem:[%s10725_s10 + $0x608] sm:$0xff]  ;;  %v8070_v46 = vcombine.low %v566_v33, %v574_v34  ;;  %v8072_v47 = vcombine.low %v567_v35, %v575_v36 }
  0xe6   : > { %5246 = vmatpush1.bf16.msra.mxu0 %v7974_v57  ;;  %5410 = vmatpush1.bf16.msra.mxu1 %v7976_v58  ;;  %v590_v42 = vld [vmem:[%s10725_s10 + $0x640] sm:$0xff]  ;;  %v591_v45 = vld [vmem:[%s10725_s10 + $0x648] sm:$0xff]  ;;  %v10855_v35 = vcombine.high %v10799_v10, %v10799_v10 }
  0xe7   : > { %5247 = vmatprep.subr.bf16.mxu0 %v7991_v59  ;;  %5411 = vmatprep.subr.bf16.mxu1 %v7993_v61  ;;  %v8087_v48 = vcombine.high %v582_v41, %v590_v42  ;;  %v8089_v49 = vcombine.high %v583_v43, %v591_v45  ;;  %v598_v50 = vld [vmem:[%s10725_s10 + $0x680] sm:$0xff]  ;;  %v599_v52 = vld [vmem:[%s10725_s10 + $0x688] sm:$0xff]  ;;  %v8086_v55 = vcombine.low %v582_v41, %v590_v42 }
  0xe8   : > { %v606_v51 = vld [vmem:[%s10725_s10 + $0x6c0] sm:$0xff]  ;;  %v607_v53 = vld [vmem:[%s10725_s10 + $0x6c8] sm:$0xff]  ;;  %v8088_v56 = vcombine.low %v583_v43, %v591_v45 }
  0xe9   : > { %v8103_v57 = vcombine.high %v598_v50, %v606_v51  ;;  %v8105_v58 = vcombine.high %v599_v52, %v607_v53  ;;  %v614_v59 = vld [vmem:[%s10725_s10 + $0x700] sm:$0xff]  ;;  %v615_v62 = vld [vmem:[%s10725_s10 + $0x708] sm:$0xff]  ;;  %v8102_v1 = vcombine.low %v598_v50, %v606_v51  ;;  %v8104_v2 = vcombine.low %v599_v52, %v607_v53 }
  0xea   : > { %5248 = vmatpush1.bf16.msra.mxu0 %v7990_v3  ;;  %5412 = vmatpush1.bf16.msra.mxu1 %v7992_v5  ;;  %v622_v61 = vld [vmem:[%s10725_s10 + $0x740] sm:$0xff]  ;;  %v623_v63 = vld [vmem:[%s10725_s10 + $0x748] sm:$0xff] }
  0xeb   : > { %5249 = vmatprep.subr.bf16.mxu0 %v8007_v6  ;;  %5413 = vmatprep.subr.bf16.mxu1 %v8009_v7  ;;  %v8119_v3 = vcombine.high %v614_v59, %v622_v61  ;;  %v8121_v4 = vcombine.high %v615_v62, %v623_v63  ;;  %v630_v5 = vld [vmem:[%s10725_s10 + $0x780] sm:$0xff]  ;;  %v631_v7 = vld [vmem:[%s10725_s10 + $0x788] sm:$0xff]  ;;  %v8118_v9 = vcombine.low %v614_v59, %v622_v61 }
  0xec   : > { %v638_v6 = vld [vmem:[%s10725_s10 + $0x7c0] sm:$0xff]  ;;  %v639_v8 = vld [vmem:[%s10725_s10 + $0x7c8] sm:$0xff]  ;;  %v8120_v11 = vcombine.low %v615_v62, %v623_v63 }
  0xed   : > { %v8135_v12 = vcombine.high %v630_v5, %v638_v6  ;;  %v655_v17 = vld [vmem:[%s10725_s10 + $0x848] sm:$0xff]  ;;  %v8134_v18 = vcombine.low %v630_v5, %v638_v6  ;;  %v8136_v20 = vcombine.low %v631_v7, %v639_v8  ;;  %v678_v34 = vld [vmem:[%s10725_s10 + $0x900] sm:$0xff] }
  0xee   : > { %5250 = vmatpush1.bf16.msra.mxu0 %v8006_v13  ;;  %5414 = vmatpush1.bf16.msra.mxu1 %v8008_v14  ;;  %v8137_v13 = vcombine.high %v631_v7, %v639_v8  ;;  %v646_v14 = vld [vmem:[%s10725_s10 + $0x800] sm:$0xff]  ;;  %v663_v27 = vld [vmem:[%s10725_s10 + $0x888] sm:$0xff] }
  0xef   : > { %5251 = vmatprep.subr.bf16.mxu0 %v8023_v15  ;;  %5415 = vmatprep.subr.bf16.mxu1 %v8025_v16  ;;  %v654_v15 = vld [vmem:[%s10725_s10 + $0x840] sm:$0xff]  ;;  %v647_v16 = vld [vmem:[%s10725_s10 + $0x808] sm:$0xff] }
  0xf0   : > { %v671_v28 = vld [vmem:[%s10725_s10 + $0x8c8] sm:$0xff]  ;;  %v8150_v60 = vcombine.low %v646_v14, %v654_v15  ;;  %v686_v0 = vld [vmem:[%s10725_s10 + $0x940] sm:$0xff] }
  0xf1   : > { %v8169_v33 = vcombine.high %v663_v27, %v671_v28  ;;  %v8183_v41 = vcombine.high %v678_v34, %v686_v0  ;;  %v702_v43 = vld [vmem:[%s10725_s10 + $0x9c0] sm:$0xff]  ;;  %v695_v45 = vld [vmem:[%s10725_s10 + $0x988] sm:$0xff] }
  0xf2   : > { %5252 = vmatpush1.bf16.msra.mxu0 %v8022_v21  ;;  %5416 = vmatpush1.bf16.msra.mxu1 %v8024_v22  ;;  %v8151_v21 = vcombine.high %v646_v14, %v654_v15  ;;  %v8153_v22 = vcombine.high %v647_v16, %v655_v17  ;;  %v710_v51 = vld [vmem:[%s10725_s10 + $0xa00] sm:$0xff]  ;;  %v711_v53 = vld [vmem:[%s10725_s10 + $0xa08] sm:$0xff] }
  0xf3   : > { %5253 = vmatprep.subr.bf16.mxu0 %v8039_v23  ;;  %5417 = vmatprep.subr.bf16.mxu1 %v8041_v24  ;;  %v662_v23 = vld [vmem:[%s10725_s10 + $0x880] sm:$0xff]  ;;  %v727_v63 = vld [vmem:[%s10725_s10 + $0xa88] sm:$0xff] }
  0xf4   : > { %v670_v24 = vld [vmem:[%s10725_s10 + $0x8c0] sm:$0xff]  ;;  %v743_v8 = vld [vmem:[%s10725_s10 + $0xb08] sm:$0xff] }
  0xf5   : > { %v718_v52 = vld [vmem:[%s10725_s10 + $0xa40] sm:$0xff] }
  0xf6   : > { %5254 = vmatpush1.bf16.msra.mxu0 %v8038_v29  ;;  %5418 = vmatpush1.bf16.msra.mxu1 %v8040_v30  ;;  %v1273_v29 = vcombine.high %v1271_v25, %v1271_v25  ;;  %v8152_v30 = vcombine.low %v647_v16, %v655_v17  ;;  %v726_v61 = vld [vmem:[%s10725_s10 + $0xa80] sm:$0xff]  ;;  %v759_v17 = vld [vmem:[%s10725_s10 + $0xb88] sm:$0xff] }
  0xf7   : > { %5255 = vmatprep.subr.bf16.mxu0 %v8055_v31  ;;  %5419 = vmatprep.subr.bf16.mxu1 %v8057_v32  ;;  %v8167_v31 = vcombine.high %v662_v23, %v670_v24  ;;  %v10849_v32 = vrot.slane %v1271_v25, %v10780_v54  ;;  %v734_v62 = vld [vmem:[%s10725_s10 + $0xac0] sm:$0xff]  ;;  %v775_v25 = vld [vmem:[%s10725_s10 + $0xc08] sm:$0xff] }
  0xf8   : > { %v10858_v36 = vrot.slane %v1273_v29, %v10780_v54  ;;  %v694_v54 = vld [vmem:[%s10725_s10 + $0x980] sm:$0xff] }
  0xf9   : > { %v742_v6 = vld [vmem:[%s10725_s10 + $0xb00] sm:$0xff] }
  0xfa   : > { %5256 = vmatpush1.bf16.msra.mxu0 %v8054_v37  ;;  %5420 = vmatpush1.bf16.msra.mxu1 %v8056_v38  ;;  %v679_v37 = vld [vmem:[%s10725_s10 + $0x908] sm:$0xff]  ;;  %v750_v7 = vld [vmem:[%s10725_s10 + $0xb40] sm:$0xff] }
  0xfb   : > { %5257 = vmatprep.subr.bf16.mxu0 %v8071_v39  ;;  %5421 = vmatprep.subr.bf16.mxu1 %v8073_v40  ;;  %v687_v38 = vld [vmem:[%s10725_s10 + $0x948] sm:$0xff]  ;;  %v8166_v39 = vcombine.low %v662_v23, %v670_v24  ;;  %v8168_v40 = vcombine.low %v663_v27, %v671_v28  ;;  %v758_v15 = vld [vmem:[%s10725_s10 + $0xb80] sm:$0xff]  ;;  %v8246_v19 = vcombine.low %v742_v6, %v750_v7 }
  0xfc   : > { %v8185_v42 = vcombine.high %v679_v37, %v687_v38  ;;  %v766_v16 = vld [vmem:[%s10725_s10 + $0xbc0] sm:$0xff]  ;;  %v783_v27 = vld [vmem:[%s10725_s10 + $0xc48] sm:$0xff] }
  0xfd   : > { %v774_v23 = vld [vmem:[%s10725_s10 + $0xc00] sm:$0xff]  ;;  %v8262_v28 = vcombine.low %v758_v15, %v766_v16 }
  0xfe   : > { %5258 = vmatpush1.bf16.msra.mxu0 %v8070_v46  ;;  %5422 = vmatpush1.bf16.msra.mxu1 %v8072_v47  ;;  %v703_v46 = vld [vmem:[%s10725_s10 + $0x9c8] sm:$0xff]  ;;  %v8182_v47 = vcombine.low %v678_v34, %v686_v0  ;;  %v782_v24 = vld [vmem:[%s10725_s10 + $0xc40] sm:$0xff] }
  0xff   : > { %5259 = vmatprep.subr.bf16.mxu0 %v8087_v48  ;;  %5423 = vmatprep.subr.bf16.mxu1 %v8089_v49  ;;  %v8184_v48 = vcombine.low %v679_v37, %v687_v38  ;;  %v8199_v49 = vcombine.high %v694_v54, %v702_v43  ;;  %v8201_v50 = vcombine.high %v695_v45, %v703_v46  ;;  %v791_v34 = vld [vmem:[%s10725_s10 + $0xc88] sm:$0xff] }
 0x100   : > { %v8279_v29 = vcombine.high %v774_v23, %v782_v24  ;;  %v799_v0 = vld [vmem:[%s10725_s10 + $0xcc8] sm:$0xff]  ;;  %v8278_v37 = vcombine.low %v774_v23, %v782_v24  ;;  %v8280_v38 = vcombine.low %v775_v25, %v783_v27 }
 0x101   : > { %v887_v23 = vld [vmem:[%s10725_s10 + $0xf88] sm:$0xff] }
 0x102   : > { %5260 = vmatpush1.bf16.msra.mxu0 %v8086_v55  ;;  %5424 = vmatpush1.bf16.msra.mxu1 %v8088_v56  ;;  %v719_v55 = vld [vmem:[%s10725_s10 + $0xa48] sm:$0xff]  ;;  %v8198_v56 = vcombine.low %v694_v54, %v702_v43 }
 0x103   : > { %5261 = vmatprep.subr.bf16.mxu0 %v8103_v57  ;;  %5425 = vmatprep.subr.bf16.mxu1 %v8105_v58  ;;  %v8200_v57 = vcombine.low %v695_v45, %v703_v46  ;;  %v8215_v58 = vcombine.high %v710_v51, %v718_v52  ;;  %v8217_v59 = vcombine.high %v711_v53, %v719_v55  ;;  %v807_v54 = vld [vmem:[%s10725_s10 + $0xd08] sm:$0xff] }
 0x104   : > { %v815_v43 = vld [vmem:[%s10725_s10 + $0xd48] sm:$0xff]  ;;  %v8296_v46 = vcombine.low %v791_v34, %v799_v0 }
 0x105   : > { %v895_v24 = vld [vmem:[%s10725_s10 + $0xfc8] sm:$0xff] }
 0x106   : > { %5262 = vmatpush1.bf16.msra.mxu0 %v8102_v1  ;;  %5426 = vmatpush1.bf16.msra.mxu1 %v8104_v2  ;;  %v735_v1 = vld [vmem:[%s10725_s10 + $0xac8] sm:$0xff]  ;;  %v8214_v2 = vcombine.low %v710_v51, %v718_v52 }
 0x107   : > { %5263 = vmatprep.subr.bf16.mxu0 %v8119_v3  ;;  %5427 = vmatprep.subr.bf16.mxu1 %v8121_v4  ;;  %v8216_v3 = vcombine.low %v711_v53, %v719_v55  ;;  %v8231_v4 = vcombine.high %v726_v61, %v734_v62  ;;  %v8233_v5 = vcombine.high %v727_v63, %v735_v1  ;;  %v823_v51 = vld [vmem:[%s10725_s10 + $0xd88] sm:$0xff] }
 0x108   : > { %v831_v52 = vld [vmem:[%s10725_s10 + $0xdc8] sm:$0xff]  ;;  %v8312_v55 = vcombine.low %v807_v54, %v815_v43 }
 0x10a   : > { %5264 = vmatpush1.bf16.msra.mxu0 %v8118_v9  ;;  %5428 = vmatpush1.bf16.msra.mxu1 %v8120_v11  ;;  %v751_v9 = vld [vmem:[%s10725_s10 + $0xb48] sm:$0xff]  ;;  %v8230_v11 = vcombine.low %v726_v61, %v734_v62 }
 0x10b   : > { %5265 = vmatprep.subr.bf16.mxu0 %v8135_v12  ;;  %5429 = vmatprep.subr.bf16.mxu1 %v8137_v13  ;;  %v8232_v12 = vcombine.low %v727_v63, %v735_v1  ;;  %v8247_v13 = vcombine.high %v742_v6, %v750_v7  ;;  %v8249_v14 = vcombine.high %v743_v8, %v751_v9  ;;  %v839_v61 = vld [vmem:[%s10725_s10 + $0xe08] sm:$0xff] }
 0x10c   : > { %v847_v62 = vld [vmem:[%s10725_s10 + $0xe48] sm:$0xff]  ;;  %v8328_v1 = vcombine.low %v823_v51, %v831_v52 }
 0x10d   : > { %v855_v6 = vld [vmem:[%s10725_s10 + $0xe88] sm:$0xff] }
 0x10e   : > { %5266 = vmatpush1.bf16.msra.mxu0 %v8134_v18  ;;  %5430 = vmatpush1.bf16.msra.mxu1 %v8136_v20  ;;  %v767_v18 = vld [vmem:[%s10725_s10 + $0xbc8] sm:$0xff]  ;;  %v8248_v20 = vcombine.low %v743_v8, %v751_v9  ;;  %v8344_v9 = vcombine.low %v839_v61, %v847_v62 }
 0x10f   : > { %5276 = vmatprep.subr.bf16.mxu0 %v8151_v21  ;;  %5440 = vmatprep.subr.bf16.mxu1 %v8153_v22  ;;  %v8263_v21 = vcombine.high %v758_v15, %v766_v16  ;;  %v8265_v22 = vcombine.high %v759_v17, %v767_v18  ;;  %v863_v7 = vld [vmem:[%s10725_s10 + $0xec8] sm:$0xff] }
 0x110   : > { %v871_v15 = vld [vmem:[%s10725_s10 + $0xf08] sm:$0xff] }
 0x111   : > { %5268 = vmatmul.mubr.bf16.vlgmr.msra.gmra.mrb[0].mxu0 %v10844_v26  ;;  %5432 = vmatmul.mubr.bf16.vlgmr.msra.gmra.mrb[0].mxu1 %v10844_v26  ;;  %v879_v16 = vld [vmem:[%s10725_s10 + $0xf48] sm:$0xff] }
 0x112   : > { %5277 = vmatpush1.bf16.msra.mxu0 %v8150_v60  ;;  %5441 = vmatpush1.bf16.msra.mxu1 %v8152_v30  ;;  %v8264_v60 = vcombine.low %v759_v17, %v767_v18  ;;  %v8281_v30 = vcombine.high %v775_v25, %v783_v27  ;;  %v8360_v18 = vcombine.low %v855_v6, %v863_v7 }
 0x113   : > { %5278 = vmatprep.subr.bf16.mxu0 %v8167_v31  ;;  %5442 = vmatprep.subr.bf16.mxu1 %v8169_v33  ;;  %v790_v31 = vld [vmem:[%s10725_s10 + $0xc80] sm:$0xff]  ;;  %v8376_v27 = vcombine.low %v871_v15, %v879_v16 }
 0x114   : > { %5308 = vmatprep.mubr.bf16.mxu0 %v10855_v35  ;;  %5472 = vmatprep.mubr.bf16.mxu1 %v10855_v35  ;;  %v798_v33 = vld [vmem:[%s10725_s10 + $0xcc0] sm:$0xff] }
 0x115   : > { %v8294_v45 = vcombine.low %v790_v31, %v798_v33 }
 0x116   : > { %5279 = vmatpush1.bf16.msra.mxu0 %v8166_v39  ;;  %5443 = vmatpush1.bf16.msra.mxu1 %v8168_v40  ;;  %v8295_v39 = vcombine.high %v790_v31, %v798_v33  ;;  %v8297_v40 = vcombine.high %v791_v34, %v799_v0  ;;  %v903_v31 = vld [vmem:[%s10725_s10 + $0x1008] sm:$0xff]  ;;  %v8392_v0 = vcombine.low %v887_v23, %v895_v24 }
 0x117   : > { %5280 = vmatprep.subr.bf16.mxu0 %v8183_v41  ;;  %5444 = vmatprep.subr.bf16.mxu1 %v8185_v42  ;;  %v806_v41 = vld [vmem:[%s10725_s10 + $0xd00] sm:$0xff]  ;;  %v911_v33 = vld [vmem:[%s10725_s10 + $0x1048] sm:$0xff] }
 0x118   : > { %v814_v42 = vld [vmem:[%s10725_s10 + $0xd40] sm:$0xff] }
 0x119   : > { %v8310_v53 = vcombine.low %v806_v41, %v814_v42 }
 0x11a   : > { %5281 = vmatpush1.bf16.msra.mxu0 %v8182_v47  ;;  %5445 = vmatpush1.bf16.msra.mxu1 %v8184_v48  ;;  %v8311_v47 = vcombine.high %v806_v41, %v814_v42  ;;  %v8313_v48 = vcombine.high %v807_v54, %v815_v43  ;;  %v10926_v41 = vcombine.high %v10844_v26, %v10844_v26  ;;  %v919_v42 = vld [vmem:[%s10725_s10 + $0x1088] sm:$0xff] }
 0x11b   : > { %5282 = vmatprep.subr.bf16.mxu0 %v8199_v49  ;;  %5446 = vmatprep.subr.bf16.mxu1 %v8201_v50  ;;  %v822_v49 = vld [vmem:[%s10725_s10 + $0xd80] sm:$0xff]  ;;  %v927_v54 = vld [vmem:[%s10725_s10 + $0x10c8] sm:$0xff] }
 0x11c   : > { %v830_v50 = vld [vmem:[%s10725_s10 + $0xdc0] sm:$0xff] }
 0x11d   : > { %v8326_v63 = vcombine.low %v822_v49, %v830_v50 }
 0x11e   : > { %5283 = vmatpush1.bf16.msra.mxu0 %v8198_v56  ;;  %5447 = vmatpush1.bf16.msra.mxu1 %v8200_v57  ;;  %v8327_v56 = vcombine.high %v822_v49, %v830_v50  ;;  %v8329_v57 = vcombine.high %v823_v51, %v831_v52  ;;  %v942_v49 = vld [vmem:[%s10725_s10 + $0x1140] sm:$0xff]  ;;  %v935_v50 = vld [vmem:[%s10725_s10 + $0x1108] sm:$0xff] }
 0x11f   : > { %5284 = vmatprep.subr.bf16.mxu0 %v8215_v58  ;;  %5448 = vmatprep.subr.bf16.mxu1 %v8217_v59  ;;  %v838_v58 = vld [vmem:[%s10725_s10 + $0xe00] sm:$0xff]  ;;  %v943_v51 = vld [vmem:[%s10725_s10 + $0x1148] sm:$0xff] }
 0x120   : > { %v846_v59 = vld [vmem:[%s10725_s10 + $0xe40] sm:$0xff] }
 0x121   : > { %v8342_v8 = vcombine.low %v838_v58, %v846_v59 }
 0x122   : > { %5285 = vmatpush1.bf16.msra.mxu0 %v8214_v2  ;;  %5449 = vmatpush1.bf16.msra.mxu1 %v8216_v3  ;;  %v8343_v2 = vcombine.high %v838_v58, %v846_v59  ;;  %v8345_v3 = vcombine.high %v839_v61, %v847_v62  ;;  %v958_v58 = vld [vmem:[%s10725_s10 + $0x11c0] sm:$0xff]  ;;  %v951_v59 = vld [vmem:[%s10725_s10 + $0x1188] sm:$0xff] }
 0x123   : > { %5286 = vmatprep.subr.bf16.mxu0 %v8231_v4  ;;  %5450 = vmatprep.subr.bf16.mxu1 %v8233_v5  ;;  %v854_v4 = vld [vmem:[%s10725_s10 + $0xe80] sm:$0xff]  ;;  %v959_v61 = vld [vmem:[%s10725_s10 + $0x11c8] sm:$0xff] }
 0x124   : > { %v862_v5 = vld [vmem:[%s10725_s10 + $0xec0] sm:$0xff] }
 0x125   : > { %v8358_v17 = vcombine.low %v854_v4, %v862_v5 }
 0x126   : > { %5287 = vmatpush1.bf16.msra.mxu0 %v8230_v11  ;;  %5451 = vmatpush1.bf16.msra.mxu1 %v8232_v12  ;;  %v8359_v11 = vcombine.high %v854_v4, %v862_v5  ;;  %v8361_v12 = vcombine.high %v855_v6, %v863_v7  ;;  %v974_v4 = vld [vmem:[%s10725_s10 + $0x1240] sm:$0xff]  ;;  %v967_v5 = vld [vmem:[%s10725_s10 + $0x1208] sm:$0xff] }
 0x127   : > { %5288 = vmatprep.subr.bf16.mxu0 %v8247_v13  ;;  %5452 = vmatprep.subr.bf16.mxu1 %v8249_v14  ;;  %v870_v13 = vld [vmem:[%s10725_s10 + $0xf00] sm:$0xff]  ;;  %v975_v6 = vld [vmem:[%s10725_s10 + $0x1248] sm:$0xff] }
 0x128   : > { %v878_v14 = vld [vmem:[%s10725_s10 + $0xf40] sm:$0xff] }
 0x129   : > { %v8374_v25 = vcombine.low %v870_v13, %v878_v14 }
 0x12a   : > { %5289 = vmatpush1.bf16.msra.mxu0 %v8246_v19  ;;  %5453 = vmatpush1.bf16.msra.mxu1 %v8248_v20  ;;  %v8375_v19 = vcombine.high %v870_v13, %v878_v14  ;;  %v8377_v20 = vcombine.high %v871_v15, %v879_v16  ;;  %v990_v13 = vld [vmem:[%s10725_s10 + $0x12c0] sm:$0xff]  ;;  %v983_v14 = vld [vmem:[%s10725_s10 + $0x1288] sm:$0xff] }
 0x12b   : > { %5290 = vmatprep.subr.bf16.mxu0 %v8263_v21  ;;  %5454 = vmatprep.subr.bf16.mxu1 %v8265_v22  ;;  %v886_v21 = vld [vmem:[%s10725_s10 + $0xf80] sm:$0xff]  ;;  %v991_v15 = vld [vmem:[%s10725_s10 + $0x12c8] sm:$0xff] }
 0x12c   : > { %v894_v22 = vld [vmem:[%s10725_s10 + $0xfc0] sm:$0xff] }
 0x12d   : > { %v8390_v34 = vcombine.low %v886_v21, %v894_v22 }
 0x12e   : > { %5291 = vmatpush1.bf16.msra.mxu0 %v8262_v28  ;;  %5455 = vmatpush1.bf16.msra.mxu1 %v8264_v60  ;;  %v8391_v28 = vcombine.high %v886_v21, %v894_v22  ;;  %v8393_v60 = vcombine.high %v887_v23, %v895_v24  ;;  %v1006_v21 = vld [vmem:[%s10725_s10 + $0x1340] sm:$0xff]  ;;  %v999_v22 = vld [vmem:[%s10725_s10 + $0x1308] sm:$0xff] }
 0x12f   : > { %5292 = vmatprep.subr.bf16.mxu0 %v8279_v29  ;;  %5456 = vmatprep.subr.bf16.mxu1 %v8281_v30  ;;  %v902_v29 = vld [vmem:[%s10725_s10 + $0x1000] sm:$0xff]  ;;  %v1007_v23 = vld [vmem:[%s10725_s10 + $0x1348] sm:$0xff] }
 0x130   : > { %v910_v30 = vld [vmem:[%s10725_s10 + $0x1040] sm:$0xff] }
 0x131   : > { %v8406_v43 = vcombine.low %v902_v29, %v910_v30 }
 0x132   : > { %5293 = vmatpush1.bf16.msra.mxu0 %v8278_v37  ;;  %5457 = vmatpush1.bf16.msra.mxu1 %v8280_v38  ;;  %v8407_v37 = vcombine.high %v902_v29, %v910_v30  ;;  %v8409_v38 = vcombine.high %v903_v31, %v911_v33  ;;  %v1022_v29 = vld [vmem:[%s10725_s10 + $0x13c0] sm:$0xff]  ;;  %v1015_v30 = vld [vmem:[%s10725_s10 + $0x1388] sm:$0xff] }
 0x133   : > { %5294 = vmatprep.subr.bf16.mxu0 %v8295_v39  ;;  %5458 = vmatprep.subr.bf16.mxu1 %v8297_v40  ;;  %v918_v39 = vld [vmem:[%s10725_s10 + $0x1080] sm:$0xff] }
 0x134   : > { %v926_v40 = vld [vmem:[%s10725_s10 + $0x10c0] sm:$0xff] }
 0x135   : > { %v8422_v52 = vcombine.low %v918_v39, %v926_v40 }
 0x136   : > { %5295 = vmatpush1.bf16.msra.mxu0 %v8294_v45  ;;  %5459 = vmatpush1.bf16.msra.mxu1 %v8296_v46  ;;  %v8408_v45 = vcombine.low %v903_v31, %v911_v33  ;;  %v8423_v46 = vcombine.high %v918_v39, %v926_v40  ;;  %v1023_v31 = vld [vmem:[%s10725_s10 + $0x13c8] sm:$0xff]  ;;  %v1038_v39 = vld [vmem:[%s10725_s10 + $0x1440] sm:$0xff] }
 0x137   : > { %5296 = vmatprep.subr.bf16.mxu0 %v8311_v47  ;;  %5460 = vmatprep.subr.bf16.mxu1 %v8313_v48  ;;  %v8425_v47 = vcombine.high %v919_v42, %v927_v54  ;;  %v934_v48 = vld [vmem:[%s10725_s10 + $0x1100] sm:$0xff]  ;;  %v1031_v40 = vld [vmem:[%s10725_s10 + $0x1408] sm:$0xff] }
 0x138   : > { %v8438_v62 = vcombine.low %v934_v48, %v942_v49 }
 0x13a   : > { %5297 = vmatpush1.bf16.msra.mxu0 %v8310_v53  ;;  %5461 = vmatpush1.bf16.msra.mxu1 %v8312_v55  ;;  %v8424_v53 = vcombine.low %v919_v42, %v927_v54  ;;  %v8439_v55 = vcombine.high %v934_v48, %v942_v49  ;;  %v1039_v42 = vld [vmem:[%s10725_s10 + $0x1448] sm:$0xff]  ;;  %v1054_v48 = vld [vmem:[%s10725_s10 + $0x14c0] sm:$0xff] }
 0x13b   : > { %5298 = vmatprep.subr.bf16.mxu0 %v8327_v56  ;;  %5462 = vmatprep.subr.bf16.mxu1 %v8329_v57  ;;  %v8441_v56 = vcombine.high %v935_v50, %v943_v51  ;;  %v950_v57 = vld [vmem:[%s10725_s10 + $0x1180] sm:$0xff]  ;;  %v1047_v49 = vld [vmem:[%s10725_s10 + $0x1488] sm:$0xff] }
 0x13c   : > { %v8454_v7 = vcombine.low %v950_v57, %v958_v58 }
 0x13e   : > { %5299 = vmatpush1.bf16.msra.mxu0 %v8326_v63  ;;  %5463 = vmatpush1.bf16.msra.mxu1 %v8328_v1  ;;  %v8440_v63 = vcombine.low %v935_v50, %v943_v51  ;;  %v8455_v1 = vcombine.high %v950_v57, %v958_v58  ;;  %v1055_v50 = vld [vmem:[%s10725_s10 + $0x14c8] sm:$0xff]  ;;  %v1070_v57 = vld [vmem:[%s10725_s10 + $0x1540] sm:$0xff] }
 0x13f   : > { %5300 = vmatprep.subr.bf16.mxu0 %v8343_v2  ;;  %5464 = vmatprep.subr.bf16.mxu1 %v8345_v3  ;;  %v8457_v2 = vcombine.high %v951_v59, %v959_v61  ;;  %v966_v3 = vld [vmem:[%s10725_s10 + $0x1200] sm:$0xff]  ;;  %v1063_v58 = vld [vmem:[%s10725_s10 + $0x1508] sm:$0xff] }
 0x140   : > { %v8470_v16 = vcombine.low %v966_v3, %v974_v4 }
 0x142   : > { %5301 = vmatpush1.bf16.msra.mxu0 %v8342_v8  ;;  %5465 = vmatpush1.bf16.msra.mxu1 %v8344_v9  ;;  %v8456_v8 = vcombine.low %v951_v59, %v959_v61  ;;  %v8471_v9 = vcombine.high %v966_v3, %v974_v4  ;;  %v1071_v59 = vld [vmem:[%s10725_s10 + $0x1548] sm:$0xff]  ;;  %v1086_v3 = vld [vmem:[%s10725_s10 + $0x15c0] sm:$0xff] }
 0x143   : > { %5302 = vmatprep.subr.bf16.mxu0 %v8359_v11  ;;  %5466 = vmatprep.subr.bf16.mxu1 %v8361_v12  ;;  %v8473_v11 = vcombine.high %v967_v5, %v975_v6  ;;  %v982_v12 = vld [vmem:[%s10725_s10 + $0x1280] sm:$0xff]  ;;  %v1079_v4 = vld [vmem:[%s10725_s10 + $0x1588] sm:$0xff] }
 0x144   : > { %v8486_v24 = vcombine.low %v982_v12, %v990_v13 }
 0x146   : > { %5303 = vmatpush1.bf16.msra.mxu0 %v8358_v17  ;;  %5467 = vmatpush1.bf16.msra.mxu1 %v8360_v18  ;;  %v8472_v17 = vcombine.low %v967_v5, %v975_v6  ;;  %v8487_v18 = vcombine.high %v982_v12, %v990_v13  ;;  %v1087_v5 = vld [vmem:[%s10725_s10 + $0x15c8] sm:$0xff]  ;;  %v1102_v12 = vld [vmem:[%s10725_s10 + $0x1640] sm:$0xff] }
 0x147   : > { %5304 = vmatprep.subr.bf16.mxu0 %v8375_v19  ;;  %5468 = vmatprep.subr.bf16.mxu1 %v8377_v20  ;;  %v8489_v19 = vcombine.high %v983_v14, %v991_v15  ;;  %v998_v20 = vld [vmem:[%s10725_s10 + $0x1300] sm:$0xff]  ;;  %v1095_v13 = vld [vmem:[%s10725_s10 + $0x1608] sm:$0xff] }
 0x148   : > { %v8502_v33 = vcombine.low %v998_v20, %v1006_v21 }
 0x14a   : > { %5305 = vmatpush1.bf16.msra.mxu0 %v8374_v25  ;;  %5469 = vmatpush1.bf16.msra.mxu1 %v8376_v27  ;;  %v8488_v25 = vcombine.low %v983_v14, %v991_v15  ;;  %v8503_v27 = vcombine.high %v998_v20, %v1006_v21  ;;  %v1103_v14 = vld [vmem:[%s10725_s10 + $0x1648] sm:$0xff]  ;;  %v1118_v20 = vld [vmem:[%s10725_s10 + $0x16c0] sm:$0xff] }
 0x14b   : > { %5306 = vmatprep.subr.bf16.mxu0 %v8391_v28  ;;  %5470 = vmatprep.subr.bf16.mxu1 %v8393_v60  ;;  %v8505_v28 = vcombine.high %v999_v22, %v1007_v23  ;;  %v1014_v60 = vld [vmem:[%s10725_s10 + $0x1380] sm:$0xff]  ;;  %v1111_v21 = vld [vmem:[%s10725_s10 + $0x1688] sm:$0xff] }
 0x14c   : > { %v8518_v54 = vcombine.low %v1014_v60, %v1022_v29 }
 0x14e   : > { %5307 = vmatpush1.bf16.msra.mxu0 %v8390_v34  ;;  %5471 = vmatpush1.bf16.msra.mxu1 %v8392_v0  ;;  %v8504_v34 = vcombine.low %v999_v22, %v1007_v23  ;;  %v8519_v0 = vcombine.high %v1014_v60, %v1022_v29  ;;  %v1119_v22 = vld [vmem:[%s10725_s10 + $0x16c8] sm:$0xff]  ;;  %v1134_v60 = vld [vmem:[%s10725_s10 + $0x1740] sm:$0xff] }
 0x14f   : > { %5317 = vmatprep.subr.bf16.mxu0 %v8407_v37  ;;  %5481 = vmatprep.subr.bf16.mxu1 %v8409_v38  ;;  %v8521_v37 = vcombine.high %v1015_v30, %v1023_v31  ;;  %v1030_v38 = vld [vmem:[%s10725_s10 + $0x1400] sm:$0xff]  ;;  %v1127_v29 = vld [vmem:[%s10725_s10 + $0x1708] sm:$0xff] }
 0x150   : > { %v8534_v51 = vcombine.low %v1030_v38, %v1038_v39 }
 0x151   : > { %5309 = vmatmul.mubr.bf16.vlgmr.msra.gmra.mrb[0].mxu0 %v10926_v41  ;;  %5473 = vmatmul.mubr.bf16.vlgmr.msra.gmra.mrb[0].mxu1 %v10926_v41 }
 0x152   : > { %5318 = vmatpush1.bf16.msra.mxu0 %v8406_v43  ;;  %5482 = vmatpush1.bf16.msra.mxu1 %v8408_v45  ;;  %v8520_v43 = vcombine.low %v1015_v30, %v1023_v31  ;;  %v8535_v45 = vcombine.high %v1030_v38, %v1038_v39  ;;  %v1135_v30 = vld [vmem:[%s10725_s10 + $0x1748] sm:$0xff]  ;;  %v1150_v38 = vld [vmem:[%s10725_s10 + $0x17c0] sm:$0xff] }
 0x153   : > { %5319 = vmatprep.subr.bf16.mxu0 %v8423_v46  ;;  %5483 = vmatprep.subr.bf16.mxu1 %v8425_v47  ;;  %v8537_v46 = vcombine.high %v1031_v40, %v1039_v42  ;;  %v1046_v47 = vld [vmem:[%s10725_s10 + $0x1480] sm:$0xff]  ;;  %v1143_v39 = vld [vmem:[%s10725_s10 + $0x1788] sm:$0xff] }
 0x154   : > { %5349 = vmatprep.mubr.bf16.mxu0 %v10858_v36  ;;  %5513 = vmatprep.mubr.bf16.mxu1 %v10858_v36  ;;  %v8550_v61 = vcombine.low %v1046_v47, %v1054_v48 }
 0x156   : > { %5320 = vmatpush1.bf16.msra.mxu0 %v8422_v52  ;;  %5484 = vmatpush1.bf16.msra.mxu1 %v8424_v53  ;;  %v8536_v52 = vcombine.low %v1031_v40, %v1039_v42  ;;  %v8551_v53 = vcombine.high %v1046_v47, %v1054_v48  ;;  %v1151_v40 = vld [vmem:[%s10725_s10 + $0x17c8] sm:$0xff]  ;;  %v1166_v47 = vld [vmem:[%s10725_s10 + $0x1840] sm:$0xff] }
 0x157   : > { %5321 = vmatprep.subr.bf16.mxu0 %v8439_v55  ;;  %5485 = vmatprep.subr.bf16.mxu1 %v8441_v56  ;;  %v8553_v55 = vcombine.high %v1047_v49, %v1055_v50  ;;  %v1062_v56 = vld [vmem:[%s10725_s10 + $0x1500] sm:$0xff]  ;;  %v1159_v48 = vld [vmem:[%s10725_s10 + $0x1808] sm:$0xff] }
 0x158   : > { %v8566_v6 = vcombine.low %v1062_v56, %v1070_v57 }
 0x15a   : > { %5322 = vmatpush1.bf16.msra.mxu0 %v8438_v62  ;;  %5486 = vmatpush1.bf16.msra.mxu1 %v8440_v63  ;;  %v8552_v62 = vcombine.low %v1047_v49, %v1055_v50  ;;  %v8567_v63 = vcombine.high %v1062_v56, %v1070_v57  ;;  %v1167_v49 = vld [vmem:[%s10725_s10 + $0x1848] sm:$0xff]  ;;  %v400_v56 = vld [vmem:[%s10725_s10 + $0x50] sm:$0xff] }
 0x15b   : > { %5323 = vmatprep.subr.bf16.mxu0 %v8455_v1  ;;  %5487 = vmatprep.subr.bf16.mxu1 %v8457_v2  ;;  %v8569_v1 = vcombine.high %v1063_v58, %v1071_v59  ;;  %v1078_v2 = vld [vmem:[%s10725_s10 + $0x1580] sm:$0xff] }
 0x15c   : > { %v8582_v15 = vcombine.low %v1078_v2, %v1086_v3 }
 0x15e   : > { %5324 = vmatpush1.bf16.msra.mxu0 %v8454_v7  ;;  %5488 = vmatpush1.bf16.msra.mxu1 %v8456_v8  ;;  %v8568_v7 = vcombine.low %v1063_v58, %v1071_v59  ;;  %v8583_v8 = vcombine.high %v1078_v2, %v1086_v3  ;;  %v393_v58 = vld [vmem:[%s10725_s10 + $0x18] sm:$0xff]  ;;  %v408_v2 = vld [vmem:[%s10725_s10 + $0x90] sm:$0xff] }
 0x15f   : > { %5325 = vmatprep.subr.bf16.mxu0 %v8471_v9  ;;  %5489 = vmatprep.subr.bf16.mxu1 %v8473_v11  ;;  %v8585_v9 = vcombine.high %v1079_v4, %v1087_v5  ;;  %v1094_v11 = vld [vmem:[%s10725_s10 + $0x1600] sm:$0xff]  ;;  %v401_v59 = vld [vmem:[%s10725_s10 + $0x58] sm:$0xff]  ;;  %v416_v3 = vld [vmem:[%s10725_s10 + $0xd0] sm:$0xff] }
 0x160   : > { %v8598_v23 = vcombine.low %v1094_v11, %v1102_v12 }
 0x162   : > { %5326 = vmatpush1.bf16.msra.mxu0 %v8470_v16  ;;  %5490 = vmatpush1.bf16.msra.mxu1 %v8472_v17  ;;  %v8584_v16 = vcombine.low %v1079_v4, %v1087_v5  ;;  %v8599_v17 = vcombine.high %v1094_v11, %v1102_v12  ;;  %v11006_v4 = vcombine.high %v10849_v32, %v10849_v32  ;;  %v409_v5 = vld [vmem:[%s10725_s10 + $0x98] sm:$0xff]  ;;  %v424_v12 = vld [vmem:[%s10725_s10 + $0x110] sm:$0xff] }
 0x163   : > { %5327 = vmatprep.subr.bf16.mxu0 %v8487_v18  ;;  %5491 = vmatprep.subr.bf16.mxu1 %v8489_v19  ;;  %v8601_v18 = vcombine.high %v1095_v13, %v1103_v14  ;;  %v1110_v19 = vld [vmem:[%s10725_s10 + $0x1680] sm:$0xff] }
 0x164   : > { %v8614_v31 = vcombine.low %v1110_v19, %v1118_v20 }
 0x166   : > { %5328 = vmatpush1.bf16.msra.mxu0 %v8486_v24  ;;  %5492 = vmatpush1.bf16.msra.mxu1 %v8488_v25  ;;  %v8600_v24 = vcombine.low %v1095_v13, %v1103_v14  ;;  %v8615_v25 = vcombine.high %v1110_v19, %v1118_v20  ;;  %v432_v13 = vld [vmem:[%s10725_s10 + $0x150] sm:$0xff]  ;;  %v425_v14 = vld [vmem:[%s10725_s10 + $0x118] sm:$0xff] }
 0x167   : > { %5329 = vmatprep.subr.bf16.mxu0 %v8503_v27  ;;  %5493 = vmatprep.subr.bf16.mxu1 %v8505_v28  ;;  %v8617_v27 = vcombine.high %v1111_v21, %v1119_v22  ;;  %v1126_v28 = vld [vmem:[%s10725_s10 + $0x1700] sm:$0xff]  ;;  %v440_v20 = vld [vmem:[%s10725_s10 + $0x190] sm:$0xff] }
 0x168   : > { %v8630_v42 = vcombine.low %v1126_v28, %v1134_v60 }
 0x16a   : > { %5330 = vmatpush1.bf16.msra.mxu0 %v8502_v33  ;;  %5494 = vmatpush1.bf16.msra.mxu1 %v8504_v34  ;;  %v8616_v33 = vcombine.low %v1111_v21, %v1119_v22  ;;  %v8631_v34 = vcombine.high %v1126_v28, %v1134_v60  ;;  %v448_v21 = vld [vmem:[%s10725_s10 + $0x1d0] sm:$0xff]  ;;  %v441_v22 = vld [vmem:[%s10725_s10 + $0x198] sm:$0xff] }
 0x16b   : > { %5331 = vmatprep.subr.bf16.mxu0 %v8519_v0  ;;  %5495 = vmatprep.subr.bf16.mxu1 %v8521_v37  ;;  %v8633_v0 = vcombine.high %v1127_v29, %v1135_v30  ;;  %v1142_v37 = vld [vmem:[%s10725_s10 + $0x1780] sm:$0xff]  ;;  %v456_v60 = vld [vmem:[%s10725_s10 + $0x210] sm:$0xff] }
 0x16c   : > { %v8646_v50 = vcombine.low %v1142_v37, %v1150_v38 }
 0x16e   : > { %5332 = vmatpush1.bf16.msra.mxu0 %v8518_v54  ;;  %5496 = vmatpush1.bf16.msra.mxu1 %v8520_v43  ;;  %v8632_v54 = vcombine.low %v1127_v29, %v1135_v30  ;;  %v8647_v43 = vcombine.high %v1142_v37, %v1150_v38  ;;  %v464_v29 = vld [vmem:[%s10725_s10 + $0x250] sm:$0xff]  ;;  %v457_v30 = vld [vmem:[%s10725_s10 + $0x218] sm:$0xff] }
 0x16f   : > { %5333 = vmatprep.subr.bf16.mxu0 %v8535_v45  ;;  %5497 = vmatprep.subr.bf16.mxu1 %v8537_v46  ;;  %v8649_v45 = vcombine.high %v1143_v39, %v1151_v40  ;;  %v1158_v46 = vld [vmem:[%s10725_s10 + $0x1800] sm:$0xff]  ;;  %v472_v38 = vld [vmem:[%s10725_s10 + $0x290] sm:$0xff] }
 0x170   : > { %v8662_v57 = vcombine.low %v1158_v46, %v1166_v47 }
 0x172   : > { %5334 = vmatpush1.bf16.msra.mxu0 %v8534_v51  ;;  %5498 = vmatpush1.bf16.msra.mxu1 %v8536_v52  ;;  %v8648_v51 = vcombine.low %v1143_v39, %v1151_v40  ;;  %v8663_v52 = vcombine.high %v1158_v46, %v1166_v47  ;;  %v480_v39 = vld [vmem:[%s10725_s10 + $0x2d0] sm:$0xff]  ;;  %v473_v40 = vld [vmem:[%s10725_s10 + $0x298] sm:$0xff] }
 0x173   : > { %5335 = vmatprep.subr.bf16.mxu0 %v8551_v53  ;;  %5499 = vmatprep.subr.bf16.mxu1 %v8553_v55  ;;  %v8665_v53 = vcombine.high %v1159_v48, %v1167_v49  ;;  %v392_v55 = vld [vmem:[%s10725_s10 + $0x10] sm:$0xff] }
 0x174   : > { %v488_v47 = vld [vmem:[%s10725_s10 + $0x310] sm:$0xff] }
 0x176   : > { %5336 = vmatpush1.bf16.msra.mxu0 %v8550_v61  ;;  %5500 = vmatpush1.bf16.msra.mxu1 %v8552_v62  ;;  %v8664_v61 = vcombine.low %v1159_v48, %v1167_v49  ;;  %v7899_v62 = vcombine.high %v392_v55, %v400_v56  ;;  %v496_v48 = vld [vmem:[%s10725_s10 + $0x350] sm:$0xff]  ;;  %v489_v49 = vld [vmem:[%s10725_s10 + $0x318] sm:$0xff] }
 0x177   : > { %5337 = vmatprep.subr.bf16.mxu0 %v8567_v63  ;;  %5501 = vmatprep.subr.bf16.mxu1 %v8569_v1  ;;  %v7901_v63 = vcombine.high %v393_v58, %v401_v59  ;;  %v10437_v1 = vmov 0  }
 0x17a   : > { %5338 = vmatpush1.bf16.msra.mxu0 %v8566_v6  ;;  %5502 = vmatpush1.bf16.msra.mxu1 %v8568_v7  ;;  %v417_v6 = vld [vmem:[%s10725_s10 + $0xd8] sm:$0xff]  ;;  %v7898_v7 = vcombine.low %v392_v55, %v400_v56  ;;  %v504_v56 = vld [vmem:[%s10725_s10 + $0x390] sm:$0xff] }
 0x17b   : > { %5339 = vmatprep.subr.bf16.mxu0 %v8583_v8  ;;  %5503 = vmatprep.subr.bf16.mxu1 %v8585_v9  ;;  %v7900_v8 = vcombine.low %v393_v58, %v401_v59  ;;  %v7915_v9 = vcombine.high %v408_v2, %v416_v3  ;;  %v7917_v11 = vcombine.high %v409_v5, %v417_v6  ;;  %v505_v58 = vld [vmem:[%s10725_s10 + $0x398] sm:$0xff] }
 0x17c   : > { %v513_v59 = vld [vmem:[%s10725_s10 + $0x3d8] sm:$0xff] }
 0x17e   : > { %5340 = vmatpush1.bf16.msra.mxu0 %v8582_v15  ;;  %5504 = vmatpush1.bf16.msra.mxu1 %v8584_v16  ;;  %v433_v15 = vld [vmem:[%s10725_s10 + $0x158] sm:$0xff]  ;;  %v7914_v16 = vcombine.low %v408_v2, %v416_v3  ;;  %v8013_v2 = vcombine.high %v505_v58, %v513_v59  ;;  %v520_v3 = vld [vmem:[%s10725_s10 + $0x410] sm:$0xff] }
 0x17f   : > { %5341 = vmatprep.subr.bf16.mxu0 %v8599_v17  ;;  %5505 = vmatprep.subr.bf16.mxu1 %v8601_v18  ;;  %v7916_v17 = vcombine.low %v409_v5, %v417_v6  ;;  %v7931_v18 = vcombine.high %v424_v12, %v432_v13  ;;  %v7933_v19 = vcombine.high %v425_v14, %v433_v15  ;;  %v528_v5 = vld [vmem:[%s10725_s10 + $0x450] sm:$0xff]  ;;  %v521_v6 = vld [vmem:[%s10725_s10 + $0x418] sm:$0xff] }
 0x182   : > { %5342 = vmatpush1.bf16.msra.mxu0 %v8598_v23  ;;  %5506 = vmatpush1.bf16.msra.mxu1 %v8600_v24  ;;  %v449_v23 = vld [vmem:[%s10725_s10 + $0x1d8] sm:$0xff]  ;;  %v7930_v24 = vcombine.low %v424_v12, %v432_v13  ;;  %v536_v13 = vld [vmem:[%s10725_s10 + $0x490] sm:$0xff] }
 0x183   : > { %5343 = vmatprep.subr.bf16.mxu0 %v8615_v25  ;;  %5507 = vmatprep.subr.bf16.mxu1 %v8617_v27  ;;  %v7932_v25 = vcombine.low %v425_v14, %v433_v15  ;;  %v7947_v27 = vcombine.high %v440_v20, %v448_v21  ;;  %v7949_v28 = vcombine.high %v441_v22, %v449_v23  ;;  %v544_v14 = vld [vmem:[%s10725_s10 + $0x4d0] sm:$0xff]  ;;  %v537_v15 = vld [vmem:[%s10725_s10 + $0x498] sm:$0xff] }
 0x186   : > { %5344 = vmatpush1.bf16.msra.mxu0 %v8614_v31  ;;  %5508 = vmatpush1.bf16.msra.mxu1 %v8616_v33  ;;  %v465_v31 = vld [vmem:[%s10725_s10 + $0x258] sm:$0xff]  ;;  %v7946_v33 = vcombine.low %v440_v20, %v448_v21  ;;  %v552_v21 = vld [vmem:[%s10725_s10 + $0x510] sm:$0xff] }
 0x187   : > { %5345 = vmatprep.subr.bf16.mxu0 %v8631_v34  ;;  %5509 = vmatprep.subr.bf16.mxu1 %v8633_v0  ;;  %v7948_v34 = vcombine.low %v441_v22, %v449_v23  ;;  %v7963_v0 = vcombine.high %v456_v60, %v464_v29  ;;  %v7965_v37 = vcombine.high %v457_v30, %v465_v31  ;;  %v560_v22 = vld [vmem:[%s10725_s10 + $0x550] sm:$0xff]  ;;  %v553_v23 = vld [vmem:[%s10725_s10 + $0x518] sm:$0xff] }
 0x18a   : > { %5346 = vmatpush1.bf16.msra.mxu0 %v8630_v42  ;;  %5510 = vmatpush1.bf16.msra.mxu1 %v8632_v54  ;;  %v481_v42 = vld [vmem:[%s10725_s10 + $0x2d8] sm:$0xff]  ;;  %v7962_v54 = vcombine.low %v456_v60, %v464_v29  ;;  %v568_v29 = vld [vmem:[%s10725_s10 + $0x590] sm:$0xff] }
 0x18b   : > { %5347 = vmatprep.subr.bf16.mxu0 %v8647_v43  ;;  %5511 = vmatprep.subr.bf16.mxu1 %v8649_v45  ;;  %v7964_v43 = vcombine.low %v457_v30, %v465_v31  ;;  %v7979_v45 = vcombine.high %v472_v38, %v480_v39  ;;  %v7981_v46 = vcombine.high %v473_v40, %v481_v42  ;;  %v576_v30 = vld [vmem:[%s10725_s10 + $0x5d0] sm:$0xff]  ;;  %v569_v31 = vld [vmem:[%s10725_s10 + $0x598] sm:$0xff] }
 0x18e   : > { %5348 = vmatpush1.bf16.msra.mxu0 %v8646_v50  ;;  %5512 = vmatpush1.bf16.msra.mxu1 %v8648_v51  ;;  %v497_v50 = vld [vmem:[%s10725_s10 + $0x358] sm:$0xff]  ;;  %v7978_v51 = vcombine.low %v472_v38, %v480_v39  ;;  %v584_v39 = vld [vmem:[%s10725_s10 + $0x610] sm:$0xff] }
 0x18f   : > { %5358 = vmatprep.subr.bf16.mxu0 %v8663_v52  ;;  %5522 = vmatprep.subr.bf16.mxu1 %v8665_v53  ;;  %v7980_v52 = vcombine.low %v473_v40, %v481_v42  ;;  %v7995_v53 = vcombine.high %v488_v47, %v496_v48  ;;  %v7997_v55 = vcombine.high %v489_v49, %v497_v50  ;;  %v592_v40 = vld [vmem:[%s10725_s10 + $0x650] sm:$0xff]  ;;  %v585_v42 = vld [vmem:[%s10725_s10 + $0x618] sm:$0xff] }
 0x191   : > { %5350 = vmatmul.mubr.bf16.vlgmr.msra.gmra.mrb[0].mxu0 %v10849_v32  ;;  %5514 = vmatmul.mubr.bf16.vlgmr.msra.gmra.mrb[0].mxu1 %v10849_v32 }
 0x192   : > { %5359 = vmatpush1.bf16.msra.mxu0 %v8662_v57  ;;  %5523 = vmatpush1.bf16.msra.mxu1 %v8664_v61  ;;  %v512_v57 = vld [vmem:[%s10725_s10 + $0x3d0] sm:$0xff]  ;;  %v7994_v61 = vcombine.low %v488_v47, %v496_v48 }
 0x193   : > { %5390 = vmatprep.mubr.bf16.mxu0 %v10437_v1  ;;  %5554 = vmatprep.mubr.bf16.mxu1 %v10437_v1  ;;  %v600_v48 = vld [vmem:[%s10725_s10 + $0x690] sm:$0xff] }
 0x194   : > { %5563 = vmatprep.subr.bf16.mxu0 %v7899_v62  ;;  %5727 = vmatprep.subr.bf16.mxu1 %v7901_v63  ;;  %v7996_v62 = vcombine.low %v489_v49, %v497_v50  ;;  %v8011_v63 = vcombine.high %v504_v56, %v512_v57  ;;  %v608_v49 = vld [vmem:[%s10725_s10 + $0x6d0] sm:$0xff]  ;;  %v601_v50 = vld [vmem:[%s10725_s10 + $0x698] sm:$0xff] }
 0x19d   : > { %8678 = vmatmul.mubr.msk.bf16.vlgmr.msra.gmra.mrb[0].mxu0 %vm5231_vm0, %v11006_v4  ;;  %8679 = vmatmul.mubr.msk.bf16.vlgmr.msra.gmra.mrb[0].mxu1 %vm5231_vm0, %v11006_v4 }
 0x19e   : > { %5564 = vmatpush1.bf16.msra.mxu0 %v7898_v7  ;;  %5728 = vmatpush1.bf16.msra.mxu1 %v7900_v8  ;;  %v529_v7 = vld [vmem:[%s10725_s10 + $0x458] sm:$0xff]  ;;  %v8010_v8 = vcombine.low %v504_v56, %v512_v57  ;;  %v616_v57 = vld [vmem:[%s10725_s10 + $0x710] sm:$0xff] }
 0x19f   : > { %5565 = vmatprep.subr.bf16.mxu0 %v7915_v9  ;;  %5729 = vmatprep.subr.bf16.mxu1 %v7917_v11  ;;  %v8012_v9 = vcombine.low %v505_v58, %v513_v59  ;;  %v8027_v11 = vcombine.high %v520_v3, %v528_v5  ;;  %v8029_v12 = vcombine.high %v521_v6, %v529_v7  ;;  %v624_v58 = vld [vmem:[%s10725_s10 + $0x750] sm:$0xff]  ;;  %v617_v59 = vld [vmem:[%s10725_s10 + $0x718] sm:$0xff] }
 0x1a0   : > { %5595 = vmatprep.mubr.bf16.mxu0 %v10799_v10  ;;  %5759 = vmatprep.mubr.bf16.mxu1 %v10799_v10 }
 0x1a2   : > { %5566 = vmatpush1.bf16.msra.mxu0 %v7914_v16  ;;  %5730 = vmatpush1.bf16.msra.mxu1 %v7916_v17  ;;  %v545_v16 = vld [vmem:[%s10725_s10 + $0x4d8] sm:$0xff]  ;;  %v8026_v17 = vcombine.low %v520_v3, %v528_v5  ;;  %v632_v5 = vld [vmem:[%s10725_s10 + $0x790] sm:$0xff] }
 0x1a3   : > { %5567 = vmatprep.subr.bf16.mxu0 %v7931_v18  ;;  %5731 = vmatprep.subr.bf16.mxu1 %v7933_v19  ;;  %v8028_v18 = vcombine.low %v521_v6, %v529_v7  ;;  %v8043_v19 = vcombine.high %v536_v13, %v544_v14  ;;  %v8045_v20 = vcombine.high %v537_v15, %v545_v16  ;;  %v640_v6 = vld [vmem:[%s10725_s10 + $0x7d0] sm:$0xff]  ;;  %v633_v7 = vld [vmem:[%s10725_s10 + $0x798] sm:$0xff] }
 0x1a6   : > { %5568 = vmatpush1.bf16.msra.mxu0 %v7930_v24  ;;  %5732 = vmatpush1.bf16.msra.mxu1 %v7932_v25  ;;  %v561_v24 = vld [vmem:[%s10725_s10 + $0x558] sm:$0xff]  ;;  %v8042_v25 = vcombine.low %v536_v13, %v544_v14  ;;  %v648_v14 = vld [vmem:[%s10725_s10 + $0x810] sm:$0xff] }
 0x1a7   : > { %5569 = vmatprep.subr.bf16.mxu0 %v7947_v27  ;;  %5733 = vmatprep.subr.bf16.mxu1 %v7949_v28  ;;  %v8044_v27 = vcombine.low %v537_v15, %v545_v16  ;;  %v8059_v28 = vcombine.high %v552_v21, %v560_v22  ;;  %v8061_v60 = vcombine.high %v553_v23, %v561_v24  ;;  %v656_v15 = vld [vmem:[%s10725_s10 + $0x850] sm:$0xff]  ;;  %v649_v16 = vld [vmem:[%s10725_s10 + $0x818] sm:$0xff] }
 0x1aa   : > { %5570 = vmatpush1.bf16.msra.mxu0 %v7946_v33  ;;  %5734 = vmatpush1.bf16.msra.mxu1 %v7948_v34  ;;  %v577_v33 = vld [vmem:[%s10725_s10 + $0x5d8] sm:$0xff]  ;;  %v8058_v34 = vcombine.low %v552_v21, %v560_v22  ;;  %v664_v22 = vld [vmem:[%s10725_s10 + $0x890] sm:$0xff] }
 0x1ab   : > { %5571 = vmatprep.subr.bf16.mxu0 %v7963_v0  ;;  %5735 = vmatprep.subr.bf16.mxu1 %v7965_v37  ;;  %v8060_v0 = vcombine.low %v553_v23, %v561_v24  ;;  %v8075_v37 = vcombine.high %v568_v29, %v576_v30  ;;  %v8077_v38 = vcombine.high %v569_v31, %v577_v33  ;;  %v672_v23 = vld [vmem:[%s10725_s10 + $0x8d0] sm:$0xff]  ;;  %v665_v24 = vld [vmem:[%s10725_s10 + $0x898] sm:$0xff] }
 0x1ae   : > { %5572 = vmatpush1.bf16.msra.mxu0 %v7962_v54  ;;  %5736 = vmatpush1.bf16.msra.mxu1 %v7964_v43  ;;  %v593_v54 = vld [vmem:[%s10725_s10 + $0x658] sm:$0xff]  ;;  %v8074_v43 = vcombine.low %v568_v29, %v576_v30  ;;  %v680_v30 = vld [vmem:[%s10725_s10 + $0x910] sm:$0xff] }
 0x1af   : > { %5573 = vmatprep.subr.bf16.mxu0 %v7979_v45  ;;  %5737 = vmatprep.subr.bf16.mxu1 %v7981_v46  ;;  %v8076_v45 = vcombine.low %v569_v31, %v577_v33  ;;  %v8091_v46 = vcombine.high %v584_v39, %v592_v40  ;;  %v8093_v47 = vcombine.high %v585_v42, %v593_v54  ;;  %v688_v31 = vld [vmem:[%s10725_s10 + $0x950] sm:$0xff]  ;;  %v681_v33 = vld [vmem:[%s10725_s10 + $0x918] sm:$0xff] }
 0x1b2   : > { %5574 = vmatpush1.bf16.msra.mxu0 %v7978_v51  ;;  %5738 = vmatpush1.bf16.msra.mxu1 %v7980_v52  ;;  %v609_v51 = vld [vmem:[%s10725_s10 + $0x6d8] sm:$0xff]  ;;  %v8090_v52 = vcombine.low %v584_v39, %v592_v40  ;;  %v696_v40 = vld [vmem:[%s10725_s10 + $0x990] sm:$0xff] }
 0x1b3   : > { %5575 = vmatprep.subr.bf16.mxu0 %v7995_v53  ;;  %5739 = vmatprep.subr.bf16.mxu1 %v7997_v55  ;;  %v8092_v53 = vcombine.low %v585_v42, %v593_v54  ;;  %v8107_v55 = vcombine.high %v600_v48, %v608_v49  ;;  %v8109_v56 = vcombine.high %v601_v50, %v609_v51  ;;  %v704_v42 = vld [vmem:[%s10725_s10 + $0x9d0] sm:$0xff]  ;;  %v697_v54 = vld [vmem:[%s10725_s10 + $0x998] sm:$0xff] }
 0x1b6   : > { %5576 = vmatpush1.bf16.msra.mxu0 %v7994_v61  ;;  %5740 = vmatpush1.bf16.msra.mxu1 %v7996_v62  ;;  %v625_v61 = vld [vmem:[%s10725_s10 + $0x758] sm:$0xff]  ;;  %v8106_v62 = vcombine.low %v600_v48, %v608_v49  ;;  %v712_v49 = vld [vmem:[%s10725_s10 + $0xa10] sm:$0xff] }
 0x1b7   : > { %5577 = vmatprep.subr.bf16.mxu0 %v8011_v63  ;;  %5741 = vmatprep.subr.bf16.mxu1 %v8013_v2  ;;  %v8108_v63 = vcombine.low %v601_v50, %v609_v51  ;;  %v8123_v2 = vcombine.high %v616_v57, %v624_v58  ;;  %v8125_v3 = vcombine.high %v617_v59, %v625_v61  ;;  %v720_v50 = vld [vmem:[%s10725_s10 + $0xa50] sm:$0xff]  ;;  %v713_v51 = vld [vmem:[%s10725_s10 + $0xa18] sm:$0xff] }
 0x1ba   : > { %5578 = vmatpush1.bf16.msra.mxu0 %v8010_v8  ;;  %5742 = vmatpush1.bf16.msra.mxu1 %v8012_v9  ;;  %v641_v8 = vld [vmem:[%s10725_s10 + $0x7d8] sm:$0xff]  ;;  %v8122_v9 = vcombine.low %v616_v57, %v624_v58  ;;  %v728_v58 = vld [vmem:[%s10725_s10 + $0xa90] sm:$0xff] }
 0x1bb   : > { %5579 = vmatprep.subr.bf16.mxu0 %v8027_v11  ;;  %5743 = vmatprep.subr.bf16.mxu1 %v8029_v12  ;;  %v8124_v11 = vcombine.low %v617_v59, %v625_v61  ;;  %v8139_v12 = vcombine.high %v632_v5, %v640_v6  ;;  %v8141_v13 = vcombine.high %v633_v7, %v641_v8  ;;  %v736_v59 = vld [vmem:[%s10725_s10 + $0xad0] sm:$0xff]  ;;  %v729_v61 = vld [vmem:[%s10725_s10 + $0xa98] sm:$0xff] }
 0x1be   : > { %5580 = vmatpush1.bf16.msra.mxu0 %v8026_v17  ;;  %5744 = vmatpush1.bf16.msra.mxu1 %v8028_v18  ;;  %v657_v17 = vld [vmem:[%s10725_s10 + $0x858] sm:$0xff]  ;;  %v8138_v18 = vcombine.low %v632_v5, %v640_v6  ;;  %v744_v6 = vld [vmem:[%s10725_s10 + $0xb10] sm:$0xff] }
 0x1bf   : > { %5581 = vmatprep.subr.bf16.mxu0 %v8043_v19  ;;  %5745 = vmatprep.subr.bf16.mxu1 %v8045_v20  ;;  %v8140_v19 = vcombine.low %v633_v7, %v641_v8  ;;  %v8155_v20 = vcombine.high %v648_v14, %v656_v15  ;;  %v8157_v21 = vcombine.high %v649_v16, %v657_v17  ;;  %v752_v7 = vld [vmem:[%s10725_s10 + $0xb50] sm:$0xff]  ;;  %v745_v8 = vld [vmem:[%s10725_s10 + $0xb18] sm:$0xff] }
 0x1c2   : > { %5582 = vmatpush1.bf16.msra.mxu0 %v8042_v25  ;;  %5746 = vmatpush1.bf16.msra.mxu1 %v8044_v27  ;;  %v673_v25 = vld [vmem:[%s10725_s10 + $0x8d8] sm:$0xff]  ;;  %v8154_v27 = vcombine.low %v648_v14, %v656_v15  ;;  %v760_v15 = vld [vmem:[%s10725_s10 + $0xb90] sm:$0xff] }
 0x1c3   : > { %5583 = vmatprep.subr.bf16.mxu0 %v8059_v28  ;;  %5747 = vmatprep.subr.bf16.mxu1 %v8061_v60  ;;  %v8156_v28 = vcombine.low %v649_v16, %v657_v17  ;;  %v8171_v60 = vcombine.high %v664_v22, %v672_v23  ;;  %v8173_v29 = vcombine.high %v665_v24, %v673_v25  ;;  %v768_v16 = vld [vmem:[%s10725_s10 + $0xbd0] sm:$0xff]  ;;  %v761_v17 = vld [vmem:[%s10725_s10 + $0xb98] sm:$0xff] }
 0x1c6   : > { %5584 = vmatpush1.bf16.msra.mxu0 %v8058_v34  ;;  %5748 = vmatpush1.bf16.msra.mxu1 %v8060_v0  ;;  %v689_v34 = vld [vmem:[%s10725_s10 + $0x958] sm:$0xff]  ;;  %v8170_v0 = vcombine.low %v664_v22, %v672_v23  ;;  %v776_v23 = vld [vmem:[%s10725_s10 + $0xc10] sm:$0xff] }
 0x1c7   : > { %5585 = vmatprep.subr.bf16.mxu0 %v8075_v37  ;;  %5749 = vmatprep.subr.bf16.mxu1 %v8077_v38  ;;  %v8172_v37 = vcombine.low %v665_v24, %v673_v25  ;;  %v8187_v38 = vcombine.high %v680_v30, %v688_v31  ;;  %v8189_v39 = vcombine.high %v681_v33, %v689_v34  ;;  %v784_v24 = vld [vmem:[%s10725_s10 + $0xc50] sm:$0xff]  ;;  %v777_v25 = vld [vmem:[%s10725_s10 + $0xc18] sm:$0xff] }
 0x1ca   : > { %5586 = vmatpush1.bf16.msra.mxu0 %v8074_v43  ;;  %5750 = vmatpush1.bf16.msra.mxu1 %v8076_v45  ;;  %v705_v43 = vld [vmem:[%s10725_s10 + $0x9d8] sm:$0xff]  ;;  %v8186_v45 = vcombine.low %v680_v30, %v688_v31  ;;  %v792_v31 = vld [vmem:[%s10725_s10 + $0xc90] sm:$0xff] }
 0x1cb   : > { %5587 = vmatprep.subr.bf16.mxu0 %v8091_v46  ;;  %5751 = vmatprep.subr.bf16.mxu1 %v8093_v47  ;;  %v8188_v46 = vcombine.low %v681_v33, %v689_v34  ;;  %v8203_v47 = vcombine.high %v696_v40, %v704_v42  ;;  %v8205_v48 = vcombine.high %v697_v54, %v705_v43  ;;  %v800_v33 = vld [vmem:[%s10725_s10 + $0xcd0] sm:$0xff]  ;;  %v793_v34 = vld [vmem:[%s10725_s10 + $0xc98] sm:$0xff] }
 0x1ce   : > { %5588 = vmatpush1.bf16.msra.mxu0 %v8090_v52  ;;  %5752 = vmatpush1.bf16.msra.mxu1 %v8092_v53  ;;  %v721_v52 = vld [vmem:[%s10725_s10 + $0xa58] sm:$0xff]  ;;  %v8202_v53 = vcombine.low %v696_v40, %v704_v42  ;;  %v808_v42 = vld [vmem:[%s10725_s10 + $0xd10] sm:$0xff] }
 0x1cf   : > { %5589 = vmatprep.subr.bf16.mxu0 %v8107_v55  ;;  %5753 = vmatprep.subr.bf16.mxu1 %v8109_v56  ;;  %v8204_v55 = vcombine.low %v697_v54, %v705_v43  ;;  %v8219_v56 = vcombine.high %v712_v49, %v720_v50  ;;  %v8221_v57 = vcombine.high %v713_v51, %v721_v52  ;;  %v816_v54 = vld [vmem:[%s10725_s10 + $0xd50] sm:$0xff]  ;;  %v809_v43 = vld [vmem:[%s10725_s10 + $0xd18] sm:$0xff] }
 0x1d2   : > { %5590 = vmatpush1.bf16.msra.mxu0 %v8106_v62  ;;  %5754 = vmatpush1.bf16.msra.mxu1 %v8108_v63  ;;  %v737_v62 = vld [vmem:[%s10725_s10 + $0xad8] sm:$0xff]  ;;  %v8218_v63 = vcombine.low %v712_v49, %v720_v50  ;;  %v824_v50 = vld [vmem:[%s10725_s10 + $0xd90] sm:$0xff] }
 0x1d3   : > { %5591 = vmatprep.subr.bf16.mxu0 %v8123_v2  ;;  %5755 = vmatprep.subr.bf16.mxu1 %v8125_v3  ;;  %v8220_v2 = vcombine.low %v713_v51, %v721_v52  ;;  %v8235_v3 = vcombine.high %v728_v58, %v736_v59  ;;  %v8237_v5 = vcombine.high %v729_v61, %v737_v62  ;;  %v832_v51 = vld [vmem:[%s10725_s10 + $0xdd0] sm:$0xff]  ;;  %v825_v52 = vld [vmem:[%s10725_s10 + $0xd98] sm:$0xff] }
 0x1d6   : > { %5592 = vmatpush1.bf16.msra.mxu0 %v8122_v9  ;;  %5756 = vmatpush1.bf16.msra.mxu1 %v8124_v11  ;;  %v753_v9 = vld [vmem:[%s10725_s10 + $0xb58] sm:$0xff]  ;;  %v8234_v11 = vcombine.low %v728_v58, %v736_v59  ;;  %v840_v59 = vld [vmem:[%s10725_s10 + $0xe10] sm:$0xff] }
 0x1d7   : > { %5593 = vmatprep.subr.bf16.mxu0 %v8139_v12  ;;  %5757 = vmatprep.subr.bf16.mxu1 %v8141_v13  ;;  %v8236_v12 = vcombine.low %v729_v61, %v737_v62  ;;  %v8251_v13 = vcombine.high %v744_v6, %v752_v7  ;;  %v8253_v14 = vcombine.high %v745_v8, %v753_v9  ;;  %v848_v61 = vld [vmem:[%s10725_s10 + $0xe50] sm:$0xff]  ;;  %v841_v62 = vld [vmem:[%s10725_s10 + $0xe18] sm:$0xff] }
 0x1da   : > { %5594 = vmatpush1.bf16.msra.mxu0 %v8138_v18  ;;  %5758 = vmatpush1.bf16.msra.mxu1 %v8140_v19  ;;  %v769_v18 = vld [vmem:[%s10725_s10 + $0xbd8] sm:$0xff]  ;;  %v8250_v19 = vcombine.low %v744_v6, %v752_v7  ;;  %v856_v7 = vld [vmem:[%s10725_s10 + $0xe90] sm:$0xff] }
 0x1db   : > { %5604 = vmatprep.subr.bf16.mxu0 %v8155_v20  ;;  %5768 = vmatprep.subr.bf16.mxu1 %v8157_v21  ;;  %v8252_v20 = vcombine.low %v745_v8, %v753_v9  ;;  %v8267_v21 = vcombine.high %v760_v15, %v768_v16  ;;  %v8269_v22 = vcombine.high %v761_v17, %v769_v18  ;;  %v864_v8 = vld [vmem:[%s10725_s10 + $0xed0] sm:$0xff]  ;;  %v857_v9 = vld [vmem:[%s10725_s10 + $0xe98] sm:$0xff] }
 0x1dd   : > { %5596 = vmatmul.mubr.bf16.vlgmr.msra.gmra.mrb[4].mxu0 %v10844_v26  ;;  %5760 = vmatmul.mubr.bf16.vlgmr.msra.gmra.mrb[4].mxu1 %v10844_v26 }
 0x1de   : > { %5605 = vmatpush1.bf16.msra.mxu0 %v8154_v27  ;;  %5769 = vmatpush1.bf16.msra.mxu1 %v8156_v28  ;;  %v785_v27 = vld [vmem:[%s10725_s10 + $0xc58] sm:$0xff]  ;;  %v8266_v28 = vcombine.low %v760_v15, %v768_v16  ;;  %v872_v16 = vld [vmem:[%s10725_s10 + $0xf10] sm:$0xff] }
 0x1df   : > { %5606 = vmatprep.subr.bf16.mxu0 %v8171_v60  ;;  %5770 = vmatprep.subr.bf16.mxu1 %v8173_v29  ;;  %v8268_v60 = vcombine.low %v761_v17, %v769_v18  ;;  %v8283_v29 = vcombine.high %v776_v23, %v784_v24  ;;  %v8285_v30 = vcombine.high %v777_v25, %v785_v27  ;;  %v880_v17 = vld [vmem:[%s10725_s10 + $0xf50] sm:$0xff]  ;;  %v873_v18 = vld [vmem:[%s10725_s10 + $0xf18] sm:$0xff] }
 0x1e0   : > { %5636 = vmatprep.mubr.bf16.mxu0 %v10855_v35  ;;  %5800 = vmatprep.mubr.bf16.mxu1 %v10855_v35 }
 0x1e2   : > { %5607 = vmatpush1.bf16.msra.mxu0 %v8170_v0  ;;  %5771 = vmatpush1.bf16.msra.mxu1 %v8172_v37  ;;  %v801_v0 = vld [vmem:[%s10725_s10 + $0xcd8] sm:$0xff]  ;;  %v8282_v37 = vcombine.low %v776_v23, %v784_v24  ;;  %v888_v24 = vld [vmem:[%s10725_s10 + $0xf90] sm:$0xff] }
 0x1e3   : > { %5608 = vmatprep.subr.bf16.mxu0 %v8187_v38  ;;  %5772 = vmatprep.subr.bf16.mxu1 %v8189_v39  ;;  %v8284_v38 = vcombine.low %v777_v25, %v785_v27  ;;  %v8299_v39 = vcombine.high %v792_v31, %v800_v33  ;;  %v8301_v40 = vcombine.high %v793_v34, %v801_v0  ;;  %v896_v25 = vld [vmem:[%s10725_s10 + $0xfd0] sm:$0xff]  ;;  %v889_v27 = vld [vmem:[%s10725_s10 + $0xf98] sm:$0xff] }
 0x1e6   : > { %5609 = vmatpush1.bf16.msra.mxu0 %v8186_v45  ;;  %5773 = vmatpush1.bf16.msra.mxu1 %v8188_v46  ;;  %v817_v45 = vld [vmem:[%s10725_s10 + $0xd58] sm:$0xff]  ;;  %v8298_v46 = vcombine.low %v792_v31, %v800_v33  ;;  %v904_v33 = vld [vmem:[%s10725_s10 + $0x1010] sm:$0xff] }
 0x1e7   : > { %5610 = vmatprep.subr.bf16.mxu0 %v8203_v47  ;;  %5774 = vmatprep.subr.bf16.mxu1 %v8205_v48  ;;  %v8300_v47 = vcombine.low %v793_v34, %v801_v0  ;;  %v8315_v48 = vcombine.high %v808_v42, %v816_v54  ;;  %v8317_v49 = vcombine.high %v809_v43, %v817_v45  ;;  %v912_v34 = vld [vmem:[%s10725_s10 + $0x1050] sm:$0xff]  ;;  %v905_v0 = vld [vmem:[%s10725_s10 + $0x1018] sm:$0xff] }
 0x1ea   : > { %5611 = vmatpush1.bf16.msra.mxu0 %v8202_v53  ;;  %5775 = vmatpush1.bf16.msra.mxu1 %v8204_v55  ;;  %v833_v53 = vld [vmem:[%s10725_s10 + $0xdd8] sm:$0xff]  ;;  %v8314_v55 = vcombine.low %v808_v42, %v816_v54  ;;  %v920_v54 = vld [vmem:[%s10725_s10 + $0x1090] sm:$0xff] }
 0x1eb   : > { %5612 = vmatprep.subr.bf16.mxu0 %v8219_v56  ;;  %5776 = vmatprep.subr.bf16.mxu1 %v8221_v57  ;;  %v8316_v56 = vcombine.low %v809_v43, %v817_v45  ;;  %v8331_v57 = vcombine.high %v824_v50, %v832_v51  ;;  %v8333_v58 = vcombine.high %v825_v52, %v833_v53  ;;  %v928_v43 = vld [vmem:[%s10725_s10 + $0x10d0] sm:$0xff]  ;;  %v921_v45 = vld [vmem:[%s10725_s10 + $0x1098] sm:$0xff] }
 0x1ee   : > { %5613 = vmatpush1.bf16.msra.mxu0 %v8218_v63  ;;  %5777 = vmatpush1.bf16.msra.mxu1 %v8220_v2  ;;  %v849_v63 = vld [vmem:[%s10725_s10 + $0xe58] sm:$0xff]  ;;  %v8330_v2 = vcombine.low %v824_v50, %v832_v51  ;;  %v936_v51 = vld [vmem:[%s10725_s10 + $0x1110] sm:$0xff] }
 0x1ef   : > { %5614 = vmatprep.subr.bf16.mxu0 %v8235_v3  ;;  %5778 = vmatprep.subr.bf16.mxu1 %v8237_v5  ;;  %v8332_v3 = vcombine.low %v825_v52, %v833_v53  ;;  %v8347_v5 = vcombine.high %v840_v59, %v848_v61  ;;  %v8349_v6 = vcombine.high %v841_v62, %v849_v63  ;;  %v944_v52 = vld [vmem:[%s10725_s10 + $0x1150] sm:$0xff]  ;;  %v937_v53 = vld [vmem:[%s10725_s10 + $0x1118] sm:$0xff] }
 0x1f2   : > { %5615 = vmatpush1.bf16.msra.mxu0 %v8234_v11  ;;  %5779 = vmatpush1.bf16.msra.mxu1 %v8236_v12  ;;  %v865_v11 = vld [vmem:[%s10725_s10 + $0xed8] sm:$0xff]  ;;  %v8346_v12 = vcombine.low %v840_v59, %v848_v61  ;;  %v952_v61 = vld [vmem:[%s10725_s10 + $0x1190] sm:$0xff] }
 0x1f3   : > { %5616 = vmatprep.subr.bf16.mxu0 %v8251_v13  ;;  %5780 = vmatprep.subr.bf16.mxu1 %v8253_v14  ;;  %v8348_v13 = vcombine.low %v841_v62, %v849_v63  ;;  %v8363_v14 = vcombine.high %v856_v7, %v864_v8  ;;  %v8365_v15 = vcombine.high %v857_v9, %v865_v11  ;;  %v960_v62 = vld [vmem:[%s10725_s10 + $0x11d0] sm:$0xff]  ;;  %v953_v63 = vld [vmem:[%s10725_s10 + $0x1198] sm:$0xff] }
 0x1f6   : > { %5617 = vmatpush1.bf16.msra.mxu0 %v8250_v19  ;;  %5781 = vmatpush1.bf16.msra.mxu1 %v8252_v20  ;;  %v881_v19 = vld [vmem:[%s10725_s10 + $0xf58] sm:$0xff]  ;;  %v8362_v20 = vcombine.low %v856_v7, %v864_v8  ;;  %v968_v8 = vld [vmem:[%s10725_s10 + $0x1210] sm:$0xff] }
 0x1f7   : > { %5618 = vmatprep.subr.bf16.mxu0 %v8267_v21  ;;  %5782 = vmatprep.subr.bf16.mxu1 %v8269_v22  ;;  %v8364_v21 = vcombine.low %v857_v9, %v865_v11  ;;  %v8379_v22 = vcombine.high %v872_v16, %v880_v17  ;;  %v8381_v23 = vcombine.high %v873_v18, %v881_v19  ;;  %v976_v9 = vld [vmem:[%s10725_s10 + $0x1250] sm:$0xff]  ;;  %v969_v11 = vld [vmem:[%s10725_s10 + $0x1218] sm:$0xff] }
 0x1fa   : > { %5619 = vmatpush1.bf16.msra.mxu0 %v8266_v28  ;;  %5783 = vmatpush1.bf16.msra.mxu1 %v8268_v60  ;;  %v897_v28 = vld [vmem:[%s10725_s10 + $0xfd8] sm:$0xff]  ;;  %v8378_v60 = vcombine.low %v872_v16, %v880_v17  ;;  %v984_v17 = vld [vmem:[%s10725_s10 + $0x1290] sm:$0xff] }
 0x1fb   : > { %5620 = vmatprep.subr.bf16.mxu0 %v8283_v29  ;;  %5784 = vmatprep.subr.bf16.mxu1 %v8285_v30  ;;  %v8380_v29 = vcombine.low %v873_v18, %v881_v19  ;;  %v8395_v30 = vcombine.high %v888_v24, %v896_v25  ;;  %v8397_v31 = vcombine.high %v889_v27, %v897_v28  ;;  %v992_v18 = vld [vmem:[%s10725_s10 + $0x12d0] sm:$0xff]  ;;  %v985_v19 = vld [vmem:[%s10725_s10 + $0x1298] sm:$0xff] }
 0x1fe   : > { %5621 = vmatpush1.bf16.msra.mxu0 %v8282_v37  ;;  %5785 = vmatpush1.bf16.msra.mxu1 %v8284_v38  ;;  %v913_v37 = vld [vmem:[%s10725_s10 + $0x1058] sm:$0xff]  ;;  %v8394_v38 = vcombine.low %v888_v24, %v896_v25  ;;  %v1000_v25 = vld [vmem:[%s10725_s10 + $0x1310] sm:$0xff] }
 0x1ff   : > { %5622 = vmatprep.subr.bf16.mxu0 %v8299_v39  ;;  %5786 = vmatprep.subr.bf16.mxu1 %v8301_v40  ;;  %v8396_v39 = vcombine.low %v889_v27, %v897_v28  ;;  %v8411_v40 = vcombine.high %v904_v33, %v912_v34  ;;  %v8413_v42 = vcombine.high %v905_v0, %v913_v37  ;;  %v1008_v27 = vld [vmem:[%s10725_s10 + $0x1350] sm:$0xff]  ;;  %v1001_v28 = vld [vmem:[%s10725_s10 + $0x1318] sm:$0xff] }
 0x202   : > { %5623 = vmatpush1.bf16.msra.mxu0 %v8298_v46  ;;  %5787 = vmatpush1.bf16.msra.mxu1 %v8300_v47  ;;  %v929_v46 = vld [vmem:[%s10725_s10 + $0x10d8] sm:$0xff]  ;;  %v8410_v47 = vcombine.low %v904_v33, %v912_v34  ;;  %v1016_v34 = vld [vmem:[%s10725_s10 + $0x1390] sm:$0xff] }
 0x203   : > { %5624 = vmatprep.subr.bf16.mxu0 %v8315_v48  ;;  %5788 = vmatprep.subr.bf16.mxu1 %v8317_v49  ;;  %v8412_v48 = vcombine.low %v905_v0, %v913_v37  ;;  %v8427_v49 = vcombine.high %v920_v54, %v928_v43  ;;  %v8429_v50 = vcombine.high %v921_v45, %v929_v46  ;;  %v1024_v0 = vld [vmem:[%s10725_s10 + $0x13d0] sm:$0xff]  ;;  %v1017_v37 = vld [vmem:[%s10725_s10 + $0x1398] sm:$0xff] }
 0x206   : > { %5625 = vmatpush1.bf16.msra.mxu0 %v8314_v55  ;;  %5789 = vmatpush1.bf16.msra.mxu1 %v8316_v56  ;;  %v945_v55 = vld [vmem:[%s10725_s10 + $0x1158] sm:$0xff]  ;;  %v8426_v56 = vcombine.low %v920_v54, %v928_v43  ;;  %v1032_v43 = vld [vmem:[%s10725_s10 + $0x1410] sm:$0xff] }
 0x207   : > { %5626 = vmatprep.subr.bf16.mxu0 %v8331_v57  ;;  %5790 = vmatprep.subr.bf16.mxu1 %v8333_v58  ;;  %v8428_v57 = vcombine.low %v921_v45, %v929_v46  ;;  %v8443_v58 = vcombine.high %v936_v51, %v944_v52  ;;  %v8445_v59 = vcombine.high %v937_v53, %v945_v55  ;;  %v1040_v45 = vld [vmem:[%s10725_s10 + $0x1450] sm:$0xff]  ;;  %v1033_v46 = vld [vmem:[%s10725_s10 + $0x1418] sm:$0xff] }
 0x20a   : > { %5627 = vmatpush1.bf16.msra.mxu0 %v8330_v2  ;;  %5791 = vmatpush1.bf16.msra.mxu1 %v8332_v3  ;;  %v961_v2 = vld [vmem:[%s10725_s10 + $0x11d8] sm:$0xff]  ;;  %v8442_v3 = vcombine.low %v936_v51, %v944_v52  ;;  %v1048_v52 = vld [vmem:[%s10725_s10 + $0x1490] sm:$0xff] }
 0x20b   : > { %5628 = vmatprep.subr.bf16.mxu0 %v8347_v5  ;;  %5792 = vmatprep.subr.bf16.mxu1 %v8349_v6  ;;  %v8444_v5 = vcombine.low %v937_v53, %v945_v55  ;;  %v8459_v6 = vcombine.high %v952_v61, %v960_v62  ;;  %v8461_v7 = vcombine.high %v953_v63, %v961_v2  ;;  %v1056_v53 = vld [vmem:[%s10725_s10 + $0x14d0] sm:$0xff]  ;;  %v1049_v55 = vld [vmem:[%s10725_s10 + $0x1498] sm:$0xff] }
 0x20e   : > { %5629 = vmatpush1.bf16.msra.mxu0 %v8346_v12  ;;  %5793 = vmatpush1.bf16.msra.mxu1 %v8348_v13  ;;  %v977_v12 = vld [vmem:[%s10725_s10 + $0x1258] sm:$0xff]  ;;  %v8458_v13 = vcombine.low %v952_v61, %v960_v62  ;;  %v1064_v62 = vld [vmem:[%s10725_s10 + $0x1510] sm:$0xff] }
 0x20f   : > { %5630 = vmatprep.subr.bf16.mxu0 %v8363_v14  ;;  %5794 = vmatprep.subr.bf16.mxu1 %v8365_v15  ;;  %v8460_v14 = vcombine.low %v953_v63, %v961_v2  ;;  %v8475_v15 = vcombine.high %v968_v8, %v976_v9  ;;  %v8477_v16 = vcombine.high %v969_v11, %v977_v12  ;;  %v1072_v63 = vld [vmem:[%s10725_s10 + $0x1550] sm:$0xff]  ;;  %v1065_v2 = vld [vmem:[%s10725_s10 + $0x1518] sm:$0xff] }
 0x212   : > { %5631 = vmatpush1.bf16.msra.mxu0 %v8362_v20  ;;  %5795 = vmatpush1.bf16.msra.mxu1 %v8364_v21  ;;  %v993_v20 = vld [vmem:[%s10725_s10 + $0x12d8] sm:$0xff]  ;;  %v8474_v21 = vcombine.low %v968_v8, %v976_v9  ;;  %v1080_v9 = vld [vmem:[%s10725_s10 + $0x1590] sm:$0xff] }
 0x213   : > { %5632 = vmatprep.subr.bf16.mxu0 %v8379_v22  ;;  %5796 = vmatprep.subr.bf16.mxu1 %v8381_v23  ;;  %v8476_v22 = vcombine.low %v969_v11, %v977_v12  ;;  %v8491_v23 = vcombine.high %v984_v17, %v992_v18  ;;  %v8493_v24 = vcombine.high %v985_v19, %v993_v20  ;;  %v1088_v11 = vld [vmem:[%s10725_s10 + $0x15d0] sm:$0xff]  ;;  %v1081_v12 = vld [vmem:[%s10725_s10 + $0x1598] sm:$0xff] }
 0x216   : > { %5633 = vmatpush1.bf16.msra.mxu0 %v8378_v60  ;;  %5797 = vmatpush1.bf16.msra.mxu1 %v8380_v29  ;;  %v1009_v60 = vld [vmem:[%s10725_s10 + $0x1358] sm:$0xff]  ;;  %v8490_v29 = vcombine.low %v984_v17, %v992_v18  ;;  %v1096_v18 = vld [vmem:[%s10725_s10 + $0x1610] sm:$0xff] }
 0x217   : > { %5634 = vmatprep.subr.bf16.mxu0 %v8395_v30  ;;  %5798 = vmatprep.subr.bf16.mxu1 %v8397_v31  ;;  %v8492_v30 = vcombine.low %v985_v19, %v993_v20  ;;  %v8507_v31 = vcombine.high %v1000_v25, %v1008_v27  ;;  %v8509_v33 = vcombine.high %v1001_v28, %v1009_v60  ;;  %v1104_v19 = vld [vmem:[%s10725_s10 + $0x1650] sm:$0xff]  ;;  %v1097_v20 = vld [vmem:[%s10725_s10 + $0x1618] sm:$0xff] }
 0x21a   : > { %5635 = vmatpush1.bf16.msra.mxu0 %v8394_v38  ;;  %5799 = vmatpush1.bf16.msra.mxu1 %v8396_v39  ;;  %v1025_v38 = vld [vmem:[%s10725_s10 + $0x13d8] sm:$0xff]  ;;  %v8506_v39 = vcombine.low %v1000_v25, %v1008_v27  ;;  %v1112_v27 = vld [vmem:[%s10725_s10 + $0x1690] sm:$0xff] }
 0x21b   : > { %5645 = vmatprep.subr.bf16.mxu0 %v8411_v40  ;;  %5809 = vmatprep.subr.bf16.mxu1 %v8413_v42  ;;  %v8508_v40 = vcombine.low %v1001_v28, %v1009_v60  ;;  %v8523_v42 = vcombine.high %v1016_v34, %v1024_v0  ;;  %v8525_v54 = vcombine.high %v1017_v37, %v1025_v38  ;;  %v1120_v28 = vld [vmem:[%s10725_s10 + $0x16d0] sm:$0xff]  ;;  %v1113_v60 = vld [vmem:[%s10725_s10 + $0x1698] sm:$0xff] }
 0x21d   : > { %5637 = vmatmul.mubr.bf16.vlgmr.msra.gmra.mrb[4].mxu0 %v10926_v41  ;;  %5801 = vmatmul.mubr.bf16.vlgmr.msra.gmra.mrb[4].mxu1 %v10926_v41 }
 0x21e   : > { %5646 = vmatpush1.bf16.msra.mxu0 %v8410_v47  ;;  %5810 = vmatpush1.bf16.msra.mxu1 %v8412_v48  ;;  %v1041_v47 = vld [vmem:[%s10725_s10 + $0x1458] sm:$0xff]  ;;  %v8522_v48 = vcombine.low %v1016_v34, %v1024_v0  ;;  %v1128_v0 = vld [vmem:[%s10725_s10 + $0x1710] sm:$0xff] }
 0x21f   : > { %5647 = vmatprep.subr.bf16.mxu0 %v8427_v49  ;;  %5811 = vmatprep.subr.bf16.mxu1 %v8429_v50  ;;  %v8524_v49 = vcombine.low %v1017_v37, %v1025_v38  ;;  %v8539_v50 = vcombine.high %v1032_v43, %v1040_v45  ;;  %v8541_v51 = vcombine.high %v1033_v46, %v1041_v47  ;;  %v1136_v37 = vld [vmem:[%s10725_s10 + $0x1750] sm:$0xff]  ;;  %v1129_v38 = vld [vmem:[%s10725_s10 + $0x1718] sm:$0xff] }
 0x220   : > { %5677 = vmatprep.mubr.bf16.mxu0 %v10858_v36  ;;  %5841 = vmatprep.mubr.bf16.mxu1 %v10858_v36 }
 0x222   : > { %5648 = vmatpush1.bf16.msra.mxu0 %v8426_v56  ;;  %5812 = vmatpush1.bf16.msra.mxu1 %v8428_v57  ;;  %v1057_v56 = vld [vmem:[%s10725_s10 + $0x14d8] sm:$0xff]  ;;  %v8538_v57 = vcombine.low %v1032_v43, %v1040_v45  ;;  %v1144_v45 = vld [vmem:[%s10725_s10 + $0x1790] sm:$0xff] }
 0x223   : > { %5649 = vmatprep.subr.bf16.mxu0 %v8443_v58  ;;  %5813 = vmatprep.subr.bf16.mxu1 %v8445_v59  ;;  %v8540_v58 = vcombine.low %v1033_v46, %v1041_v47  ;;  %v8555_v59 = vcombine.high %v1048_v52, %v1056_v53  ;;  %v8557_v61 = vcombine.high %v1049_v55, %v1057_v56  ;;  %v1152_v46 = vld [vmem:[%s10725_s10 + $0x17d0] sm:$0xff]  ;;  %v1145_v47 = vld [vmem:[%s10725_s10 + $0x1798] sm:$0xff] }
 0x226   : > { %5650 = vmatpush1.bf16.msra.mxu0 %v8442_v3  ;;  %5814 = vmatpush1.bf16.msra.mxu1 %v8444_v5  ;;  %v1073_v3 = vld [vmem:[%s10725_s10 + $0x1558] sm:$0xff]  ;;  %v8554_v5 = vcombine.low %v1048_v52, %v1056_v53  ;;  %v1160_v53 = vld [vmem:[%s10725_s10 + $0x1810] sm:$0xff] }
 0x227   : > { %5651 = vmatprep.subr.bf16.mxu0 %v8459_v6  ;;  %5815 = vmatprep.subr.bf16.mxu1 %v8461_v7  ;;  %v8556_v6 = vcombine.low %v1049_v55, %v1057_v56  ;;  %v8571_v7 = vcombine.high %v1064_v62, %v1072_v63  ;;  %v8573_v8 = vcombine.high %v1065_v2, %v1073_v3  ;;  %v1168_v55 = vld [vmem:[%s10725_s10 + $0x1850] sm:$0xff]  ;;  %v1161_v56 = vld [vmem:[%s10725_s10 + $0x1818] sm:$0xff] }
 0x22a   : > { %5652 = vmatpush1.bf16.msra.mxu0 %v8458_v13  ;;  %5816 = vmatpush1.bf16.msra.mxu1 %v8460_v14  ;;  %v1089_v13 = vld [vmem:[%s10725_s10 + $0x15d8] sm:$0xff]  ;;  %v8570_v14 = vcombine.low %v1064_v62, %v1072_v63  ;;  %v394_v63 = vld [vmem:[%s10725_s10 + $0x20] sm:$0xff] }
 0x22b   : > { %5653 = vmatprep.subr.bf16.mxu0 %v8475_v15  ;;  %5817 = vmatprep.subr.bf16.mxu1 %v8477_v16  ;;  %v8572_v15 = vcombine.low %v1065_v2, %v1073_v3  ;;  %v8587_v16 = vcombine.high %v1080_v9, %v1088_v11  ;;  %v8589_v17 = vcombine.high %v1081_v12, %v1089_v13  ;;  %v402_v2 = vld [vmem:[%s10725_s10 + $0x60] sm:$0xff] }
 0x22c   : > { %v8666_v3 = vcombine.low %v1160_v53, %v1168_v55 }
 0x22e   : > { %5654 = vmatpush1.bf16.msra.mxu0 %v8474_v21  ;;  %5818 = vmatpush1.bf16.msra.mxu1 %v8476_v22  ;;  %v1105_v21 = vld [vmem:[%s10725_s10 + $0x1658] sm:$0xff]  ;;  %v8586_v22 = vcombine.low %v1080_v9, %v1088_v11  ;;  %v410_v11 = vld [vmem:[%s10725_s10 + $0xa0] sm:$0xff] }
 0x22f   : > { %5655 = vmatprep.subr.bf16.mxu0 %v8491_v23  ;;  %5819 = vmatprep.subr.bf16.mxu1 %v8493_v24  ;;  %v8588_v23 = vcombine.low %v1081_v12, %v1089_v13  ;;  %v8603_v24 = vcombine.high %v1096_v18, %v1104_v19  ;;  %v8605_v25 = vcombine.high %v1097_v20, %v1105_v21  ;;  %v418_v12 = vld [vmem:[%s10725_s10 + $0xe0] sm:$0xff]  ;;  %v411_v13 = vld [vmem:[%s10725_s10 + $0xa8] sm:$0xff] }
 0x232   : > { %5656 = vmatpush1.bf16.msra.mxu0 %v8490_v29  ;;  %5820 = vmatpush1.bf16.msra.mxu1 %v8492_v30  ;;  %v1121_v29 = vld [vmem:[%s10725_s10 + $0x16d8] sm:$0xff]  ;;  %v8602_v30 = vcombine.low %v1096_v18, %v1104_v19  ;;  %v426_v19 = vld [vmem:[%s10725_s10 + $0x120] sm:$0xff] }
 0x233   : > { %5657 = vmatprep.subr.bf16.mxu0 %v8507_v31  ;;  %5821 = vmatprep.subr.bf16.mxu1 %v8509_v33  ;;  %v8604_v31 = vcombine.low %v1097_v20, %v1105_v21  ;;  %v8619_v33 = vcombine.high %v1112_v27, %v1120_v28  ;;  %v8621_v34 = vcombine.high %v1113_v60, %v1121_v29  ;;  %v434_v20 = vld [vmem:[%s10725_s10 + $0x160] sm:$0xff]  ;;  %v427_v21 = vld [vmem:[%s10725_s10 + $0x128] sm:$0xff] }
 0x236   : > { %5658 = vmatpush1.bf16.msra.mxu0 %v8506_v39  ;;  %5822 = vmatpush1.bf16.msra.mxu1 %v8508_v40  ;;  %v1137_v39 = vld [vmem:[%s10725_s10 + $0x1758] sm:$0xff]  ;;  %v8618_v40 = vcombine.low %v1112_v27, %v1120_v28  ;;  %v442_v28 = vld [vmem:[%s10725_s10 + $0x1a0] sm:$0xff] }
 0x237   : > { %5659 = vmatprep.subr.bf16.mxu0 %v8523_v42  ;;  %5823 = vmatprep.subr.bf16.mxu1 %v8525_v54  ;;  %v8620_v42 = vcombine.low %v1113_v60, %v1121_v29  ;;  %v8635_v54 = vcombine.high %v1128_v0, %v1136_v37  ;;  %v8637_v43 = vcombine.high %v1129_v38, %v1137_v39  ;;  %v450_v60 = vld [vmem:[%s10725_s10 + $0x1e0] sm:$0xff]  ;;  %v443_v29 = vld [vmem:[%s10725_s10 + $0x1a8] sm:$0xff] }
 0x23a   : > { %5660 = vmatpush1.bf16.msra.mxu0 %v8522_v48  ;;  %5824 = vmatpush1.bf16.msra.mxu1 %v8524_v49  ;;  %v1153_v48 = vld [vmem:[%s10725_s10 + $0x17d8] sm:$0xff]  ;;  %v8634_v49 = vcombine.low %v1128_v0, %v1136_v37 }
 0x23b   : > { %5661 = vmatprep.subr.bf16.mxu0 %v8539_v50  ;;  %5825 = vmatprep.subr.bf16.mxu1 %v8541_v51  ;;  %v8636_v50 = vcombine.low %v1129_v38, %v1137_v39  ;;  %v8651_v51 = vcombine.high %v1144_v45, %v1152_v46  ;;  %v8653_v52 = vcombine.high %v1145_v47, %v1153_v48  ;;  %v458_v38 = vld [vmem:[%s10725_s10 + $0x220] sm:$0xff] }
 0x23c   : > { %v466_v39 = vld [vmem:[%s10725_s10 + $0x260] sm:$0xff] }
 0x23e   : > { %5662 = vmatpush1.bf16.msra.mxu0 %v8538_v57  ;;  %5826 = vmatpush1.bf16.msra.mxu1 %v8540_v58  ;;  %v1169_v57 = vld [vmem:[%s10725_s10 + $0x1858] sm:$0xff]  ;;  %v8650_v58 = vcombine.low %v1144_v45, %v1152_v46 }
 0x23f   : > { %5663 = vmatprep.subr.bf16.mxu0 %v8555_v59  ;;  %5827 = vmatprep.subr.bf16.mxu1 %v8557_v61  ;;  %v8652_v59 = vcombine.low %v1145_v47, %v1153_v48  ;;  %v8667_v61 = vcombine.high %v1160_v53, %v1168_v55  ;;  %v8669_v62 = vcombine.high %v1161_v56, %v1169_v57  ;;  %v474_v55 = vld [vmem:[%s10725_s10 + $0x2a0] sm:$0xff] }
 0x240   : > { %v7950_v47 = vcombine.low %v442_v28, %v450_v60 }
 0x242   : > { %5664 = vmatpush1.bf16.msra.mxu0 %v8554_v5  ;;  %5828 = vmatpush1.bf16.msra.mxu1 %v8556_v6  ;;  %v395_v5 = vld [vmem:[%s10725_s10 + $0x28] sm:$0xff] }
 0x243   : > { %5665 = vmatprep.subr.bf16.mxu0 %v8571_v7  ;;  %5829 = vmatprep.subr.bf16.mxu1 %v8573_v8  ;;  %v403_v6 = vld [vmem:[%s10725_s10 + $0x68] sm:$0xff]  ;;  %v8668_v7 = vcombine.low %v1161_v56, %v1169_v57  ;;  %v7903_v8 = vcombine.high %v394_v63, %v402_v2  ;;  %v482_v56 = vld [vmem:[%s10725_s10 + $0x2e0] sm:$0xff] }
 0x244   : > { %v7905_v9 = vcombine.high %v395_v5, %v403_v6  ;;  %v475_v57 = vld [vmem:[%s10725_s10 + $0x2a8] sm:$0xff] }
 0x246   : > { %5666 = vmatpush1.bf16.msra.mxu0 %v8570_v14  ;;  %5830 = vmatpush1.bf16.msra.mxu1 %v8572_v15  ;;  %v419_v14 = vld [vmem:[%s10725_s10 + $0xe8] sm:$0xff]  ;;  %v7902_v15 = vcombine.low %v394_v63, %v402_v2  ;;  %v490_v2 = vld [vmem:[%s10725_s10 + $0x320] sm:$0xff] }
 0x247   : > { %5667 = vmatprep.subr.bf16.mxu0 %v8587_v16  ;;  %5831 = vmatprep.subr.bf16.mxu1 %v8589_v17  ;;  %v7904_v16 = vcombine.low %v395_v5, %v403_v6  ;;  %v7919_v17 = vcombine.high %v410_v11, %v418_v12  ;;  %v7921_v18 = vcombine.high %v411_v13, %v419_v14  ;;  %v491_v5 = vld [vmem:[%s10725_s10 + $0x328] sm:$0xff] }
 0x248   : > { %v499_v6 = vld [vmem:[%s10725_s10 + $0x368] sm:$0xff] }
 0x24a   : > { %5668 = vmatpush1.bf16.msra.mxu0 %v8586_v22  ;;  %5832 = vmatpush1.bf16.msra.mxu1 %v8588_v23  ;;  %v435_v22 = vld [vmem:[%s10725_s10 + $0x168] sm:$0xff]  ;;  %v7918_v23 = vcombine.low %v410_v11, %v418_v12  ;;  %v8001_v11 = vcombine.high %v491_v5, %v499_v6  ;;  %v506_v12 = vld [vmem:[%s10725_s10 + $0x3a0] sm:$0xff] }
 0x24b   : > { %5669 = vmatprep.subr.bf16.mxu0 %v8603_v24  ;;  %5833 = vmatprep.subr.bf16.mxu1 %v8605_v25  ;;  %v7920_v24 = vcombine.low %v411_v13, %v419_v14  ;;  %v7935_v25 = vcombine.high %v426_v19, %v434_v20  ;;  %v7937_v27 = vcombine.high %v427_v21, %v435_v22  ;;  %v514_v13 = vld [vmem:[%s10725_s10 + $0x3e0] sm:$0xff]  ;;  %v507_v14 = vld [vmem:[%s10725_s10 + $0x3a8] sm:$0xff] }
 0x24e   : > { %5670 = vmatpush1.bf16.msra.mxu0 %v8602_v30  ;;  %5834 = vmatpush1.bf16.msra.mxu1 %v8604_v31  ;;  %v451_v30 = vld [vmem:[%s10725_s10 + $0x1e8] sm:$0xff]  ;;  %v7934_v31 = vcombine.low %v426_v19, %v434_v20  ;;  %v522_v20 = vld [vmem:[%s10725_s10 + $0x420] sm:$0xff] }
 0x24f   : > { %5671 = vmatprep.subr.bf16.mxu0 %v8619_v33  ;;  %5835 = vmatprep.subr.bf16.mxu1 %v8621_v34  ;;  %v7936_v33 = vcombine.low %v427_v21, %v435_v22  ;;  %v7951_v34 = vcombine.high %v442_v28, %v450_v60  ;;  %v7953_v37 = vcombine.high %v443_v29, %v451_v30  ;;  %v530_v21 = vld [vmem:[%s10725_s10 + $0x460] sm:$0xff]  ;;  %v523_v22 = vld [vmem:[%s10725_s10 + $0x428] sm:$0xff] }
 0x250   : > { %v538_v60 = vld [vmem:[%s10725_s10 + $0x4a0] sm:$0xff] }
 0x252   : > { %5672 = vmatpush1.bf16.msra.mxu0 %v8618_v40  ;;  %5836 = vmatpush1.bf16.msra.mxu1 %v8620_v42 }
 0x253   : > { %5673 = vmatprep.subr.bf16.mxu0 %v8635_v54  ;;  %5837 = vmatprep.subr.bf16.mxu1 %v8637_v43  ;;  %v459_v54 = vld [vmem:[%s10725_s10 + $0x228] sm:$0xff] }
 0x254   : > { %v467_v43 = vld [vmem:[%s10725_s10 + $0x268] sm:$0xff] }
 0x255   : > { %v7969_v53 = vcombine.high %v459_v54, %v467_v43 }
 0x256   : > { %5674 = vmatpush1.bf16.msra.mxu0 %v8634_v49  ;;  %5838 = vmatpush1.bf16.msra.mxu1 %v8636_v50  ;;  %v7952_v50 = vcombine.low %v443_v29, %v451_v30  ;;  %v546_v29 = vld [vmem:[%s10725_s10 + $0x4e0] sm:$0xff]  ;;  %v539_v30 = vld [vmem:[%s10725_s10 + $0x4a8] sm:$0xff] }
 0x257   : > { %5675 = vmatprep.subr.bf16.mxu0 %v8651_v51  ;;  %5839 = vmatprep.subr.bf16.mxu1 %v8653_v52  ;;  %v7967_v51 = vcombine.high %v458_v38, %v466_v39 }
 0x25a   : > { %5676 = vmatpush1.bf16.msra.mxu0 %v8650_v58  ;;  %5840 = vmatpush1.bf16.msra.mxu1 %v8652_v59  ;;  %v483_v58 = vld [vmem:[%s10725_s10 + $0x2e8] sm:$0xff]  ;;  %v7966_v59 = vcombine.low %v458_v38, %v466_v39  ;;  %v554_v39 = vld [vmem:[%s10725_s10 + $0x520] sm:$0xff] }
 0x25b   : > { %5686 = vmatprep.subr.bf16.mxu0 %v8667_v61  ;;  %5850 = vmatprep.subr.bf16.mxu1 %v8669_v62  ;;  %v7968_v61 = vcombine.low %v459_v54, %v467_v43  ;;  %v7983_v62 = vcombine.high %v474_v55, %v482_v56  ;;  %v7985_v63 = vcombine.high %v475_v57, %v483_v58  ;;  %v562_v54 = vld [vmem:[%s10725_s10 + $0x560] sm:$0xff]  ;;  %v555_v43 = vld [vmem:[%s10725_s10 + $0x528] sm:$0xff] }
 0x25d   : > { %5678 = vmatmul.mubr.bf16.vlgmr.msra.gmra.mrb[4].mxu0 %v10849_v32  ;;  %5842 = vmatmul.mubr.bf16.vlgmr.msra.gmra.mrb[4].mxu1 %v10849_v32 }
 0x25e   : > { %5687 = vmatpush1.bf16.msra.mxu0 %v8666_v3  ;;  %5851 = vmatpush1.bf16.msra.mxu1 %v8668_v7  ;;  %v498_v3 = vld [vmem:[%s10725_s10 + $0x360] sm:$0xff]  ;;  %v7982_v7 = vcombine.low %v474_v55, %v482_v56  ;;  %v579_v55 = vld [vmem:[%s10725_s10 + $0x5e8] sm:$0xff]  ;;  %v8062_v56 = vcombine.low %v554_v39, %v562_v54 }
 0x25f   : > { %5718 = vmatprep.mubr.bf16.mxu0 %v10437_v1  ;;  %5882 = vmatprep.mubr.bf16.mxu1 %v10437_v1 }
 0x260   : > { %5891 = vmatprep.subr.bf16.mxu0 %v7903_v8  ;;  %6055 = vmatprep.subr.bf16.mxu1 %v7905_v9  ;;  %v7984_v8 = vcombine.low %v475_v57, %v483_v58  ;;  %v7999_v9 = vcombine.high %v490_v2, %v498_v3 }
 0x269   : > { %8680 = vmatmul.mubr.msk.bf16.vlgmr.msra.gmra.mrb[4].mxu0 %vm5231_vm0, %v11006_v4  ;;  %8681 = vmatmul.mubr.msk.bf16.vlgmr.msra.gmra.mrb[4].mxu1 %vm5231_vm0, %v11006_v4 }
 0x26a   : > { %5892 = vmatpush1.bf16.msra.mxu0 %v7902_v15  ;;  %6056 = vmatpush1.bf16.msra.mxu1 %v7904_v16  ;;  %v515_v15 = vld [vmem:[%s10725_s10 + $0x3e8] sm:$0xff]  ;;  %v7998_v16 = vcombine.low %v490_v2, %v498_v3 }
 0x26b   : > { %5893 = vmatprep.subr.bf16.mxu0 %v7919_v17  ;;  %6057 = vmatprep.subr.bf16.mxu1 %v7921_v18  ;;  %v8000_v17 = vcombine.low %v491_v5, %v499_v6  ;;  %v8015_v18 = vcombine.high %v506_v12, %v514_v13  ;;  %v8017_v19 = vcombine.high %v507_v14, %v515_v15  ;;  %v595_v2 = vld [vmem:[%s10725_s10 + $0x668] sm:$0xff] }
 0x26c   : > { %5923 = vmatprep.mubr.bf16.mxu0 %v10799_v10  ;;  %6087 = vmatprep.mubr.bf16.mxu1 %v10799_v10 }
 0x26e   : > { %5894 = vmatpush1.bf16.msra.mxu0 %v7918_v23  ;;  %6058 = vmatpush1.bf16.msra.mxu1 %v7920_v24  ;;  %v531_v23 = vld [vmem:[%s10725_s10 + $0x468] sm:$0xff]  ;;  %v8014_v24 = vcombine.low %v506_v12, %v514_v13 }
 0x26f   : > { %5895 = vmatprep.subr.bf16.mxu0 %v7935_v25  ;;  %6059 = vmatprep.subr.bf16.mxu1 %v7937_v27  ;;  %v8016_v25 = vcombine.low %v507_v14, %v515_v15  ;;  %v8031_v27 = vcombine.high %v522_v20, %v530_v21  ;;  %v8033_v28 = vcombine.high %v523_v22, %v531_v23  ;;  %v611_v12 = vld [vmem:[%s10725_s10 + $0x6e8] sm:$0xff] }
 0x270   : > { %v11238_v0 = vpop.f32.mrb[0].mxu0  ;;  %v11242_v40 = vpop.f32.mrb[0].mxu1 }
 0x271   : > { %v11244_v42 = vpop.f32.mrb[1].mxu0  ;;  %v11248_v45 = vpop.f32.mrb[1].mxu1 }
 0x272   : > { %5896 = vmatpush1.bf16.msra.mxu0 %v7934_v31  ;;  %v5396_v46 = vpop.f32.mrb[2].mxu0  ;;  %6060 = vmatpush1.bf16.msra.mxu1 %v7936_v33  ;;  %v5560_v48 = vpop.f32.mrb[2].mxu1  ;;  %v547_v31 = vld [vmem:[%s10725_s10 + $0x4e8] sm:$0xff]  ;;  %v8030_v33 = vcombine.low %v522_v20, %v530_v21 }
 0x273   : > { %v5397_v49 = vpop.f32.mrb[3].mxu0  ;;  %5897 = vmatprep.subr.bf16.mxu0 %v7951_v34  ;;  %v5561_v52 = vpop.f32.mrb[3].mxu1  ;;  %6061 = vmatprep.subr.bf16.mxu1 %v7953_v37  ;;  %v8032_v34 = vcombine.low %v523_v22, %v531_v23  ;;  %v8047_v37 = vcombine.high %v538_v60, %v546_v29  ;;  %v8049_v38 = vcombine.high %v539_v30, %v547_v31  ;;  %v563_v46 = vld [vmem:[%s10725_s10 + $0x568] sm:$0xff] }
 0x274   : > { %v8048_v48 = vcombine.low %v539_v30, %v547_v31  ;;  %v8063_v49 = vcombine.high %v554_v39, %v562_v54  ;;  %v578_v52 = vld [vmem:[%s10725_s10 + $0x5e0] sm:$0xff]  ;;  %v8064_v57 = vcombine.low %v555_v43, %v563_v46  ;;  %v627_v20 = vld [vmem:[%s10725_s10 + $0x768] sm:$0xff] }
 0x275   : > { %v659_v39 = vld [vmem:[%s10725_s10 + $0x868] sm:$0xff] }
 0x276   : > { %5898 = vmatpush1.bf16.msra.mxu0 %v7950_v47  ;;  %6062 = vmatpush1.bf16.msra.mxu1 %v7952_v50  ;;  %v8046_v47 = vcombine.low %v538_v60, %v546_v29  ;;  %v8065_v50 = vcombine.high %v555_v43, %v563_v46  ;;  %v643_v60 = vld [vmem:[%s10725_s10 + $0x7e8] sm:$0xff] }
 0x277   : > { %5899 = vmatprep.subr.bf16.mxu0 %v7967_v51  ;;  %6063 = vmatprep.subr.bf16.mxu1 %v7969_v53  ;;  %v570_v51 = vld [vmem:[%s10725_s10 + $0x5a0] sm:$0xff]  ;;  %v571_v53 = vld [vmem:[%s10725_s10 + $0x5a8] sm:$0xff] }
 0x278   : > { %v8079_v58 = vcombine.high %v570_v51, %v578_v52  ;;  %v8078_v3 = vcombine.low %v570_v51, %v578_v52  ;;  %v8080_v5 = vcombine.low %v571_v53, %v579_v55  ;;  %v675_v51 = vld [vmem:[%s10725_s10 + $0x8e8] sm:$0xff] }
 0x27a   : > { %5900 = vmatpush1.bf16.msra.mxu0 %v7966_v59  ;;  %6064 = vmatpush1.bf16.msra.mxu1 %v7968_v61  ;;  %v8081_v59 = vcombine.high %v571_v53, %v579_v55  ;;  %v586_v61 = vld [vmem:[%s10725_s10 + $0x620] sm:$0xff] }
 0x27b   : > { %5901 = vmatprep.subr.bf16.mxu0 %v7983_v62  ;;  %6065 = vmatprep.subr.bf16.mxu1 %v7985_v63  ;;  %v594_v62 = vld [vmem:[%s10725_s10 + $0x660] sm:$0xff]  ;;  %v587_v63 = vld [vmem:[%s10725_s10 + $0x628] sm:$0xff] }
 0x27c   : > { %v8095_v6 = vcombine.high %v586_v61, %v594_v62  ;;  %v8094_v13 = vcombine.low %v586_v61, %v594_v62  ;;  %v8096_v14 = vcombine.low %v587_v63, %v595_v2  ;;  %v691_v61 = vld [vmem:[%s10725_s10 + $0x968] sm:$0xff] }
 0x27e   : > { %5902 = vmatpush1.bf16.msra.mxu0 %v7982_v7  ;;  %6066 = vmatpush1.bf16.msra.mxu1 %v7984_v8  ;;  %v8097_v7 = vcombine.high %v587_v63, %v595_v2  ;;  %v602_v8 = vld [vmem:[%s10725_s10 + $0x6a0] sm:$0xff] }
 0x27f   : > { %5903 = vmatprep.subr.bf16.mxu0 %v7999_v9  ;;  %6067 = vmatprep.subr.bf16.mxu1 %v8001_v11  ;;  %v610_v9 = vld [vmem:[%s10725_s10 + $0x6e0] sm:$0xff]  ;;  %v603_v11 = vld [vmem:[%s10725_s10 + $0x6a8] sm:$0xff] }
 0x280   : > { %v8111_v15 = vcombine.high %v602_v8, %v610_v9  ;;  %v8110_v21 = vcombine.low %v602_v8, %v610_v9  ;;  %v8112_v22 = vcombine.low %v603_v11, %v611_v12  ;;  %v707_v8 = vld [vmem:[%s10725_s10 + $0x9e8] sm:$0xff] }
 0x282   : > { %5904 = vmatpush1.bf16.msra.mxu0 %v7998_v16  ;;  %6068 = vmatpush1.bf16.msra.mxu1 %v8000_v17  ;;  %v8113_v16 = vcombine.high %v603_v11, %v611_v12  ;;  %v618_v17 = vld [vmem:[%s10725_s10 + $0x720] sm:$0xff] }
 0x283   : > { %5905 = vmatprep.subr.bf16.mxu0 %v8015_v18  ;;  %6069 = vmatprep.subr.bf16.mxu1 %v8017_v19  ;;  %v626_v18 = vld [vmem:[%s10725_s10 + $0x760] sm:$0xff]  ;;  %v619_v19 = vld [vmem:[%s10725_s10 + $0x728] sm:$0xff] }
 0x284   : > { %v8127_v23 = vcombine.high %v618_v17, %v626_v18  ;;  %v8126_v29 = vcombine.low %v618_v17, %v626_v18  ;;  %v8128_v30 = vcombine.low %v619_v19, %v627_v20  ;;  %v723_v17 = vld [vmem:[%s10725_s10 + $0xa68] sm:$0xff] }
 0x286   : > { %5906 = vmatpush1.bf16.msra.mxu0 %v8014_v24  ;;  %6070 = vmatpush1.bf16.msra.mxu1 %v8016_v25  ;;  %v8129_v24 = vcombine.high %v619_v19, %v627_v20  ;;  %v634_v25 = vld [vmem:[%s10725_s10 + $0x7a0] sm:$0xff] }
 0x287   : > { %5907 = vmatprep.subr.bf16.mxu0 %v8031_v27  ;;  %6071 = vmatprep.subr.bf16.mxu1 %v8033_v28  ;;  %v642_v27 = vld [vmem:[%s10725_s10 + $0x7e0] sm:$0xff]  ;;  %v635_v28 = vld [vmem:[%s10725_s10 + $0x7a8] sm:$0xff] }
 0x288   : > { %v8143_v31 = vcombine.high %v634_v25, %v642_v27  ;;  %v8142_v54 = vcombine.low %v634_v25, %v642_v27  ;;  %v8144_v43 = vcombine.low %v635_v28, %v643_v60  ;;  %v739_v25 = vld [vmem:[%s10725_s10 + $0xae8] sm:$0xff] }
 0x28a   : > { %5908 = vmatpush1.bf16.msra.mxu0 %v8030_v33  ;;  %6072 = vmatpush1.bf16.msra.mxu1 %v8032_v34  ;;  %v8145_v33 = vcombine.high %v635_v28, %v643_v60  ;;  %v650_v34 = vld [vmem:[%s10725_s10 + $0x820] sm:$0xff] }
 0x28b   : > { %5909 = vmatprep.subr.bf16.mxu0 %v8047_v37  ;;  %6073 = vmatprep.subr.bf16.mxu1 %v8049_v38  ;;  %v658_v37 = vld [vmem:[%s10725_s10 + $0x860] sm:$0xff]  ;;  %v651_v38 = vld [vmem:[%s10725_s10 + $0x828] sm:$0xff] }
 0x28c   : > { %v8159_v46 = vcombine.high %v650_v34, %v658_v37  ;;  %v8158_v52 = vcombine.low %v650_v34, %v658_v37  ;;  %v8160_v53 = vcombine.low %v651_v38, %v659_v39  ;;  %v755_v34 = vld [vmem:[%s10725_s10 + $0xb68] sm:$0xff] }
 0x28e   : > { %5910 = vmatpush1.bf16.msra.mxu0 %v8046_v47  ;;  %6074 = vmatpush1.bf16.msra.mxu1 %v8048_v48  ;;  %v8161_v47 = vcombine.high %v651_v38, %v659_v39  ;;  %v666_v48 = vld [vmem:[%s10725_s10 + $0x8a0] sm:$0xff] }
 0x28f   : > { %5911 = vmatprep.subr.bf16.mxu0 %v8063_v49  ;;  %6075 = vmatprep.subr.bf16.mxu1 %v8065_v50  ;;  %v674_v49 = vld [vmem:[%s10725_s10 + $0x8e0] sm:$0xff]  ;;  %v667_v50 = vld [vmem:[%s10725_s10 + $0x8a8] sm:$0xff] }
 0x290   : > { %v8175_v55 = vcombine.high %v666_v48, %v674_v49  ;;  %v8174_v62 = vcombine.low %v666_v48, %v674_v49  ;;  %v8176_v63 = vcombine.low %v667_v50, %v675_v51  ;;  %v771_v48 = vld [vmem:[%s10725_s10 + $0xbe8] sm:$0xff] }
 0x292   : > { %5912 = vmatpush1.bf16.msra.mxu0 %v8062_v56  ;;  %6076 = vmatpush1.bf16.msra.mxu1 %v8064_v57  ;;  %v8177_v56 = vcombine.high %v667_v50, %v675_v51  ;;  %v682_v57 = vld [vmem:[%s10725_s10 + $0x920] sm:$0xff] }
 0x293   : > { %5913 = vmatprep.subr.bf16.mxu0 %v8079_v58  ;;  %6077 = vmatprep.subr.bf16.mxu1 %v8081_v59  ;;  %v690_v58 = vld [vmem:[%s10725_s10 + $0x960] sm:$0xff]  ;;  %v683_v59 = vld [vmem:[%s10725_s10 + $0x928] sm:$0xff] }
 0x294   : > { %v8191_v2 = vcombine.high %v682_v57, %v690_v58  ;;  %v8190_v9 = vcombine.low %v682_v57, %v690_v58  ;;  %v8192_v11 = vcombine.low %v683_v59, %v691_v61  ;;  %v787_v57 = vld [vmem:[%s10725_s10 + $0xc68] sm:$0xff] }
 0x296   : > { %5914 = vmatpush1.bf16.msra.mxu0 %v8078_v3  ;;  %6078 = vmatpush1.bf16.msra.mxu1 %v8080_v5  ;;  %v8193_v3 = vcombine.high %v683_v59, %v691_v61  ;;  %v698_v5 = vld [vmem:[%s10725_s10 + $0x9a0] sm:$0xff] }
 0x297   : > { %5915 = vmatprep.subr.bf16.mxu0 %v8095_v6  ;;  %6079 = vmatprep.subr.bf16.mxu1 %v8097_v7  ;;  %v706_v6 = vld [vmem:[%s10725_s10 + $0x9e0] sm:$0xff]  ;;  %v699_v7 = vld [vmem:[%s10725_s10 + $0x9a8] sm:$0xff] }
 0x298   : > { %v8207_v12 = vcombine.high %v698_v5, %v706_v6  ;;  %v8206_v18 = vcombine.low %v698_v5, %v706_v6  ;;  %v8208_v19 = vcombine.low %v699_v7, %v707_v8  ;;  %v803_v5 = vld [vmem:[%s10725_s10 + $0xce8] sm:$0xff] }
 0x29a   : > { %5916 = vmatpush1.bf16.msra.mxu0 %v8094_v13  ;;  %6080 = vmatpush1.bf16.msra.mxu1 %v8096_v14  ;;  %v8209_v13 = vcombine.high %v699_v7, %v707_v8  ;;  %v714_v14 = vld [vmem:[%s10725_s10 + $0xa20] sm:$0xff] }
 0x29b   : > { %5917 = vmatprep.subr.bf16.mxu0 %v8111_v15  ;;  %6081 = vmatprep.subr.bf16.mxu1 %v8113_v16  ;;  %v722_v15 = vld [vmem:[%s10725_s10 + $0xa60] sm:$0xff]  ;;  %v715_v16 = vld [vmem:[%s10725_s10 + $0xa28] sm:$0xff] }
 0x29c   : > { %v8223_v20 = vcombine.high %v714_v14, %v722_v15  ;;  %v8222_v27 = vcombine.low %v714_v14, %v722_v15  ;;  %v8224_v28 = vcombine.low %v715_v16, %v723_v17  ;;  %v819_v14 = vld [vmem:[%s10725_s10 + $0xd68] sm:$0xff] }
 0x29e   : > { %5918 = vmatpush1.bf16.msra.mxu0 %v8110_v21  ;;  %6082 = vmatpush1.bf16.msra.mxu1 %v8112_v22  ;;  %v8225_v21 = vcombine.high %v715_v16, %v723_v17  ;;  %v730_v22 = vld [vmem:[%s10725_s10 + $0xaa0] sm:$0xff] }
 0x29f   : > { %5919 = vmatprep.subr.bf16.mxu0 %v8127_v23  ;;  %6083 = vmatprep.subr.bf16.mxu1 %v8129_v24  ;;  %v738_v23 = vld [vmem:[%s10725_s10 + $0xae0] sm:$0xff]  ;;  %v731_v24 = vld [vmem:[%s10725_s10 + $0xaa8] sm:$0xff] }
 0x2a0   : > { %v8239_v60 = vcombine.high %v730_v22, %v738_v23  ;;  %v8238_v37 = vcombine.low %v730_v22, %v738_v23  ;;  %v8240_v38 = vcombine.low %v731_v24, %v739_v25  ;;  %v835_v22 = vld [vmem:[%s10725_s10 + $0xde8] sm:$0xff] }
 0x2a2   : > { %5920 = vmatpush1.bf16.msra.mxu0 %v8126_v29  ;;  %6084 = vmatpush1.bf16.msra.mxu1 %v8128_v30  ;;  %v8241_v29 = vcombine.high %v731_v24, %v739_v25  ;;  %v746_v30 = vld [vmem:[%s10725_s10 + $0xb20] sm:$0xff] }
 0x2a3   : > { %5921 = vmatprep.subr.bf16.mxu0 %v8143_v31  ;;  %6085 = vmatprep.subr.bf16.mxu1 %v8145_v33  ;;  %v754_v31 = vld [vmem:[%s10725_s10 + $0xb60] sm:$0xff]  ;;  %v747_v33 = vld [vmem:[%s10725_s10 + $0xb28] sm:$0xff] }
 0x2a4   : > { %v8255_v39 = vcombine.high %v746_v30, %v754_v31  ;;  %v8254_v49 = vcombine.low %v746_v30, %v754_v31  ;;  %v8256_v50 = vcombine.low %v747_v33, %v755_v34  ;;  %v851_v30 = vld [vmem:[%s10725_s10 + $0xe68] sm:$0xff] }
 0x2a6   : > { %5922 = vmatpush1.bf16.msra.mxu0 %v8142_v54  ;;  %6086 = vmatpush1.bf16.msra.mxu1 %v8144_v43  ;;  %v8257_v54 = vcombine.high %v747_v33, %v755_v34  ;;  %v762_v43 = vld [vmem:[%s10725_s10 + $0xba0] sm:$0xff] }
 0x2a7   : > { %5932 = vmatprep.subr.bf16.mxu0 %v8159_v46  ;;  %6096 = vmatprep.subr.bf16.mxu1 %v8161_v47  ;;  %v770_v46 = vld [vmem:[%s10725_s10 + $0xbe0] sm:$0xff]  ;;  %v763_v47 = vld [vmem:[%s10725_s10 + $0xba8] sm:$0xff] }
 0x2a8   : > { %v8271_v51 = vcombine.high %v762_v43, %v770_v46  ;;  %v8270_v58 = vcombine.low %v762_v43, %v770_v46  ;;  %v8272_v59 = vcombine.low %v763_v47, %v771_v48  ;;  %v867_v43 = vld [vmem:[%s10725_s10 + $0xee8] sm:$0xff] }
 0x2a9   : > { %5924 = vmatmul.mubr.bf16.vlgmr.msra.gmra.mrb[8].mxu0 %v10844_v26  ;;  %6088 = vmatmul.mubr.bf16.vlgmr.msra.gmra.mrb[8].mxu1 %v10844_v26 }
 0x2aa   : > { %5933 = vmatpush1.bf16.msra.mxu0 %v8158_v52  ;;  %6097 = vmatpush1.bf16.msra.mxu1 %v8160_v53  ;;  %v8273_v52 = vcombine.high %v763_v47, %v771_v48  ;;  %v778_v53 = vld [vmem:[%s10725_s10 + $0xc20] sm:$0xff] }
 0x2ab   : > { %5934 = vmatprep.subr.bf16.mxu0 %v8175_v55  ;;  %6098 = vmatprep.subr.bf16.mxu1 %v8177_v56  ;;  %v786_v55 = vld [vmem:[%s10725_s10 + $0xc60] sm:$0xff]  ;;  %v779_v56 = vld [vmem:[%s10725_s10 + $0xc28] sm:$0xff] }
 0x2ac   : > { %5964 = vmatprep.mubr.bf16.mxu0 %v10855_v35  ;;  %6128 = vmatprep.mubr.bf16.mxu1 %v10855_v35  ;;  %v8287_v61 = vcombine.high %v778_v53, %v786_v55  ;;  %v8286_v6 = vcombine.low %v778_v53, %v786_v55  ;;  %v8288_v7 = vcombine.low %v779_v56, %v787_v57  ;;  %v883_v53 = vld [vmem:[%s10725_s10 + $0xf68] sm:$0xff] }
 0x2ae   : > { %5935 = vmatpush1.bf16.msra.mxu0 %v8174_v62  ;;  %6099 = vmatpush1.bf16.msra.mxu1 %v8176_v63  ;;  %v8289_v62 = vcombine.high %v779_v56, %v787_v57  ;;  %v794_v63 = vld [vmem:[%s10725_s10 + $0xca0] sm:$0xff] }
 0x2af   : > { %5936 = vmatprep.subr.bf16.mxu0 %v8191_v2  ;;  %6100 = vmatprep.subr.bf16.mxu1 %v8193_v3  ;;  %v802_v2 = vld [vmem:[%s10725_s10 + $0xce0] sm:$0xff]  ;;  %v795_v3 = vld [vmem:[%s10725_s10 + $0xca8] sm:$0xff] }
 0x2b0   : > { %v8303_v8 = vcombine.high %v794_v63, %v802_v2  ;;  %v8302_v15 = vcombine.low %v794_v63, %v802_v2  ;;  %v8304_v16 = vcombine.low %v795_v3, %v803_v5  ;;  %v899_v63 = vld [vmem:[%s10725_s10 + $0xfe8] sm:$0xff] }
 0x2b2   : > { %5937 = vmatpush1.bf16.msra.mxu0 %v8190_v9  ;;  %6101 = vmatpush1.bf16.msra.mxu1 %v8192_v11  ;;  %v8305_v9 = vcombine.high %v795_v3, %v803_v5  ;;  %v810_v11 = vld [vmem:[%s10725_s10 + $0xd20] sm:$0xff] }
 0x2b3   : > { %5938 = vmatprep.subr.bf16.mxu0 %v8207_v12  ;;  %6102 = vmatprep.subr.bf16.mxu1 %v8209_v13  ;;  %v818_v12 = vld [vmem:[%s10725_s10 + $0xd60] sm:$0xff]  ;;  %v811_v13 = vld [vmem:[%s10725_s10 + $0xd28] sm:$0xff] }
 0x2b4   : > { %v8319_v17 = vcombine.high %v810_v11, %v818_v12  ;;  %v8318_v23 = vcombine.low %v810_v11, %v818_v12  ;;  %v8320_v24 = vcombine.low %v811_v13, %v819_v14  ;;  %v915_v11 = vld [vmem:[%s10725_s10 + $0x1068] sm:$0xff] }
 0x2b6   : > { %5939 = vmatpush1.bf16.msra.mxu0 %v8206_v18  ;;  %6103 = vmatpush1.bf16.msra.mxu1 %v8208_v19  ;;  %v8321_v18 = vcombine.high %v811_v13, %v819_v14  ;;  %v826_v19 = vld [vmem:[%s10725_s10 + $0xda0] sm:$0xff] }
 0x2b7   : > { %5940 = vmatprep.subr.bf16.mxu0 %v8223_v20  ;;  %6104 = vmatprep.subr.bf16.mxu1 %v8225_v21  ;;  %v834_v20 = vld [vmem:[%s10725_s10 + $0xde0] sm:$0xff]  ;;  %v827_v21 = vld [vmem:[%s10725_s10 + $0xda8] sm:$0xff] }
 0x2b8   : > { %v8335_v25 = vcombine.high %v826_v19, %v834_v20  ;;  %v8334_v31 = vcombine.low %v826_v19, %v834_v20  ;;  %v8336_v33 = vcombine.low %v827_v21, %v835_v22  ;;  %v931_v19 = vld [vmem:[%s10725_s10 + $0x10e8] sm:$0xff] }
 0x2ba   : > { %5941 = vmatpush1.bf16.msra.mxu0 %v8222_v27  ;;  %6105 = vmatpush1.bf16.msra.mxu1 %v8224_v28  ;;  %v8337_v27 = vcombine.high %v827_v21, %v835_v22  ;;  %v842_v28 = vld [vmem:[%s10725_s10 + $0xe20] sm:$0xff] }
 0x2bb   : > { %5942 = vmatprep.subr.bf16.mxu0 %v8239_v60  ;;  %6106 = vmatprep.subr.bf16.mxu1 %v8241_v29  ;;  %v850_v60 = vld [vmem:[%s10725_s10 + $0xe60] sm:$0xff]  ;;  %v843_v29 = vld [vmem:[%s10725_s10 + $0xe28] sm:$0xff] }
 0x2bc   : > { %v8351_v34 = vcombine.high %v842_v28, %v850_v60  ;;  %v8350_v46 = vcombine.low %v842_v28, %v850_v60  ;;  %v8352_v47 = vcombine.low %v843_v29, %v851_v30  ;;  %v947_v28 = vld [vmem:[%s10725_s10 + $0x1168] sm:$0xff] }
 0x2be   : > { %5943 = vmatpush1.bf16.msra.mxu0 %v8238_v37  ;;  %6107 = vmatpush1.bf16.msra.mxu1 %v8240_v38  ;;  %v8353_v37 = vcombine.high %v843_v29, %v851_v30  ;;  %v858_v38 = vld [vmem:[%s10725_s10 + $0xea0] sm:$0xff] }
 0x2bf   : > { %5944 = vmatprep.subr.bf16.mxu0 %v8255_v39  ;;  %6108 = vmatprep.subr.bf16.mxu1 %v8257_v54  ;;  %v866_v39 = vld [vmem:[%s10725_s10 + $0xee0] sm:$0xff]  ;;  %v859_v54 = vld [vmem:[%s10725_s10 + $0xea8] sm:$0xff] }
 0x2c0   : > { %v8367_v48 = vcombine.high %v858_v38, %v866_v39  ;;  %v8366_v55 = vcombine.low %v858_v38, %v866_v39  ;;  %v8368_v56 = vcombine.low %v859_v54, %v867_v43  ;;  %v963_v38 = vld [vmem:[%s10725_s10 + $0x11e8] sm:$0xff] }
 0x2c2   : > { %5945 = vmatpush1.bf16.msra.mxu0 %v8254_v49  ;;  %6109 = vmatpush1.bf16.msra.mxu1 %v8256_v50  ;;  %v8369_v49 = vcombine.high %v859_v54, %v867_v43  ;;  %v874_v50 = vld [vmem:[%s10725_s10 + $0xf20] sm:$0xff] }
 0x2c3   : > { %5946 = vmatprep.subr.bf16.mxu0 %v8271_v51  ;;  %6110 = vmatprep.subr.bf16.mxu1 %v8273_v52  ;;  %v882_v51 = vld [vmem:[%s10725_s10 + $0xf60] sm:$0xff]  ;;  %v875_v52 = vld [vmem:[%s10725_s10 + $0xf28] sm:$0xff] }
 0x2c4   : > { %v8383_v57 = vcombine.high %v874_v50, %v882_v51  ;;  %v8382_v2 = vcombine.low %v874_v50, %v882_v51  ;;  %v8384_v3 = vcombine.low %v875_v52, %v883_v53  ;;  %v979_v50 = vld [vmem:[%s10725_s10 + $0x1268] sm:$0xff] }
 0x2c6   : > { %5947 = vmatpush1.bf16.msra.mxu0 %v8270_v58  ;;  %6111 = vmatpush1.bf16.msra.mxu1 %v8272_v59  ;;  %v8385_v58 = vcombine.high %v875_v52, %v883_v53  ;;  %v890_v59 = vld [vmem:[%s10725_s10 + $0xfa0] sm:$0xff] }
 0x2c7   : > { %5948 = vmatprep.subr.bf16.mxu0 %v8287_v61  ;;  %6112 = vmatprep.subr.bf16.mxu1 %v8289_v62  ;;  %v898_v61 = vld [vmem:[%s10725_s10 + $0xfe0] sm:$0xff]  ;;  %v891_v62 = vld [vmem:[%s10725_s10 + $0xfa8] sm:$0xff] }
 0x2c8   : > { %v8399_v5 = vcombine.high %v890_v59, %v898_v61  ;;  %v8398_v12 = vcombine.low %v890_v59, %v898_v61  ;;  %v8400_v13 = vcombine.low %v891_v62, %v899_v63  ;;  %v995_v59 = vld [vmem:[%s10725_s10 + $0x12e8] sm:$0xff] }
 0x2ca   : > { %5949 = vmatpush1.bf16.msra.mxu0 %v8286_v6  ;;  %6113 = vmatpush1.bf16.msra.mxu1 %v8288_v7  ;;  %v8401_v6 = vcombine.high %v891_v62, %v899_v63  ;;  %v906_v7 = vld [vmem:[%s10725_s10 + $0x1020] sm:$0xff] }
 0x2cb   : > { %5950 = vmatprep.subr.bf16.mxu0 %v8303_v8  ;;  %6114 = vmatprep.subr.bf16.mxu1 %v8305_v9  ;;  %v914_v8 = vld [vmem:[%s10725_s10 + $0x1060] sm:$0xff]  ;;  %v907_v9 = vld [vmem:[%s10725_s10 + $0x1028] sm:$0xff] }
 0x2cc   : > { %v8415_v14 = vcombine.high %v906_v7, %v914_v8  ;;  %v8414_v20 = vcombine.low %v906_v7, %v914_v8  ;;  %v8416_v21 = vcombine.low %v907_v9, %v915_v11  ;;  %v1011_v7 = vld [vmem:[%s10725_s10 + $0x1368] sm:$0xff] }
 0x2ce   : > { %5951 = vmatpush1.bf16.msra.mxu0 %v8302_v15  ;;  %6115 = vmatpush1.bf16.msra.mxu1 %v8304_v16  ;;  %v8417_v15 = vcombine.high %v907_v9, %v915_v11  ;;  %v922_v16 = vld [vmem:[%s10725_s10 + $0x10a0] sm:$0xff] }
 0x2cf   : > { %5952 = vmatprep.subr.bf16.mxu0 %v8319_v17  ;;  %6116 = vmatprep.subr.bf16.mxu1 %v8321_v18  ;;  %v930_v17 = vld [vmem:[%s10725_s10 + $0x10e0] sm:$0xff]  ;;  %v923_v18 = vld [vmem:[%s10725_s10 + $0x10a8] sm:$0xff] }
 0x2d0   : > { %v8431_v22 = vcombine.high %v922_v16, %v930_v17  ;;  %v8430_v60 = vcombine.low %v922_v16, %v930_v17  ;;  %v8432_v29 = vcombine.low %v923_v18, %v931_v19  ;;  %v1027_v16 = vld [vmem:[%s10725_s10 + $0x13e8] sm:$0xff] }
 0x2d2   : > { %5953 = vmatpush1.bf16.msra.mxu0 %v8318_v23  ;;  %6117 = vmatpush1.bf16.msra.mxu1 %v8320_v24  ;;  %v8433_v23 = vcombine.high %v923_v18, %v931_v19  ;;  %v938_v24 = vld [vmem:[%s10725_s10 + $0x1120] sm:$0xff] }
 0x2d3   : > { %5954 = vmatprep.subr.bf16.mxu0 %v8335_v25  ;;  %6118 = vmatprep.subr.bf16.mxu1 %v8337_v27  ;;  %v946_v25 = vld [vmem:[%s10725_s10 + $0x1160] sm:$0xff]  ;;  %v939_v27 = vld [vmem:[%s10725_s10 + $0x1128] sm:$0xff] }
 0x2d4   : > { %v8447_v30 = vcombine.high %v938_v24, %v946_v25  ;;  %v8446_v39 = vcombine.low %v938_v24, %v946_v25  ;;  %v8448_v54 = vcombine.low %v939_v27, %v947_v28  ;;  %v1043_v24 = vld [vmem:[%s10725_s10 + $0x1468] sm:$0xff] }
 0x2d6   : > { %5955 = vmatpush1.bf16.msra.mxu0 %v8334_v31  ;;  %6119 = vmatpush1.bf16.msra.mxu1 %v8336_v33  ;;  %v8449_v31 = vcombine.high %v939_v27, %v947_v28  ;;  %v954_v33 = vld [vmem:[%s10725_s10 + $0x11a0] sm:$0xff] }
 0x2d7   : > { %5956 = vmatprep.subr.bf16.mxu0 %v8351_v34  ;;  %6120 = vmatprep.subr.bf16.mxu1 %v8353_v37  ;;  %v962_v34 = vld [vmem:[%s10725_s10 + $0x11e0] sm:$0xff]  ;;  %v955_v37 = vld [vmem:[%s10725_s10 + $0x11a8] sm:$0xff] }
 0x2d8   : > { %v8463_v43 = vcombine.high %v954_v33, %v962_v34  ;;  %v8462_v51 = vcombine.low %v954_v33, %v962_v34  ;;  %v8464_v52 = vcombine.low %v955_v37, %v963_v38  ;;  %v1059_v33 = vld [vmem:[%s10725_s10 + $0x14e8] sm:$0xff] }
 0x2da   : > { %5957 = vmatpush1.bf16.msra.mxu0 %v8350_v46  ;;  %6121 = vmatpush1.bf16.msra.mxu1 %v8352_v47  ;;  %v8465_v46 = vcombine.high %v955_v37, %v963_v38  ;;  %v970_v47 = vld [vmem:[%s10725_s10 + $0x1220] sm:$0xff] }
 0x2db   : > { %5958 = vmatprep.subr.bf16.mxu0 %v8367_v48  ;;  %6122 = vmatprep.subr.bf16.mxu1 %v8369_v49  ;;  %v978_v48 = vld [vmem:[%s10725_s10 + $0x1260] sm:$0xff]  ;;  %v971_v49 = vld [vmem:[%s10725_s10 + $0x1228] sm:$0xff] }
 0x2dc   : > { %v8479_v53 = vcombine.high %v970_v47, %v978_v48  ;;  %v8478_v61 = vcombine.low %v970_v47, %v978_v48  ;;  %v8480_v62 = vcombine.low %v971_v49, %v979_v50  ;;  %v1075_v47 = vld [vmem:[%s10725_s10 + $0x1568] sm:$0xff] }
 0x2de   : > { %5959 = vmatpush1.bf16.msra.mxu0 %v8366_v55  ;;  %6123 = vmatpush1.bf16.msra.mxu1 %v8368_v56  ;;  %v8481_v55 = vcombine.high %v971_v49, %v979_v50  ;;  %v986_v56 = vld [vmem:[%s10725_s10 + $0x12a0] sm:$0xff] }
 0x2df   : > { %5960 = vmatprep.subr.bf16.mxu0 %v8383_v57  ;;  %6124 = vmatprep.subr.bf16.mxu1 %v8385_v58  ;;  %v994_v57 = vld [vmem:[%s10725_s10 + $0x12e0] sm:$0xff]  ;;  %v987_v58 = vld [vmem:[%s10725_s10 + $0x12a8] sm:$0xff] }
 0x2e0   : > { %v8495_v63 = vcombine.high %v986_v56, %v994_v57  ;;  %v8494_v8 = vcombine.low %v986_v56, %v994_v57  ;;  %v8496_v9 = vcombine.low %v987_v58, %v995_v59  ;;  %v1091_v56 = vld [vmem:[%s10725_s10 + $0x15e8] sm:$0xff] }
 0x2e2   : > { %5961 = vmatpush1.bf16.msra.mxu0 %v8382_v2  ;;  %6125 = vmatpush1.bf16.msra.mxu1 %v8384_v3  ;;  %v8497_v2 = vcombine.high %v987_v58, %v995_v59  ;;  %v1002_v3 = vld [vmem:[%s10725_s10 + $0x1320] sm:$0xff] }
 0x2e3   : > { %5962 = vmatprep.subr.bf16.mxu0 %v8399_v5  ;;  %6126 = vmatprep.subr.bf16.mxu1 %v8401_v6  ;;  %v1010_v5 = vld [vmem:[%s10725_s10 + $0x1360] sm:$0xff]  ;;  %v1003_v6 = vld [vmem:[%s10725_s10 + $0x1328] sm:$0xff] }
 0x2e4   : > { %v8511_v11 = vcombine.high %v1002_v3, %v1010_v5  ;;  %v8510_v17 = vcombine.low %v1002_v3, %v1010_v5  ;;  %v8512_v18 = vcombine.low %v1003_v6, %v1011_v7  ;;  %v1107_v3 = vld [vmem:[%s10725_s10 + $0x1668] sm:$0xff] }
 0x2e6   : > { %5963 = vmatpush1.bf16.msra.mxu0 %v8398_v12  ;;  %6127 = vmatpush1.bf16.msra.mxu1 %v8400_v13  ;;  %v8513_v12 = vcombine.high %v1003_v6, %v1011_v7  ;;  %v1018_v13 = vld [vmem:[%s10725_s10 + $0x13a0] sm:$0xff] }
 0x2e7   : > { %5973 = vmatprep.subr.bf16.mxu0 %v8415_v14  ;;  %6137 = vmatprep.subr.bf16.mxu1 %v8417_v15  ;;  %v1026_v14 = vld [vmem:[%s10725_s10 + $0x13e0] sm:$0xff]  ;;  %v1019_v15 = vld [vmem:[%s10725_s10 + $0x13a8] sm:$0xff] }
 0x2e8   : > { %v8527_v19 = vcombine.high %v1018_v13, %v1026_v14  ;;  %v8526_v25 = vcombine.low %v1018_v13, %v1026_v14  ;;  %v8528_v27 = vcombine.low %v1019_v15, %v1027_v16  ;;  %v1123_v13 = vld [vmem:[%s10725_s10 + $0x16e8] sm:$0xff] }
 0x2e9   : > { %5965 = vmatmul.mubr.bf16.vlgmr.msra.gmra.mrb[8].mxu0 %v10926_v41  ;;  %6129 = vmatmul.mubr.bf16.vlgmr.msra.gmra.mrb[8].mxu1 %v10926_v41 }
 0x2ea   : > { %5974 = vmatpush1.bf16.msra.mxu0 %v8414_v20  ;;  %6138 = vmatpush1.bf16.msra.mxu1 %v8416_v21  ;;  %v8529_v20 = vcombine.high %v1019_v15, %v1027_v16  ;;  %v1034_v21 = vld [vmem:[%s10725_s10 + $0x1420] sm:$0xff] }
 0x2eb   : > { %5975 = vmatprep.subr.bf16.mxu0 %v8431_v22  ;;  %6139 = vmatprep.subr.bf16.mxu1 %v8433_v23  ;;  %v1042_v22 = vld [vmem:[%s10725_s10 + $0x1460] sm:$0xff]  ;;  %v1035_v23 = vld [vmem:[%s10725_s10 + $0x1428] sm:$0xff] }
 0x2ec   : > { %6005 = vmatprep.mubr.bf16.mxu0 %v10858_v36  ;;  %6169 = vmatprep.mubr.bf16.mxu1 %v10858_v36  ;;  %v8543_v28 = vcombine.high %v1034_v21, %v1042_v22  ;;  %v8542_v34 = vcombine.low %v1034_v21, %v1042_v22  ;;  %v8544_v37 = vcombine.low %v1035_v23, %v1043_v24  ;;  %v1139_v21 = vld [vmem:[%s10725_s10 + $0x1768] sm:$0xff] }
 0x2ee   : > { %5976 = vmatpush1.bf16.msra.mxu0 %v8430_v60  ;;  %6140 = vmatpush1.bf16.msra.mxu1 %v8432_v29  ;;  %v8545_v60 = vcombine.high %v1035_v23, %v1043_v24  ;;  %v1050_v29 = vld [vmem:[%s10725_s10 + $0x14a0] sm:$0xff] }
 0x2ef   : > { %5977 = vmatprep.subr.bf16.mxu0 %v8447_v30  ;;  %6141 = vmatprep.subr.bf16.mxu1 %v8449_v31  ;;  %v1058_v30 = vld [vmem:[%s10725_s10 + $0x14e0] sm:$0xff]  ;;  %v1051_v31 = vld [vmem:[%s10725_s10 + $0x14a8] sm:$0xff] }
 0x2f0   : > { %v8559_v38 = vcombine.high %v1050_v29, %v1058_v30  ;;  %v8558_v48 = vcombine.low %v1050_v29, %v1058_v30  ;;  %v8560_v49 = vcombine.low %v1051_v31, %v1059_v33  ;;  %v1155_v29 = vld [vmem:[%s10725_s10 + $0x17e8] sm:$0xff] }
 0x2f2   : > { %5978 = vmatpush1.bf16.msra.mxu0 %v8446_v39  ;;  %6142 = vmatpush1.bf16.msra.mxu1 %v8448_v54  ;;  %v8561_v39 = vcombine.high %v1051_v31, %v1059_v33  ;;  %v1066_v54 = vld [vmem:[%s10725_s10 + $0x1520] sm:$0xff] }
 0x2f3   : > { %5979 = vmatprep.subr.bf16.mxu0 %v8463_v43  ;;  %6143 = vmatprep.subr.bf16.mxu1 %v8465_v46  ;;  %v1074_v43 = vld [vmem:[%s10725_s10 + $0x1560] sm:$0xff]  ;;  %v1067_v46 = vld [vmem:[%s10725_s10 + $0x1528] sm:$0xff] }
 0x2f4   : > { %v8575_v50 = vcombine.high %v1066_v54, %v1074_v43  ;;  %v8574_v57 = vcombine.low %v1066_v54, %v1074_v43  ;;  %v8576_v58 = vcombine.low %v1067_v46, %v1075_v47  ;;  %v1171_v54 = vld [vmem:[%s10725_s10 + $0x1868] sm:$0xff] }
 0x2f6   : > { %5980 = vmatpush1.bf16.msra.mxu0 %v8462_v51  ;;  %6144 = vmatpush1.bf16.msra.mxu1 %v8464_v52  ;;  %v8577_v51 = vcombine.high %v1067_v46, %v1075_v47  ;;  %v1082_v52 = vld [vmem:[%s10725_s10 + $0x15a0] sm:$0xff] }
 0x2f7   : > { %5981 = vmatprep.subr.bf16.mxu0 %v8479_v53  ;;  %6145 = vmatprep.subr.bf16.mxu1 %v8481_v55  ;;  %v1090_v53 = vld [vmem:[%s10725_s10 + $0x15e0] sm:$0xff]  ;;  %v1083_v55 = vld [vmem:[%s10725_s10 + $0x15a8] sm:$0xff] }
 0x2f8   : > { %v8591_v59 = vcombine.high %v1082_v52, %v1090_v53  ;;  %v8590_v5 = vcombine.low %v1082_v52, %v1090_v53  ;;  %v8592_v6 = vcombine.low %v1083_v55, %v1091_v56  ;;  %v397_v52 = vld [vmem:[%s10725_s10 + $0x38] sm:$0xff] }
 0x2f9   : > { %v405_v53 = vld [vmem:[%s10725_s10 + $0x78] sm:$0xff] }
 0x2fa   : > { %5982 = vmatpush1.bf16.msra.mxu0 %v8478_v61  ;;  %6146 = vmatpush1.bf16.msra.mxu1 %v8480_v62  ;;  %v8593_v61 = vcombine.high %v1083_v55, %v1091_v56  ;;  %v1098_v62 = vld [vmem:[%s10725_s10 + $0x1620] sm:$0xff] }
 0x2fb   : > { %5983 = vmatprep.subr.bf16.mxu0 %v8495_v63  ;;  %6147 = vmatprep.subr.bf16.mxu1 %v8497_v2  ;;  %v1106_v63 = vld [vmem:[%s10725_s10 + $0x1660] sm:$0xff]  ;;  %v1099_v2 = vld [vmem:[%s10725_s10 + $0x1628] sm:$0xff] }
 0x2fc   : > { %v8607_v7 = vcombine.high %v1098_v62, %v1106_v63  ;;  %v8606_v14 = vcombine.low %v1098_v62, %v1106_v63  ;;  %v8608_v15 = vcombine.low %v1099_v2, %v1107_v3  ;;  %v421_v62 = vld [vmem:[%s10725_s10 + $0xf8] sm:$0xff] }
 0x2fe   : > { %5984 = vmatpush1.bf16.msra.mxu0 %v8494_v8  ;;  %6148 = vmatpush1.bf16.msra.mxu1 %v8496_v9  ;;  %v8609_v8 = vcombine.high %v1099_v2, %v1107_v3  ;;  %v1114_v9 = vld [vmem:[%s10725_s10 + $0x16a0] sm:$0xff]  ;;  %v7908_v2 = vcombine.low %v397_v52, %v405_v53 }
 0x2ff   : > { %5985 = vmatprep.subr.bf16.mxu0 %v8511_v11  ;;  %6149 = vmatprep.subr.bf16.mxu1 %v8513_v12  ;;  %v1122_v11 = vld [vmem:[%s10725_s10 + $0x16e0] sm:$0xff]  ;;  %v1115_v12 = vld [vmem:[%s10725_s10 + $0x16a8] sm:$0xff] }
 0x300   : > { %v8623_v16 = vcombine.high %v1114_v9, %v1122_v11  ;;  %v8622_v22 = vcombine.low %v1114_v9, %v1122_v11  ;;  %v8624_v23 = vcombine.low %v1115_v12, %v1123_v13  ;;  %v437_v9 = vld [vmem:[%s10725_s10 + $0x178] sm:$0xff] }
 0x302   : > { %5986 = vmatpush1.bf16.msra.mxu0 %v8510_v17  ;;  %6150 = vmatpush1.bf16.msra.mxu1 %v8512_v18  ;;  %v8625_v17 = vcombine.high %v1115_v12, %v1123_v13  ;;  %v1130_v18 = vld [vmem:[%s10725_s10 + $0x1720] sm:$0xff] }
 0x303   : > { %5987 = vmatprep.subr.bf16.mxu0 %v8527_v19  ;;  %6151 = vmatprep.subr.bf16.mxu1 %v8529_v20  ;;  %v1138_v19 = vld [vmem:[%s10725_s10 + $0x1760] sm:$0xff]  ;;  %v1131_v20 = vld [vmem:[%s10725_s10 + $0x1728] sm:$0xff] }
 0x304   : > { %v8639_v24 = vcombine.high %v1130_v18, %v1138_v19  ;;  %v8638_v30 = vcombine.low %v1130_v18, %v1138_v19  ;;  %v8640_v31 = vcombine.low %v1131_v20, %v1139_v21  ;;  %v453_v18 = vld [vmem:[%s10725_s10 + $0x1f8] sm:$0xff] }
 0x306   : > { %5988 = vmatpush1.bf16.msra.mxu0 %v8526_v25  ;;  %6152 = vmatpush1.bf16.msra.mxu1 %v8528_v27  ;;  %v8641_v25 = vcombine.high %v1131_v20, %v1139_v21  ;;  %v1146_v27 = vld [vmem:[%s10725_s10 + $0x17a0] sm:$0xff] }
 0x307   : > { %5989 = vmatprep.subr.bf16.mxu0 %v8543_v28  ;;  %6153 = vmatprep.subr.bf16.mxu1 %v8545_v60  ;;  %v1154_v28 = vld [vmem:[%s10725_s10 + $0x17e0] sm:$0xff]  ;;  %v1147_v60 = vld [vmem:[%s10725_s10 + $0x17a8] sm:$0xff] }
 0x308   : > { %v8655_v33 = vcombine.high %v1146_v27, %v1154_v28  ;;  %v8654_v43 = vcombine.low %v1146_v27, %v1154_v28  ;;  %v8656_v46 = vcombine.low %v1147_v60, %v1155_v29 }
 0x30a   : > { %5990 = vmatpush1.bf16.msra.mxu0 %v8542_v34  ;;  %6154 = vmatpush1.bf16.msra.mxu1 %v8544_v37  ;;  %v8657_v34 = vcombine.high %v1147_v60, %v1155_v29  ;;  %v1162_v37 = vld [vmem:[%s10725_s10 + $0x1820] sm:$0xff]  ;;  %v461_v60 = vld [vmem:[%s10725_s10 + $0x238] sm:$0xff] }
 0x30b   : > { %5991 = vmatprep.subr.bf16.mxu0 %v8559_v38  ;;  %6155 = vmatprep.subr.bf16.mxu1 %v8561_v39  ;;  %v1170_v38 = vld [vmem:[%s10725_s10 + $0x1860] sm:$0xff]  ;;  %v1163_v39 = vld [vmem:[%s10725_s10 + $0x1828] sm:$0xff] }
 0x30c   : > { %v8671_v47 = vcombine.high %v1162_v37, %v1170_v38  ;;  %v8672_v55 = vcombine.low %v1163_v39, %v1171_v54 }
 0x30e   : > { %5992 = vmatpush1.bf16.msra.mxu0 %v8558_v48  ;;  %6156 = vmatpush1.bf16.msra.mxu1 %v8560_v49  ;;  %v8673_v48 = vcombine.high %v1163_v39, %v1171_v54  ;;  %v396_v49 = vld [vmem:[%s10725_s10 + $0x30] sm:$0xff] }
 0x30f   : > { %5993 = vmatprep.subr.bf16.mxu0 %v8575_v50  ;;  %6157 = vmatprep.subr.bf16.mxu1 %v8577_v51  ;;  %v404_v50 = vld [vmem:[%s10725_s10 + $0x70] sm:$0xff]  ;;  %v8670_v51 = vcombine.low %v1162_v37, %v1170_v38 }
 0x310   : > { %v7907_v56 = vcombine.high %v396_v49, %v404_v50  ;;  %v7906_v63 = vcombine.low %v396_v49, %v404_v50 }
 0x312   : > { %5994 = vmatpush1.bf16.msra.mxu0 %v8574_v57  ;;  %6158 = vmatpush1.bf16.msra.mxu1 %v8576_v58  ;;  %v7909_v57 = vcombine.high %v397_v52, %v405_v53  ;;  %v412_v58 = vld [vmem:[%s10725_s10 + $0xb0] sm:$0xff] }
 0x313   : > { %5995 = vmatprep.subr.bf16.mxu0 %v8591_v59  ;;  %6159 = vmatprep.subr.bf16.mxu1 %v8593_v61  ;;  %v420_v59 = vld [vmem:[%s10725_s10 + $0xf0] sm:$0xff]  ;;  %v413_v61 = vld [vmem:[%s10725_s10 + $0xb8] sm:$0xff] }
 0x314   : > { %v7923_v3 = vcombine.high %v412_v58, %v420_v59  ;;  %v7922_v11 = vcombine.low %v412_v58, %v420_v59  ;;  %v7924_v12 = vcombine.low %v413_v61, %v421_v62  ;;  %v492_v53 = vld [vmem:[%s10725_s10 + $0x330] sm:$0xff] }
 0x316   : > { %5996 = vmatpush1.bf16.msra.mxu0 %v8590_v5  ;;  %6160 = vmatpush1.bf16.msra.mxu1 %v8592_v6  ;;  %v7925_v5 = vcombine.high %v413_v61, %v421_v62  ;;  %v428_v6 = vld [vmem:[%s10725_s10 + $0x130] sm:$0xff] }
 0x317   : > { %5997 = vmatprep.subr.bf16.mxu0 %v8607_v7  ;;  %6161 = vmatprep.subr.bf16.mxu1 %v8609_v8  ;;  %v436_v7 = vld [vmem:[%s10725_s10 + $0x170] sm:$0xff]  ;;  %v429_v8 = vld [vmem:[%s10725_s10 + $0x138] sm:$0xff] }
 0x318   : > { %v7939_v13 = vcombine.high %v428_v6, %v436_v7  ;;  %v7938_v19 = vcombine.low %v428_v6, %v436_v7  ;;  %v7940_v20 = vcombine.low %v429_v8, %v437_v9 }
 0x31a   : > { %5998 = vmatpush1.bf16.msra.mxu0 %v8606_v14  ;;  %6162 = vmatpush1.bf16.msra.mxu1 %v8608_v15  ;;  %v7941_v14 = vcombine.high %v429_v8, %v437_v9  ;;  %v444_v15 = vld [vmem:[%s10725_s10 + $0x1b0] sm:$0xff] }
 0x31b   : > { %5999 = vmatprep.subr.bf16.mxu0 %v8623_v16  ;;  %6163 = vmatprep.subr.bf16.mxu1 %v8625_v17  ;;  %v452_v16 = vld [vmem:[%s10725_s10 + $0x1f0] sm:$0xff]  ;;  %v445_v17 = vld [vmem:[%s10725_s10 + $0x1b8] sm:$0xff] }
 0x31c   : > { %v7955_v21 = vcombine.high %v444_v15, %v452_v16  ;;  %v7956_v37 = vcombine.low %v445_v17, %v453_v18 }
 0x31e   : > { %6000 = vmatpush1.bf16.msra.mxu0 %v8622_v22  ;;  %6164 = vmatpush1.bf16.msra.mxu1 %v8624_v23  ;;  %v7957_v23 = vcombine.high %v445_v17, %v453_v18 }
 0x31f   : > { %6001 = vmatprep.subr.bf16.mxu0 %v8639_v24  ;;  %6165 = vmatprep.subr.bf16.mxu1 %v8641_v25  ;;  %v460_v24 = vld [vmem:[%s10725_s10 + $0x230] sm:$0xff] }
 0x320   : > { %v468_v25 = vld [vmem:[%s10725_s10 + $0x270] sm:$0xff] }
 0x321   : > { %v7971_v38 = vcombine.high %v460_v24, %v468_v25  ;;  %v7970_v49 = vcombine.low %v460_v24, %v468_v25 }
 0x322   : > { %6002 = vmatpush1.bf16.msra.mxu0 %v8638_v30  ;;  %6166 = vmatpush1.bf16.msra.mxu1 %v8640_v31  ;;  %v7954_v31 = vcombine.low %v444_v15, %v452_v16 }
 0x323   : > { %6003 = vmatprep.subr.bf16.mxu0 %v8655_v33  ;;  %6167 = vmatprep.subr.bf16.mxu1 %v8657_v34 }
 0x326   : > { %6004 = vmatpush1.bf16.msra.mxu0 %v8654_v43  ;;  %6168 = vmatpush1.bf16.msra.mxu1 %v8656_v46  ;;  %v476_v43 = vld [vmem:[%s10725_s10 + $0x2b0] sm:$0xff] }
 0x327   : > { %6014 = vmatprep.subr.bf16.mxu0 %v8671_v47  ;;  %6178 = vmatprep.subr.bf16.mxu1 %v8673_v48  ;;  %v484_v46 = vld [vmem:[%s10725_s10 + $0x2f0] sm:$0xff]  ;;  %v477_v47 = vld [vmem:[%s10725_s10 + $0x2b8] sm:$0xff] }
 0x328   : > { %v485_v48 = vld [vmem:[%s10725_s10 + $0x2f8] sm:$0xff]  ;;  %v7986_v58 = vcombine.low %v476_v43, %v484_v46 }
 0x329   : > { %6006 = vmatmul.mubr.bf16.vlgmr.msra.gmra.mrb[8].mxu0 %v10849_v32  ;;  %6170 = vmatmul.mubr.bf16.vlgmr.msra.gmra.mrb[8].mxu1 %v10849_v32  ;;  %v7989_v52 = vcombine.high %v477_v47, %v485_v48  ;;  %v7988_v59 = vcombine.low %v477_v47, %v485_v48  ;;  %v573_v47 = vld [vmem:[%s10725_s10 + $0x5b8] sm:$0xff] }
 0x32a   : > { %6015 = vmatpush1.bf16.msra.mxu0 %v8670_v51  ;;  %6179 = vmatpush1.bf16.msra.mxu1 %v8672_v55  ;;  %v7987_v51 = vcombine.high %v476_v43, %v484_v46  ;;  %v500_v55 = vld [vmem:[%s10725_s10 + $0x370] sm:$0xff]  ;;  %v581_v48 = vld [vmem:[%s10725_s10 + $0x5f8] sm:$0xff] }
 0x32b   : > { %6046 = vmatprep.mubr.bf16.mxu0 %v10437_v1  ;;  %6210 = vmatprep.mubr.bf16.mxu1 %v10437_v1  ;;  %v8003_v61 = vcombine.high %v492_v53, %v500_v55  ;;  %v8002_v6 = vcombine.low %v492_v53, %v500_v55  ;;  %v572_v43 = vld [vmem:[%s10725_s10 + $0x5b0] sm:$0xff] }
 0x32c   : > { %6219 = vmatprep.subr.bf16.mxu0 %v7907_v56  ;;  %6383 = vmatprep.subr.bf16.mxu1 %v7909_v57  ;;  %v493_v56 = vld [vmem:[%s10725_s10 + $0x338] sm:$0xff]  ;;  %v580_v46 = vld [vmem:[%s10725_s10 + $0x5f0] sm:$0xff] }
 0x32d   : > { %v501_v57 = vld [vmem:[%s10725_s10 + $0x378] sm:$0xff]  ;;  %v588_v53 = vld [vmem:[%s10725_s10 + $0x630] sm:$0xff] }
 0x32e   : > { %v8005_v62 = vcombine.high %v493_v56, %v501_v57  ;;  %v8004_v7 = vcombine.low %v493_v56, %v501_v57  ;;  %v596_v55 = vld [vmem:[%s10725_s10 + $0x670] sm:$0xff]  ;;  %v589_v56 = vld [vmem:[%s10725_s10 + $0x638] sm:$0xff] }
 0x32f   : > { %v597_v57 = vld [vmem:[%s10725_s10 + $0x678] sm:$0xff] }
 0x335   : > { %8682 = vmatmul.mubr.msk.bf16.vlgmr.msra.gmra.mrb[8].mxu0 %vm5231_vm0, %v11006_v4  ;;  %8683 = vmatmul.mubr.msk.bf16.vlgmr.msra.gmra.mrb[8].mxu1 %vm5231_vm0, %v11006_v4 }
 0x336   : > { %6220 = vmatpush1.bf16.msra.mxu0 %v7906_v63  ;;  %6384 = vmatpush1.bf16.msra.mxu1 %v7908_v2  ;;  %v508_v63 = vld [vmem:[%s10725_s10 + $0x3b0] sm:$0xff] }
 0x337   : > { %6221 = vmatprep.subr.bf16.mxu0 %v7923_v3  ;;  %6385 = vmatprep.subr.bf16.mxu1 %v7925_v5  ;;  %v516_v2 = vld [vmem:[%s10725_s10 + $0x3f0] sm:$0xff]  ;;  %v509_v3 = vld [vmem:[%s10725_s10 + $0x3b8] sm:$0xff] }
 0x338   : > { %6251 = vmatprep.mubr.bf16.mxu0 %v10799_v10  ;;  %6415 = vmatprep.mubr.bf16.mxu1 %v10799_v10  ;;  %v469_v10 = vld [vmem:[%s10725_s10 + $0x278] sm:$0xff]  ;;  %v8019_v8 = vcombine.high %v508_v63, %v516_v2  ;;  %v8018_v15 = vcombine.low %v508_v63, %v516_v2  ;;  %v604_v63 = vld [vmem:[%s10725_s10 + $0x6b0] sm:$0xff] }
 0x339   : > { %v7973_v54 = vcombine.high %v461_v60, %v469_v10  ;;  %v7972_v50 = vcombine.low %v461_v60, %v469_v10  ;;  %v517_v5 = vld [vmem:[%s10725_s10 + $0x3f8] sm:$0xff]  ;;  %v612_v2 = vld [vmem:[%s10725_s10 + $0x6f0] sm:$0xff] }
 0x33a   : > { %6222 = vmatpush1.bf16.msra.mxu0 %v7922_v11  ;;  %6386 = vmatpush1.bf16.msra.mxu1 %v7924_v12  ;;  %v8021_v9 = vcombine.high %v509_v3, %v517_v5  ;;  %v524_v11 = vld [vmem:[%s10725_s10 + $0x430] sm:$0xff]  ;;  %v8020_v16 = vcombine.low %v509_v3, %v517_v5  ;;  %v605_v3 = vld [vmem:[%s10725_s10 + $0x6b8] sm:$0xff] }
 0x33b   : > { %6223 = vmatprep.subr.bf16.mxu0 %v7939_v13  ;;  %6387 = vmatprep.subr.bf16.mxu1 %v7941_v14  ;;  %v532_v12 = vld [vmem:[%s10725_s10 + $0x470] sm:$0xff]  ;;  %v525_v13 = vld [vmem:[%s10725_s10 + $0x438] sm:$0xff] }
 0x33c   : > { %v11460_v22 = vpop.f32.mrb[4].mxu0  ;;  %v11464_v27 = vpop.f32.mrb[4].mxu1  ;;  %v533_v14 = vld [vmem:[%s10725_s10 + $0x478] sm:$0xff]  ;;  %v8035_v17 = vcombine.high %v524_v11, %v532_v12  ;;  %v8034_v24 = vcombine.low %v524_v11, %v532_v12  ;;  %v620_v11 = vld [vmem:[%s10725_s10 + $0x730] sm:$0xff] }
 0x33d   : > { %v11466_v28 = vpop.f32.mrb[5].mxu0  ;;  %v11470_v29 = vpop.f32.mrb[5].mxu1  ;;  %v8037_v18 = vcombine.high %v525_v13, %v533_v14  ;;  %v8036_v25 = vcombine.low %v525_v13, %v533_v14  ;;  %v613_v5 = vld [vmem:[%s10725_s10 + $0x6f8] sm:$0xff]  ;;  %v628_v12 = vld [vmem:[%s10725_s10 + $0x770] sm:$0xff] }
 0x33e   : > { %6224 = vmatpush1.bf16.msra.mxu0 %v7938_v19  ;;  %v5724_v30 = vpop.f32.mrb[6].mxu0  ;;  %6388 = vmatpush1.bf16.msra.mxu1 %v7940_v20  ;;  %v5888_v33 = vpop.f32.mrb[6].mxu1  ;;  %v540_v19 = vld [vmem:[%s10725_s10 + $0x4b0] sm:$0xff]  ;;  %v621_v13 = vld [vmem:[%s10725_s10 + $0x738] sm:$0xff] }
 0x33f   : > { %v5725_v34 = vpop.f32.mrb[7].mxu0  ;;  %6225 = vmatprep.subr.bf16.mxu0 %v7955_v21  ;;  %v5889_v39 = vpop.f32.mrb[7].mxu1  ;;  %6389 = vmatprep.subr.bf16.mxu1 %v7957_v23  ;;  %v548_v20 = vld [vmem:[%s10725_s10 + $0x4f0] sm:$0xff]  ;;  %v541_v21 = vld [vmem:[%s10725_s10 + $0x4b8] sm:$0xff] }
 0x340   : > { %v549_v23 = vld [vmem:[%s10725_s10 + $0x4f8] sm:$0xff]  ;;  %v8051_v60 = vcombine.high %v540_v19, %v548_v20  ;;  %v556_v30 = vld [vmem:[%s10725_s10 + $0x530] sm:$0xff] }
 0x341   : > { %v8053_v10 = vcombine.high %v541_v21, %v549_v23  ;;  %v557_v33 = vld [vmem:[%s10725_s10 + $0x538] sm:$0xff] }
 0x342   : > { %6226 = vmatpush1.bf16.msra.mxu0 %v7954_v31  ;;  %6390 = vmatpush1.bf16.msra.mxu1 %v7956_v37  ;;  %v564_v31 = vld [vmem:[%s10725_s10 + $0x570] sm:$0xff]  ;;  %v565_v34 = vld [vmem:[%s10725_s10 + $0x578] sm:$0xff]  ;;  %v8050_v37 = vcombine.low %v540_v19, %v548_v20 }
 0x343   : > { %6227 = vmatprep.subr.bf16.mxu0 %v7971_v38  ;;  %6391 = vmatprep.subr.bf16.mxu1 %v7973_v54  ;;  %v8052_v38 = vcombine.low %v541_v21, %v549_v23  ;;  %v8067_v39 = vcombine.high %v556_v30, %v564_v31  ;;  %v8069_v54 = vcombine.high %v557_v33, %v565_v34  ;;  %v629_v14 = vld [vmem:[%s10725_s10 + $0x778] sm:$0xff]  ;;  %v636_v19 = vld [vmem:[%s10725_s10 + $0x7b0] sm:$0xff] }
 0x344   : > { %v644_v20 = vld [vmem:[%s10725_s10 + $0x7f0] sm:$0xff]  ;;  %v637_v21 = vld [vmem:[%s10725_s10 + $0x7b8] sm:$0xff] }
 0x345   : > { %v645_v23 = vld [vmem:[%s10725_s10 + $0x7f8] sm:$0xff] }
 0x346   : > { %6228 = vmatpush1.bf16.msra.mxu0 %v7970_v49  ;;  %6392 = vmatpush1.bf16.msra.mxu1 %v7972_v50  ;;  %v8066_v49 = vcombine.low %v556_v30, %v564_v31  ;;  %v8068_v50 = vcombine.low %v557_v33, %v565_v34  ;;  %v652_v30 = vld [vmem:[%s10725_s10 + $0x830] sm:$0xff]  ;;  %v653_v33 = vld [vmem:[%s10725_s10 + $0x838] sm:$0xff] }
 0x347   : > { %6229 = vmatprep.subr.bf16.mxu0 %v7987_v51  ;;  %6393 = vmatprep.subr.bf16.mxu1 %v7989_v52  ;;  %v8083_v51 = vcombine.high %v572_v43, %v580_v46  ;;  %v8085_v52 = vcombine.high %v573_v47, %v581_v48  ;;  %v660_v31 = vld [vmem:[%s10725_s10 + $0x870] sm:$0xff]  ;;  %v661_v34 = vld [vmem:[%s10725_s10 + $0x878] sm:$0xff] }
 0x34a   : > { %6230 = vmatpush1.bf16.msra.mxu0 %v7986_v58  ;;  %6394 = vmatpush1.bf16.msra.mxu1 %v7988_v59  ;;  %v8082_v58 = vcombine.low %v572_v43, %v580_v46  ;;  %v8084_v59 = vcombine.low %v573_v47, %v581_v48  ;;  %v668_v43 = vld [vmem:[%s10725_s10 + $0x8b0] sm:$0xff]  ;;  %v669_v47 = vld [vmem:[%s10725_s10 + $0x8b8] sm:$0xff] }
 0x34b   : > { %6231 = vmatprep.subr.bf16.mxu0 %v8003_v61  ;;  %6395 = vmatprep.subr.bf16.mxu1 %v8005_v62  ;;  %v8099_v61 = vcombine.high %v588_v53, %v596_v55  ;;  %v8101_v62 = vcombine.high %v589_v56, %v597_v57  ;;  %v676_v46 = vld [vmem:[%s10725_s10 + $0x8f0] sm:$0xff]  ;;  %v677_v48 = vld [vmem:[%s10725_s10 + $0x8f8] sm:$0xff] }
 0x34e   : > { %6232 = vmatpush1.bf16.msra.mxu0 %v8002_v6  ;;  %6396 = vmatpush1.bf16.msra.mxu1 %v8004_v7  ;;  %v8098_v6 = vcombine.low %v588_v53, %v596_v55  ;;  %v8100_v7 = vcombine.low %v589_v56, %v597_v57  ;;  %v684_v53 = vld [vmem:[%s10725_s10 + $0x930] sm:$0xff]  ;;  %v685_v56 = vld [vmem:[%s10725_s10 + $0x938] sm:$0xff] }
 0x34f   : > { %6233 = vmatprep.subr.bf16.mxu0 %v8019_v8  ;;  %6397 = vmatprep.subr.bf16.mxu1 %v8021_v9  ;;  %v8115_v8 = vcombine.high %v604_v63, %v612_v2  ;;  %v8117_v9 = vcombine.high %v605_v3, %v613_v5  ;;  %v692_v55 = vld [vmem:[%s10725_s10 + $0x970] sm:$0xff]  ;;  %v693_v57 = vld [vmem:[%s10725_s10 + $0x978] sm:$0xff] }
 0x352   : > { %6234 = vmatpush1.bf16.msra.mxu0 %v8018_v15  ;;  %6398 = vmatpush1.bf16.msra.mxu1 %v8020_v16  ;;  %v8114_v15 = vcombine.low %v604_v63, %v612_v2  ;;  %v8116_v16 = vcombine.low %v605_v3, %v613_v5  ;;  %v700_v63 = vld [vmem:[%s10725_s10 + $0x9b0] sm:$0xff]  ;;  %v701_v3 = vld [vmem:[%s10725_s10 + $0x9b8] sm:$0xff] }
 0x353   : > { %6235 = vmatprep.subr.bf16.mxu0 %v8035_v17  ;;  %6399 = vmatprep.subr.bf16.mxu1 %v8037_v18  ;;  %v8131_v17 = vcombine.high %v620_v11, %v628_v12  ;;  %v8133_v18 = vcombine.high %v621_v13, %v629_v14  ;;  %v708_v2 = vld [vmem:[%s10725_s10 + $0x9f0] sm:$0xff]  ;;  %v709_v5 = vld [vmem:[%s10725_s10 + $0x9f8] sm:$0xff] }
 0x356   : > { %6236 = vmatpush1.bf16.msra.mxu0 %v8034_v24  ;;  %6400 = vmatpush1.bf16.msra.mxu1 %v8036_v25  ;;  %v8130_v24 = vcombine.low %v620_v11, %v628_v12  ;;  %v8132_v25 = vcombine.low %v621_v13, %v629_v14  ;;  %v724_v11 = vld [vmem:[%s10725_s10 + $0xa70] sm:$0xff]  ;;  %v717_v12 = vld [vmem:[%s10725_s10 + $0xa38] sm:$0xff]  ;;  %v8210_v14 = vcombine.low %v700_v63, %v708_v2 }
 0x357   : > { %6237 = vmatprep.subr.bf16.mxu0 %v8051_v60  ;;  %6401 = vmatprep.subr.bf16.mxu1 %v8053_v10  ;;  %v8147_v60 = vcombine.high %v636_v19, %v644_v20  ;;  %v8149_v10 = vcombine.high %v637_v21, %v645_v23  ;;  %v725_v13 = vld [vmem:[%s10725_s10 + $0xa78] sm:$0xff] }
 0x35a   : > { %6238 = vmatpush1.bf16.msra.mxu0 %v8050_v37  ;;  %6402 = vmatpush1.bf16.msra.mxu1 %v8052_v38  ;;  %v8146_v37 = vcombine.low %v636_v19, %v644_v20  ;;  %v8148_v38 = vcombine.low %v637_v21, %v645_v23  ;;  %v733_v19 = vld [vmem:[%s10725_s10 + $0xab8] sm:$0xff]  ;;  %v8228_v23 = vcombine.low %v717_v12, %v725_v13 }
 0x35b   : > { %6239 = vmatprep.subr.bf16.mxu0 %v8067_v39  ;;  %6403 = vmatprep.subr.bf16.mxu1 %v8069_v54  ;;  %v8163_v39 = vcombine.high %v652_v30, %v660_v31  ;;  %v8165_v54 = vcombine.high %v653_v33, %v661_v34  ;;  %v741_v20 = vld [vmem:[%s10725_s10 + $0xaf8] sm:$0xff] }
 0x35e   : > { %6240 = vmatpush1.bf16.msra.mxu0 %v8066_v49  ;;  %6404 = vmatpush1.bf16.msra.mxu1 %v8068_v50  ;;  %v8162_v49 = vcombine.low %v652_v30, %v660_v31  ;;  %v8164_v50 = vcombine.low %v653_v33, %v661_v34  ;;  %v749_v30 = vld [vmem:[%s10725_s10 + $0xb38] sm:$0xff]  ;;  %v8244_v34 = vcombine.low %v733_v19, %v741_v20 }
 0x35f   : > { %6241 = vmatprep.subr.bf16.mxu0 %v8083_v51  ;;  %6405 = vmatprep.subr.bf16.mxu1 %v8085_v52  ;;  %v8179_v51 = vcombine.high %v668_v43, %v676_v46  ;;  %v8181_v52 = vcombine.high %v669_v47, %v677_v48  ;;  %v757_v31 = vld [vmem:[%s10725_s10 + $0xb78] sm:$0xff] }
 0x362   : > { %6242 = vmatpush1.bf16.msra.mxu0 %v8082_v58  ;;  %6406 = vmatpush1.bf16.msra.mxu1 %v8084_v59  ;;  %v8178_v58 = vcombine.low %v668_v43, %v676_v46  ;;  %v8180_v59 = vcombine.low %v669_v47, %v677_v48  ;;  %v765_v43 = vld [vmem:[%s10725_s10 + $0xbb8] sm:$0xff]  ;;  %v8260_v48 = vcombine.low %v749_v30, %v757_v31 }
 0x363   : > { %6243 = vmatprep.subr.bf16.mxu0 %v8099_v61  ;;  %6407 = vmatprep.subr.bf16.mxu1 %v8101_v62  ;;  %v8195_v61 = vcombine.high %v684_v53, %v692_v55  ;;  %v8197_v62 = vcombine.high %v685_v56, %v693_v57  ;;  %v773_v46 = vld [vmem:[%s10725_s10 + $0xbf8] sm:$0xff] }
 0x366   : > { %6244 = vmatpush1.bf16.msra.mxu0 %v8098_v6  ;;  %6408 = vmatpush1.bf16.msra.mxu1 %v8100_v7  ;;  %v8196_v6 = vcombine.low %v685_v56, %v693_v57  ;;  %v8211_v7 = vcombine.high %v700_v63, %v708_v2  ;;  %v8276_v57 = vcombine.low %v765_v43, %v773_v46  ;;  %v797_v63 = vld [vmem:[%s10725_s10 + $0xcb8] sm:$0xff] }
 0x367   : > { %6245 = vmatprep.subr.bf16.mxu0 %v8115_v8  ;;  %6409 = vmatprep.subr.bf16.mxu1 %v8117_v9  ;;  %v8213_v8 = vcombine.high %v701_v3, %v709_v5  ;;  %v716_v9 = vld [vmem:[%s10725_s10 + $0xa30] sm:$0xff]  ;;  %v805_v2 = vld [vmem:[%s10725_s10 + $0xcf8] sm:$0xff] }
 0x368   : > { %v8226_v21 = vcombine.low %v716_v9, %v724_v11 }
 0x36a   : > { %6246 = vmatpush1.bf16.msra.mxu0 %v8114_v15  ;;  %6410 = vmatpush1.bf16.msra.mxu1 %v8116_v16  ;;  %v8227_v15 = vcombine.high %v716_v9, %v724_v11  ;;  %v8229_v16 = vcombine.high %v717_v12, %v725_v13  ;;  %v813_v9 = vld [vmem:[%s10725_s10 + $0xd38] sm:$0xff]  ;;  %v8308_v13 = vcombine.low %v797_v63, %v805_v2 }
 0x36b   : > { %6247 = vmatprep.subr.bf16.mxu0 %v8131_v17  ;;  %6411 = vmatprep.subr.bf16.mxu1 %v8133_v18  ;;  %v732_v17 = vld [vmem:[%s10725_s10 + $0xab0] sm:$0xff]  ;;  %v821_v11 = vld [vmem:[%s10725_s10 + $0xd78] sm:$0xff] }
 0x36c   : > { %v740_v18 = vld [vmem:[%s10725_s10 + $0xaf0] sm:$0xff] }
 0x36d   : > { %v8242_v33 = vcombine.low %v732_v17, %v740_v18 }
 0x36e   : > { %6248 = vmatpush1.bf16.msra.mxu0 %v8130_v24  ;;  %6412 = vmatpush1.bf16.msra.mxu1 %v8132_v25  ;;  %v8243_v24 = vcombine.high %v732_v17, %v740_v18  ;;  %v8245_v25 = vcombine.high %v733_v19, %v741_v20  ;;  %v829_v17 = vld [vmem:[%s10725_s10 + $0xdb8] sm:$0xff]  ;;  %v8324_v20 = vcombine.low %v813_v9, %v821_v11 }
 0x36f   : > { %6249 = vmatprep.subr.bf16.mxu0 %v8147_v60  ;;  %6413 = vmatprep.subr.bf16.mxu1 %v8149_v10  ;;  %v748_v60 = vld [vmem:[%s10725_s10 + $0xb30] sm:$0xff]  ;;  %v837_v18 = vld [vmem:[%s10725_s10 + $0xdf8] sm:$0xff] }
 0x370   : > { %v756_v10 = vld [vmem:[%s10725_s10 + $0xb70] sm:$0xff] }
 0x371   : > { %v8258_v47 = vcombine.low %v748_v60, %v756_v10 }
 0x372   : > { %6250 = vmatpush1.bf16.msra.mxu0 %v8146_v37  ;;  %6414 = vmatpush1.bf16.msra.mxu1 %v8148_v38  ;;  %v8259_v37 = vcombine.high %v748_v60, %v756_v10  ;;  %v8261_v38 = vcombine.high %v749_v30, %v757_v31  ;;  %v845_v60 = vld [vmem:[%s10725_s10 + $0xe38] sm:$0xff]  ;;  %v8340_v31 = vcombine.low %v829_v17, %v837_v18 }
 0x373   : > { %6260 = vmatprep.subr.bf16.mxu0 %v8163_v39  ;;  %6424 = vmatprep.subr.bf16.mxu1 %v8165_v54  ;;  %v764_v39 = vld [vmem:[%s10725_s10 + $0xbb0] sm:$0xff]  ;;  %v853_v10 = vld [vmem:[%s10725_s10 + $0xe78] sm:$0xff] }
 0x374   : > { %v772_v54 = vld [vmem:[%s10725_s10 + $0xbf0] sm:$0xff] }
 0x375   : > { %6252 = vmatmul.mubr.bf16.vlgmr.msra.gmra.mrb[12].mxu0 %v10844_v26  ;;  %6416 = vmatmul.mubr.bf16.vlgmr.msra.gmra.mrb[12].mxu1 %v10844_v26  ;;  %v8194_v26 = vcombine.low %v684_v53, %v692_v55  ;;  %v781_v53 = vld [vmem:[%s10725_s10 + $0xc38] sm:$0xff]  ;;  %v8274_v56 = vcombine.low %v764_v39, %v772_v54 }
 0x376   : > { %6261 = vmatpush1.bf16.msra.mxu0 %v8162_v49  ;;  %6425 = vmatpush1.bf16.msra.mxu1 %v8164_v50  ;;  %v8275_v49 = vcombine.high %v764_v39, %v772_v54  ;;  %v8277_v50 = vcombine.high %v765_v43, %v773_v46  ;;  %v789_v55 = vld [vmem:[%s10725_s10 + $0xc78] sm:$0xff]  ;;  %v8356_v46 = vcombine.low %v845_v60, %v853_v10 }
 0x377   : > { %6262 = vmatprep.subr.bf16.mxu0 %v8179_v51  ;;  %6426 = vmatprep.subr.bf16.mxu1 %v8181_v52  ;;  %v780_v51 = vld [vmem:[%s10725_s10 + $0xc30] sm:$0xff]  ;;  %v861_v39 = vld [vmem:[%s10725_s10 + $0xeb8] sm:$0xff] }
 0x378   : > { %6292 = vmatprep.mubr.bf16.mxu0 %v10855_v35  ;;  %6456 = vmatprep.mubr.bf16.mxu1 %v10855_v35  ;;  %v8212_v35 = vcombine.low %v701_v3, %v709_v5  ;;  %v788_v52 = vld [vmem:[%s10725_s10 + $0xc70] sm:$0xff]  ;;  %v8292_v5 = vcombine.low %v781_v53, %v789_v55  ;;  %v869_v54 = vld [vmem:[%s10725_s10 + $0xef8] sm:$0xff] }
 0x379   : > { %v8290_v3 = vcombine.low %v780_v51, %v788_v52 }
 0x37a   : > { %6263 = vmatpush1.bf16.msra.mxu0 %v8178_v58  ;;  %6427 = vmatpush1.bf16.msra.mxu1 %v8180_v59  ;;  %v8291_v58 = vcombine.high %v780_v51, %v788_v52  ;;  %v8293_v59 = vcombine.high %v781_v53, %v789_v55  ;;  %v877_v51 = vld [vmem:[%s10725_s10 + $0xf38] sm:$0xff]  ;;  %v8372_v55 = vcombine.low %v861_v39, %v869_v54 }
 0x37b   : > { %6264 = vmatprep.subr.bf16.mxu0 %v8195_v61  ;;  %6428 = vmatprep.subr.bf16.mxu1 %v8197_v62  ;;  %v796_v61 = vld [vmem:[%s10725_s10 + $0xcb0] sm:$0xff]  ;;  %v885_v52 = vld [vmem:[%s10725_s10 + $0xf78] sm:$0xff] }
 0x37c   : > { %v804_v62 = vld [vmem:[%s10725_s10 + $0xcf0] sm:$0xff] }
 0x37d   : > { %v8306_v12 = vcombine.low %v796_v61, %v804_v62 }
 0x37e   : > { %6265 = vmatpush1.bf16.msra.mxu0 %v8194_v26  ;;  %6429 = vmatpush1.bf16.msra.mxu1 %v8196_v6  ;;  %v8307_v26 = vcombine.high %v796_v61, %v804_v62  ;;  %v8309_v6 = vcombine.high %v797_v63, %v805_v2  ;;  %v893_v61 = vld [vmem:[%s10725_s10 + $0xfb8] sm:$0xff]  ;;  %v8388_v2 = vcombine.low %v877_v51, %v885_v52 }
 0x37f   : > { %6266 = vmatprep.subr.bf16.mxu0 %v8211_v7  ;;  %6430 = vmatprep.subr.bf16.mxu1 %v8213_v8  ;;  %v812_v7 = vld [vmem:[%s10725_s10 + $0xd30] sm:$0xff]  ;;  %v901_v62 = vld [vmem:[%s10725_s10 + $0xff8] sm:$0xff] }
 0x380   : > { %v820_v8 = vld [vmem:[%s10725_s10 + $0xd70] sm:$0xff] }
 0x381   : > { %v8322_v19 = vcombine.low %v812_v7, %v820_v8 }
 0x382   : > { %6267 = vmatpush1.bf16.msra.mxu0 %v8210_v14  ;;  %6431 = vmatpush1.bf16.msra.mxu1 %v8212_v35  ;;  %v8323_v14 = vcombine.high %v812_v7, %v820_v8  ;;  %v8325_v35 = vcombine.high %v813_v9, %v821_v11  ;;  %v909_v7 = vld [vmem:[%s10725_s10 + $0x1038] sm:$0xff]  ;;  %v8404_v11 = vcombine.low %v893_v61, %v901_v62 }
 0x383   : > { %6268 = vmatprep.subr.bf16.mxu0 %v8227_v15  ;;  %6432 = vmatprep.subr.bf16.mxu1 %v8229_v16  ;;  %v828_v15 = vld [vmem:[%s10725_s10 + $0xdb0] sm:$0xff]  ;;  %v917_v8 = vld [vmem:[%s10725_s10 + $0x1078] sm:$0xff] }
 0x384   : > { %v836_v16 = vld [vmem:[%s10725_s10 + $0xdf0] sm:$0xff] }
 0x385   : > { %v8338_v30 = vcombine.low %v828_v15, %v836_v16 }
 0x386   : > { %6269 = vmatpush1.bf16.msra.mxu0 %v8226_v21  ;;  %6433 = vmatpush1.bf16.msra.mxu1 %v8228_v23  ;;  %v8339_v21 = vcombine.high %v828_v15, %v836_v16  ;;  %v8341_v23 = vcombine.high %v829_v17, %v837_v18  ;;  %v925_v15 = vld [vmem:[%s10725_s10 + $0x10b8] sm:$0xff]  ;;  %v8420_v18 = vcombine.low %v909_v7, %v917_v8 }
 0x387   : > { %6270 = vmatprep.subr.bf16.mxu0 %v8243_v24  ;;  %6434 = vmatprep.subr.bf16.mxu1 %v8245_v25  ;;  %v844_v24 = vld [vmem:[%s10725_s10 + $0xe30] sm:$0xff]  ;;  %v933_v16 = vld [vmem:[%s10725_s10 + $0x10f8] sm:$0xff] }
 0x388   : > { %v852_v25 = vld [vmem:[%s10725_s10 + $0xe70] sm:$0xff] }
 0x389   : > { %v8354_v43 = vcombine.low %v844_v24, %v852_v25 }
 0x38a   : > { %6271 = vmatpush1.bf16.msra.mxu0 %v8242_v33  ;;  %6435 = vmatpush1.bf16.msra.mxu1 %v8244_v34  ;;  %v8355_v33 = vcombine.high %v844_v24, %v852_v25  ;;  %v8357_v34 = vcombine.high %v845_v60, %v853_v10  ;;  %v941_v24 = vld [vmem:[%s10725_s10 + $0x1138] sm:$0xff]  ;;  %v8436_v10 = vcombine.low %v925_v15, %v933_v16 }
 0x38b   : > { %6272 = vmatprep.subr.bf16.mxu0 %v8259_v37  ;;  %6436 = vmatprep.subr.bf16.mxu1 %v8261_v38  ;;  %v860_v37 = vld [vmem:[%s10725_s10 + $0xeb0] sm:$0xff]  ;;  %v949_v25 = vld [vmem:[%s10725_s10 + $0x1178] sm:$0xff] }
 0x38c   : > { %v868_v38 = vld [vmem:[%s10725_s10 + $0xef0] sm:$0xff] }
 0x38d   : > { %v8370_v53 = vcombine.low %v860_v37, %v868_v38 }
 0x38e   : > { %6273 = vmatpush1.bf16.msra.mxu0 %v8258_v47  ;;  %6437 = vmatpush1.bf16.msra.mxu1 %v8260_v48  ;;  %v8371_v47 = vcombine.high %v860_v37, %v868_v38  ;;  %v8373_v48 = vcombine.high %v861_v39, %v869_v54  ;;  %v957_v37 = vld [vmem:[%s10725_s10 + $0x11b8] sm:$0xff]  ;;  %v8452_v39 = vcombine.low %v941_v24, %v949_v25 }
 0x38f   : > { %6274 = vmatprep.subr.bf16.mxu0 %v8275_v49  ;;  %6438 = vmatprep.subr.bf16.mxu1 %v8277_v50  ;;  %v876_v49 = vld [vmem:[%s10725_s10 + $0xf30] sm:$0xff]  ;;  %v965_v38 = vld [vmem:[%s10725_s10 + $0x11f8] sm:$0xff] }
 0x390   : > { %v884_v50 = vld [vmem:[%s10725_s10 + $0xf70] sm:$0xff] }
 0x391   : > { %v8386_v63 = vcombine.low %v876_v49, %v884_v50 }
 0x392   : > { %6275 = vmatpush1.bf16.msra.mxu0 %v8274_v56  ;;  %6439 = vmatpush1.bf16.msra.mxu1 %v8276_v57  ;;  %v8387_v56 = vcombine.high %v876_v49, %v884_v50  ;;  %v8389_v57 = vcombine.high %v877_v51, %v885_v52  ;;  %v981_v49 = vld [vmem:[%s10725_s10 + $0x1278] sm:$0xff] }
 0x393   : > { %6276 = vmatprep.subr.bf16.mxu0 %v8291_v58  ;;  %6440 = vmatprep.subr.bf16.mxu1 %v8293_v59  ;;  %v892_v58 = vld [vmem:[%s10725_s10 + $0xfb0] sm:$0xff] }
 0x394   : > { %v900_v59 = vld [vmem:[%s10725_s10 + $0xff0] sm:$0xff] }
 0x395   : > { %v8402_v9 = vcombine.low %v892_v58, %v900_v59 }
 0x396   : > { %6277 = vmatpush1.bf16.msra.mxu0 %v8290_v3  ;;  %6441 = vmatpush1.bf16.msra.mxu1 %v8292_v5  ;;  %v8403_v3 = vcombine.high %v892_v58, %v900_v59  ;;  %v8405_v5 = vcombine.high %v893_v61, %v901_v62 }
 0x397   : > { %6278 = vmatprep.subr.bf16.mxu0 %v8307_v26  ;;  %6442 = vmatprep.subr.bf16.mxu1 %v8309_v6  ;;  %v908_v26 = vld [vmem:[%s10725_s10 + $0x1030] sm:$0xff] }
 0x398   : > { %v916_v6 = vld [vmem:[%s10725_s10 + $0x1070] sm:$0xff] }
 0x399   : > { %v8418_v17 = vcombine.low %v908_v26, %v916_v6 }
 0x39a   : > { %6279 = vmatpush1.bf16.msra.mxu0 %v8306_v12  ;;  %6443 = vmatpush1.bf16.msra.mxu1 %v8308_v13  ;;  %v8419_v12 = vcombine.high %v908_v26, %v916_v6  ;;  %v8421_v13 = vcombine.high %v909_v7, %v917_v8 }
 0x39b   : > { %6280 = vmatprep.subr.bf16.mxu0 %v8323_v14  ;;  %6444 = vmatprep.subr.bf16.mxu1 %v8325_v35  ;;  %v924_v14 = vld [vmem:[%s10725_s10 + $0x10b0] sm:$0xff] }
 0x39c   : > { %v932_v35 = vld [vmem:[%s10725_s10 + $0x10f0] sm:$0xff] }
 0x39d   : > { %v8434_v60 = vcombine.low %v924_v14, %v932_v35 }
 0x39e   : > { %6281 = vmatpush1.bf16.msra.mxu0 %v8322_v19  ;;  %6445 = vmatpush1.bf16.msra.mxu1 %v8324_v20  ;;  %v8435_v19 = vcombine.high %v924_v14, %v932_v35  ;;  %v8437_v20 = vcombine.high %v925_v15, %v933_v16 }
 0x39f   : > { %6282 = vmatprep.subr.bf16.mxu0 %v8339_v21  ;;  %6446 = vmatprep.subr.bf16.mxu1 %v8341_v23  ;;  %v940_v21 = vld [vmem:[%s10725_s10 + $0x1130] sm:$0xff] }
 0x3a0   : > { %v948_v23 = vld [vmem:[%s10725_s10 + $0x1170] sm:$0xff] }
 0x3a2   : > { %6283 = vmatpush1.bf16.msra.mxu0 %v8338_v30  ;;  %6447 = vmatpush1.bf16.msra.mxu1 %v8340_v31  ;;  %v8451_v30 = vcombine.high %v940_v21, %v948_v23  ;;  %v8453_v31 = vcombine.high %v941_v24, %v949_v25 }
 0x3a3   : > { %6284 = vmatprep.subr.bf16.mxu0 %v8355_v33  ;;  %6448 = vmatprep.subr.bf16.mxu1 %v8357_v34  ;;  %v956_v33 = vld [vmem:[%s10725_s10 + $0x11b0] sm:$0xff] }
 0x3a4   : > { %v964_v34 = vld [vmem:[%s10725_s10 + $0x11f0] sm:$0xff] }
 0x3a5   : > { %v8467_v54 = vcombine.high %v956_v33, %v964_v34  ;;  %v8466_v50 = vcombine.low %v956_v33, %v964_v34 }
 0x3a6   : > { %6285 = vmatpush1.bf16.msra.mxu0 %v8354_v43  ;;  %6449 = vmatpush1.bf16.msra.mxu1 %v8356_v46  ;;  %v8469_v43 = vcombine.high %v957_v37, %v965_v38  ;;  %v972_v46 = vld [vmem:[%s10725_s10 + $0x1230] sm:$0xff] }
 0x3a7   : > { %6286 = vmatprep.subr.bf16.mxu0 %v8371_v47  ;;  %6450 = vmatprep.subr.bf16.mxu1 %v8373_v48  ;;  %v980_v47 = vld [vmem:[%s10725_s10 + $0x1270] sm:$0xff]  ;;  %v973_v48 = vld [vmem:[%s10725_s10 + $0x1238] sm:$0xff] }
 0x3a8   : > { %v8483_v51 = vcombine.high %v972_v46, %v980_v47  ;;  %v8485_v52 = vcombine.high %v973_v48, %v981_v49  ;;  %v8482_v58 = vcombine.low %v972_v46, %v980_v47  ;;  %v8484_v59 = vcombine.low %v973_v48, %v981_v49 }
 0x3aa   : > { %6287 = vmatpush1.bf16.msra.mxu0 %v8370_v53  ;;  %6451 = vmatpush1.bf16.msra.mxu1 %v8372_v55  ;;  %v988_v53 = vld [vmem:[%s10725_s10 + $0x12b0] sm:$0xff] }
 0x3ab   : > { %6288 = vmatprep.subr.bf16.mxu0 %v8387_v56  ;;  %6452 = vmatprep.subr.bf16.mxu1 %v8389_v57  ;;  %v996_v55 = vld [vmem:[%s10725_s10 + $0x12f0] sm:$0xff]  ;;  %v989_v56 = vld [vmem:[%s10725_s10 + $0x12b8] sm:$0xff] }
 0x3ac   : > { %v997_v57 = vld [vmem:[%s10725_s10 + $0x12f8] sm:$0xff]  ;;  %v8499_v61 = vcombine.high %v988_v53, %v996_v55  ;;  %v8498_v26 = vcombine.low %v988_v53, %v996_v55 }
 0x3ad   : > { %v8501_v62 = vcombine.high %v989_v56, %v997_v57  ;;  %v8500_v6 = vcombine.low %v989_v56, %v997_v57 }
 0x3ae   : > { %6289 = vmatpush1.bf16.msra.mxu0 %v8386_v63  ;;  %6453 = vmatpush1.bf16.msra.mxu1 %v8388_v2  ;;  %v1004_v63 = vld [vmem:[%s10725_s10 + $0x1330] sm:$0xff] }
 0x3af   : > { %6290 = vmatprep.subr.bf16.mxu0 %v8403_v3  ;;  %6454 = vmatprep.subr.bf16.mxu1 %v8405_v5  ;;  %v1012_v2 = vld [vmem:[%s10725_s10 + $0x1370] sm:$0xff]  ;;  %v1005_v3 = vld [vmem:[%s10725_s10 + $0x1338] sm:$0xff] }
 0x3b0   : > { %v1013_v5 = vld [vmem:[%s10725_s10 + $0x1378] sm:$0xff]  ;;  %v8515_v7 = vcombine.high %v1004_v63, %v1012_v2  ;;  %v8514_v14 = vcombine.low %v1004_v63, %v1012_v2 }
 0x3b1   : > { %v8517_v8 = vcombine.high %v1005_v3, %v1013_v5  ;;  %v8516_v35 = vcombine.low %v1005_v3, %v1013_v5 }
 0x3b2   : > { %6291 = vmatpush1.bf16.msra.mxu0 %v8402_v9  ;;  %6455 = vmatpush1.bf16.msra.mxu1 %v8404_v11  ;;  %v1020_v9 = vld [vmem:[%s10725_s10 + $0x13b0] sm:$0xff] }
 0x3b3   : > { %6301 = vmatprep.subr.bf16.mxu0 %v8419_v12  ;;  %6465 = vmatprep.subr.bf16.mxu1 %v8421_v13  ;;  %v1028_v11 = vld [vmem:[%s10725_s10 + $0x13f0] sm:$0xff]  ;;  %v1021_v12 = vld [vmem:[%s10725_s10 + $0x13b8] sm:$0xff] }
 0x3b4   : > { %v1029_v13 = vld [vmem:[%s10725_s10 + $0x13f8] sm:$0xff]  ;;  %v8531_v15 = vcombine.high %v1020_v9, %v1028_v11 }
 0x3b5   : > { %6293 = vmatmul.mubr.bf16.vlgmr.msra.gmra.mrb[12].mxu0 %v10926_v41  ;;  %6457 = vmatmul.mubr.bf16.vlgmr.msra.gmra.mrb[12].mxu1 %v10926_v41  ;;  %v8450_v41 = vcombine.low %v940_v21, %v948_v23  ;;  %v8533_v16 = vcombine.high %v1021_v12, %v1029_v13  ;;  %v8530_v21 = vcombine.low %v1020_v9, %v1028_v11 }
 0x3b6   : > { %6302 = vmatpush1.bf16.msra.mxu0 %v8418_v17  ;;  %6466 = vmatpush1.bf16.msra.mxu1 %v8420_v18  ;;  %v1036_v17 = vld [vmem:[%s10725_s10 + $0x1430] sm:$0xff]  ;;  %v8532_v23 = vcombine.low %v1021_v12, %v1029_v13 }
 0x3b7   : > { %6303 = vmatprep.subr.bf16.mxu0 %v8435_v19  ;;  %6467 = vmatprep.subr.bf16.mxu1 %v8437_v20  ;;  %v1044_v18 = vld [vmem:[%s10725_s10 + $0x1470] sm:$0xff]  ;;  %v1037_v19 = vld [vmem:[%s10725_s10 + $0x1438] sm:$0xff] }
 0x3b8   : > { %6333 = vmatprep.mubr.bf16.mxu0 %v10858_v36  ;;  %6497 = vmatprep.mubr.bf16.mxu1 %v10858_v36  ;;  %v8468_v36 = vcombine.low %v957_v37, %v965_v38  ;;  %v1045_v20 = vld [vmem:[%s10725_s10 + $0x1478] sm:$0xff]  ;;  %v8547_v24 = vcombine.high %v1036_v17, %v1044_v18  ;;  %v8546_v33 = vcombine.low %v1036_v17, %v1044_v18 }
 0x3b9   : > { %v8549_v25 = vcombine.high %v1037_v19, %v1045_v20  ;;  %v8548_v34 = vcombine.low %v1037_v19, %v1045_v20 }
 0x3ba   : > { %6304 = vmatpush1.bf16.msra.mxu0 %v8434_v60  ;;  %6468 = vmatpush1.bf16.msra.mxu1 %v8436_v10  ;;  %v1052_v60 = vld [vmem:[%s10725_s10 + $0x14b0] sm:$0xff] }
 0x3bb   : > { %6305 = vmatprep.subr.bf16.mxu0 %v8451_v30  ;;  %6469 = vmatprep.subr.bf16.mxu1 %v8453_v31  ;;  %v1060_v10 = vld [vmem:[%s10725_s10 + $0x14f0] sm:$0xff]  ;;  %v1053_v30 = vld [vmem:[%s10725_s10 + $0x14b8] sm:$0xff] }
 0x3bc   : > { %v1061_v31 = vld [vmem:[%s10725_s10 + $0x14f8] sm:$0xff]  ;;  %v8563_v37 = vcombine.high %v1052_v60, %v1060_v10  ;;  %v8562_v46 = vcombine.low %v1052_v60, %v1060_v10 }
 0x3bd   : > { %v8565_v38 = vcombine.high %v1053_v30, %v1061_v31  ;;  %v8564_v47 = vcombine.low %v1053_v30, %v1061_v31 }
 0x3be   : > { %6306 = vmatpush1.bf16.msra.mxu0 %v8450_v41  ;;  %6470 = vmatpush1.bf16.msra.mxu1 %v8452_v39  ;;  %v1068_v41 = vld [vmem:[%s10725_s10 + $0x1530] sm:$0xff] }
 0x3bf   : > { %6307 = vmatprep.subr.bf16.mxu0 %v8467_v54  ;;  %6471 = vmatprep.subr.bf16.mxu1 %v8469_v43  ;;  %v1076_v39 = vld [vmem:[%s10725_s10 + $0x1570] sm:$0xff]  ;;  %v1069_v54 = vld [vmem:[%s10725_s10 + $0x1538] sm:$0xff] }
 0x3c0   : > { %v1077_v43 = vld [vmem:[%s10725_s10 + $0x1578] sm:$0xff]  ;;  %v8579_v48 = vcombine.high %v1068_v41, %v1076_v39  ;;  %v8578_v53 = vcombine.low %v1068_v41, %v1076_v39 }
 0x3c1   : > { %v8581_v49 = vcombine.high %v1069_v54, %v1077_v43  ;;  %v8580_v55 = vcombine.low %v1069_v54, %v1077_v43 }
 0x3c2   : > { %6308 = vmatpush1.bf16.msra.mxu0 %v8466_v50  ;;  %6472 = vmatpush1.bf16.msra.mxu1 %v8468_v36  ;;  %v1084_v50 = vld [vmem:[%s10725_s10 + $0x15b0] sm:$0xff] }
 0x3c3   : > { %6309 = vmatprep.subr.bf16.mxu0 %v8483_v51  ;;  %6473 = vmatprep.subr.bf16.mxu1 %v8485_v52  ;;  %v1092_v36 = vld [vmem:[%s10725_s10 + $0x15f0] sm:$0xff]  ;;  %v1085_v51 = vld [vmem:[%s10725_s10 + $0x15b8] sm:$0xff] }
 0x3c4   : > { %v1093_v52 = vld [vmem:[%s10725_s10 + $0x15f8] sm:$0xff]  ;;  %v8595_v56 = vcombine.high %v1084_v50, %v1092_v36  ;;  %v8594_v63 = vcombine.low %v1084_v50, %v1092_v36  ;;  %v1190_v36 = vsub.s32 3, %v10773_v44 }
 0x3c5   : > { %v8597_v57 = vcombine.high %v1085_v51, %v1093_v52  ;;  %v8596_v2 = vcombine.low %v1085_v51, %v1093_v52  ;;  %v11663_v50 = vld [vmem:[%s386_s15] sm:$0xff]  ;;  %v9230_v51 = vld [vmem:[%s10735_s24 + $0xc0] sm:$0xff]  }
 0x3c6   : > { %6310 = vmatpush1.bf16.msra.mxu0 %v8482_v58  ;;  %6474 = vmatpush1.bf16.msra.mxu1 %v8484_v59  ;;  %v1100_v58 = vld [vmem:[%s10725_s10 + $0x1630] sm:$0xff] }
 0x3c7   : > { %6311 = vmatprep.subr.bf16.mxu0 %v8499_v61  ;;  %6475 = vmatprep.subr.bf16.mxu1 %v8501_v62  ;;  %v1108_v59 = vld [vmem:[%s10725_s10 + $0x1670] sm:$0xff]  ;;  %v1101_v61 = vld [vmem:[%s10725_s10 + $0x1638] sm:$0xff] }
 0x3c8   : > { %v1109_v62 = vld [vmem:[%s10725_s10 + $0x1678] sm:$0xff]  ;;  %v8611_v3 = vcombine.high %v1100_v58, %v1108_v59  ;;  %v8610_v9 = vcombine.low %v1100_v58, %v1108_v59 }
 0x3c9   : > { %v8613_v5 = vcombine.high %v1101_v61, %v1109_v62  ;;  %v8612_v11 = vcombine.low %v1101_v61, %v1109_v62  ;;  %v9231_v61 = vld [vmem:[%s10735_s24 + $0xc8] sm:$0xff]   ;;  %v11682_v62 = vld [vmem:[%s386_s15 + $0x8] sm:$0xff] }
 0x3ca   : > { %6312 = vmatpush1.bf16.msra.mxu0 %v8498_v26  ;;  %6476 = vmatpush1.bf16.msra.mxu1 %v8500_v6  ;;  %v1116_v26 = vld [vmem:[%s10725_s10 + $0x16b0] sm:$0xff] }
 0x3cb   : > { %6313 = vmatprep.subr.bf16.mxu0 %v8515_v7  ;;  %6477 = vmatprep.subr.bf16.mxu1 %v8517_v8  ;;  %v1124_v6 = vld [vmem:[%s10725_s10 + $0x16f0] sm:$0xff]  ;;  %v1117_v7 = vld [vmem:[%s10725_s10 + $0x16b8] sm:$0xff] }
 0x3cc   : > { %v1125_v8 = vld [vmem:[%s10725_s10 + $0x16f8] sm:$0xff]  ;;  %v8627_v12 = vcombine.high %v1116_v26, %v1124_v6  ;;  %v8626_v17 = vcombine.low %v1116_v26, %v1124_v6 }
 0x3cd   : > { %v8629_v13 = vcombine.high %v1117_v7, %v1125_v8  ;;  %v8628_v18 = vcombine.low %v1117_v7, %v1125_v8  ;;  %v9208_v7 = vld [vmem:[%s10735_s24 + $0x10] sm:$0xff]   ;;  %v1223_v8 = vrot.slane %v11682_v62, %v1190_v36 }
 0x3ce   : > { %6314 = vmatpush1.bf16.msra.mxu0 %v8514_v14  ;;  %6478 = vmatpush1.bf16.msra.mxu1 %v8516_v35  ;;  %v1132_v14 = vld [vmem:[%s10725_s10 + $0x1730] sm:$0xff] }
 0x3cf   : > { %6315 = vmatprep.subr.bf16.mxu0 %v8531_v15  ;;  %6479 = vmatprep.subr.bf16.mxu1 %v8533_v16  ;;  %v1140_v35 = vld [vmem:[%s10725_s10 + $0x1770] sm:$0xff]  ;;  %v1133_v15 = vld [vmem:[%s10725_s10 + $0x1738] sm:$0xff] }
 0x3d0   : > { %v1141_v16 = vld [vmem:[%s10725_s10 + $0x1778] sm:$0xff]  ;;  %v8643_v19 = vcombine.high %v1132_v14, %v1140_v35  ;;  %v8642_v60 = vcombine.low %v1132_v14, %v1140_v35 }
 0x3d1   : > { %v8645_v20 = vcombine.high %v1133_v15, %v1141_v16  ;;  %v8644_v10 = vcombine.low %v1133_v15, %v1141_v16  ;;  %v9233_v15 = vld [vmem:[%s10735_s24 + $0xd8] sm:$0xff]  }
 0x3d2   : > { %6316 = vmatpush1.bf16.msra.mxu0 %v8530_v21  ;;  %6480 = vmatpush1.bf16.msra.mxu1 %v8532_v23  ;;  %v1148_v21 = vld [vmem:[%s10725_s10 + $0x17b0] sm:$0xff] }
 0x3d3   : > { %6317 = vmatprep.subr.bf16.mxu0 %v8547_v24  ;;  %6481 = vmatprep.subr.bf16.mxu1 %v8549_v25  ;;  %v1156_v23 = vld [vmem:[%s10725_s10 + $0x17f0] sm:$0xff]  ;;  %v1149_v24 = vld [vmem:[%s10725_s10 + $0x17b8] sm:$0xff] }
 0x3d4   : > { %v1157_v25 = vld [vmem:[%s10725_s10 + $0x17f8] sm:$0xff]  ;;  %v8659_v30 = vcombine.high %v1148_v21, %v1156_v23  ;;  %v8658_v41 = vcombine.low %v1148_v21, %v1156_v23 }
 0x3d5   : > { %v8661_v31 = vcombine.high %v1149_v24, %v1157_v25  ;;  %v8660_v39 = vcombine.low %v1149_v24, %v1157_v25  ;;  %v9209_v24 = vld [vmem:[%s10735_s24 + $0x18] sm:$0xff]  }
 0x3d6   : > { %6318 = vmatpush1.bf16.msra.mxu0 %v8546_v33  ;;  %6482 = vmatpush1.bf16.msra.mxu1 %v8548_v34  ;;  %v1164_v33 = vld [vmem:[%s10725_s10 + $0x1830] sm:$0xff] }
 0x3d7   : > { %6319 = vmatprep.subr.bf16.mxu0 %v8563_v37  ;;  %6483 = vmatprep.subr.bf16.mxu1 %v8565_v38  ;;  %v1172_v34 = vld [vmem:[%s10725_s10 + $0x1870] sm:$0xff]  ;;  %v1165_v37 = vld [vmem:[%s10725_s10 + $0x1838] sm:$0xff] }
 0x3d8   : > { %v1173_v38 = vld [vmem:[%s10725_s10 + $0x1878] sm:$0xff]  ;;  %v8675_v54 = vcombine.high %v1164_v33, %v1172_v34 }
 0x3d9   : > { %v8677_v43 = vcombine.high %v1165_v37, %v1173_v38 }
 0x3da   : > { %6320 = vmatpush1.bf16.msra.mxu0 %v8562_v46  ;;  %6484 = vmatpush1.bf16.msra.mxu1 %v8564_v47  ;;  %v8674_v46 = vcombine.low %v1164_v33, %v1172_v34  ;;  %v8676_v47 = vcombine.low %v1165_v37, %v1173_v38  ;;  %v9226_v33 = vld [vmem:[%s10735_s24 + $0xa0] sm:$0xff]   ;;  %v9219_v34 = vld [vmem:[%s10735_s24 + $0x68] sm:$0xff]  }
 0x3db   : > { %6321 = vmatprep.subr.bf16.mxu0 %v8579_v48  ;;  %6485 = vmatprep.subr.bf16.mxu1 %v8581_v49  ;;  %v1182_v48 = vsub.s32 1, %v10773_v44  ;;  %v9214_v49 = vld [vmem:[%s10735_s24 + $0x40] sm:$0xff]   ;;  %v9235_v37 = vld [vmem:[%s10735_s24 + $0xe8] sm:$0xff]  }
 0x3dc   : > { %v9211_v38 = vld [vmem:[%s10735_s24 + $0x28] sm:$0xff]  }
 0x3dd   : > { %v1183_v52 = vrot.slane %v11663_v50, %v1182_v48  ;;  %v1215_v6 = vrot.slane %v11682_v62, %v1182_v48  ;;  %v9212_v48 = vld [vmem:[%s10735_s24 + $0x30] sm:$0xff]  }
 0x3de   : > { %6322 = vmatpush1.bf16.msra.mxu0 %v8578_v53  ;;  %6486 = vmatpush1.bf16.msra.mxu1 %v8580_v55  ;;  %v1191_v53 = vrot.slane %v11663_v50, %v1190_v36  ;;  %v9228_v36 = vld [vmem:[%s10735_s24 + $0xb0] sm:$0xff]  }
 0x3df   : > { %6323 = vmatprep.subr.bf16.mxu0 %v8595_v56  ;;  %6487 = vmatprep.subr.bf16.mxu1 %v8597_v57  ;;  %v9947_v55 = vadd.f32 %v11244_v42, %v1183_v52  ;;  %v8696_v56 = vld [vmem:[%s10735_s24] sm:$0xff]   ;;  %v1178_v42 = vsub.s32 0, %v10773_v44 }
 0x3e0   : > { %v9222_v57 = vld [vmem:[%s10735_s24 + $0x80] sm:$0xff]  }
 0x3e1   : > { %v6548_v58 = vmax.f32 %v9947_v55, 0.0 }
 0x3e2   : > { %6324 = vmatpush1.bf16.msra.mxu0 %v8594_v63  ;;  %6488 = vmatpush1.bf16.msra.mxu1 %v8596_v2  ;;  %v1186_v63 = vsub.s32 2, %v10773_v44  ;;  %v9223_v2 = vld [vmem:[%s10735_s24 + $0x88] sm:$0xff]  }
 0x3e3   : > { %6325 = vmatprep.subr.bf16.mxu0 %v8611_v3  ;;  %6489 = vmatprep.subr.bf16.mxu1 %v8613_v5  ;;  %v9216_v3 = vld [vmem:[%s10735_s24 + $0x50] sm:$0xff]   ;;  %v1211_v5 = vrot.slane %v11682_v62, %v1178_v42 }
 0x3e4   : > { %v1219_v26 = vrot.slane %v11682_v62, %v1186_v63 }
 0x3e6   : > { %6326 = vmatpush1.bf16.msra.mxu0 %v8610_v9  ;;  %6490 = vmatpush1.bf16.msra.mxu1 %v8612_v11  ;;  %v9224_v11 = vld [vmem:[%s10735_s24 + $0x90] sm:$0xff]  }
 0x3e7   : > { %6327 = vmatprep.subr.bf16.mxu0 %v8627_v12  ;;  %6491 = vmatprep.subr.bf16.mxu1 %v8629_v13  ;;  %v9217_v12 = vld [vmem:[%s10735_s24 + $0x58] sm:$0xff]  }
 0x3ea   : > { %6328 = vmatpush1.bf16.msra.mxu0 %v8626_v17  ;;  %6492 = vmatpush1.bf16.msra.mxu1 %v8628_v18 }
 0x3eb   : > { %6329 = vmatprep.subr.bf16.mxu0 %v8643_v19  ;;  %6493 = vmatprep.subr.bf16.mxu1 %v8645_v20 }
 0x3ee   : > { %6330 = vmatpush1.bf16.msra.mxu0 %v8642_v60  ;;  %6494 = vmatpush1.bf16.msra.mxu1 %v8644_v10  ;;  %v9225_v60 = vld [vmem:[%s10735_s24 + $0x98] sm:$0xff]   ;;  %v9218_v10 = vld [vmem:[%s10735_s24 + $0x60] sm:$0xff]  }
 0x3ef   : > { %6331 = vmatprep.subr.bf16.mxu0 %v8659_v30  ;;  %6495 = vmatprep.subr.bf16.mxu1 %v8661_v31  ;;  %v9234_v30 = vld [vmem:[%s10735_s24 + $0xe0] sm:$0xff]  }
 0x3f0   : > { %v9210_v31 = vld [vmem:[%s10735_s24 + $0x20] sm:$0xff]  }
 0x3f2   : > { %6332 = vmatpush1.bf16.msra.mxu0 %v8658_v41  ;;  %6496 = vmatpush1.bf16.msra.mxu1 %v8660_v39  ;;  %v9227_v41 = vld [vmem:[%s10735_s24 + $0xa8] sm:$0xff]   ;;  %v9220_v39 = vld [vmem:[%s10735_s24 + $0x70] sm:$0xff]  }
 0x3f3   : > { %6342 = vmatprep.subr.bf16.mxu0 %v8675_v54  ;;  %6506 = vmatprep.subr.bf16.mxu1 %v8677_v43  ;;  %v1198_v54 = vsub.s32 5, %v10773_v44  ;;  %v9236_v43 = vld [vmem:[%s10735_s24 + $0xf0] sm:$0xff]  }
 0x3f5   : > { %6334 = vmatmul.mubr.bf16.vlgmr.msra.gmra.mrb[12].mxu0 %v10849_v32  ;;  %6498 = vmatmul.mubr.bf16.vlgmr.msra.gmra.mrb[12].mxu1 %v10849_v32  ;;  %v9949_v32 = vadd.f32 %v11248_v45, %v1191_v53  ;;  %v9207_v45 = vld [vmem:[%s10735_s24 + $0x8] sm:$0xff]   ;;  %v1199_v52 = vrot.slane %v11663_v50, %v1198_v54  ;;  %v9237_v53 = vld [vmem:[%s10735_s24 + $0xf8] sm:$0xff]  }
 0x3f6   : > { %6343 = vmatpush1.bf16.msra.mxu0 %v8674_v46  ;;  %6507 = vmatpush1.bf16.msra.mxu1 %v8676_v47  ;;  %v1206_v46 = vsub.s32 7, %v10773_v44  ;;  %v1179_v47 = vrot.slane %v11663_v50, %v1178_v42 }
 0x3f7   : > { %6374 = vmatprep.mubr.bf16.mxu0 %v10437_v1  ;;  %6538 = vmatprep.mubr.bf16.mxu1 %v10437_v1  ;;  %v9215_v1 = vld [vmem:[%s10735_s24 + $0x48] sm:$0xff]   ;;  %v6550_v59 = vmax.f32 %v9949_v32, 0.0 }
 0x3f8   : > { %9667 = vmatprep.subr.bf16.mxu0 %v9214_v49  ;;  %9699 = vmatprep.subr.bf16.mxu1 %v9230_v51  ;;  %v1187_v49 = vrot.slane %v11663_v50, %v1186_v63  ;;  %v9221_v51 = vld [vmem:[%s10735_s24 + $0x78] sm:$0xff]   ;;  %v1207_v55 = vrot.slane %v11663_v50, %v1206_v46  ;;  %v9946_v32 = vadd.f32 %v11238_v0, %v1179_v47  ;;  %v9238_v0 = vld [vmem:[%s10735_s24 + $0x100] sm:$0xff]  }
 0x3f9   : > { %v9245_v47 = vld [vmem:[%s10735_s24 + $0x138] sm:$0xff]  }
 0x3fa   : > { %v9953_v42 = vadd.f32 %v11470_v29, %v1207_v55  ;;  %v9263_v29 = vld [vmem:[%s10735_s24 + $0x1c8] sm:$0xff]  }
 0x401   : > { %8684 = vmatmul.mubr.msk.bf16.vlgmr.msra.gmra.mrb[12].mxu0 %vm5231_vm0, %v11006_v4  ;;  %8685 = vmatmul.mubr.msk.bf16.vlgmr.msra.gmra.mrb[12].mxu1 %vm5231_vm0, %v11006_v4  ;;  %v9232_v4 = vld [vmem:[%s10735_s24 + $0xd0] sm:$0xff]  }
 0x402   : > { %9669 = vmatpush3.bf16.msra.mxu0 %v8696_v56  ;;  %9701 = vmatpush3.bf16.msra.mxu1 %v9222_v57  ;;  %v9213_v56 = vld [vmem:[%s10735_s24 + $0x38] sm:$0xff]   ;;  %v9948_v57 = vadd.f32 %v11242_v40, %v1187_v49  ;;  %v9254_v40 = vld [vmem:[%s10735_s24 + $0x180] sm:$0xff]  }
 0x403   : > { %7140 = vmatprep.mubr.f32.mxu0 %v6548_v58  ;;  %7210 = vmatprep.mubr.f32.mxu1 %v6550_v59  ;;  %v9229_v58 = vld [vmem:[%s10735_s24 + $0xb8] sm:$0xff]   ;;  %v9951_v59 = vadd.f32 %v11466_v28, %v1199_v52  ;;  %v6554_v28 = vmax.f32 %v9953_v42, 0.0  ;;  %v9270_v52 = vld [vmem:[%s10735_s24 + $0x200] sm:$0xff]  }
 0x404   : > { %9671 = vmatprep.subr.bf16.mxu0 %v9215_v1  ;;  %9703 = vmatprep.subr.bf16.mxu1 %v9231_v61  ;;  %v9246_v1 = vld [vmem:[%s10735_s24 + $0x140] sm:$0xff]   ;;  %v6549_v63 = vmax.f32 %v9948_v57, 0.0  ;;  %v9261_v49 = vld [vmem:[%s10735_s24 + $0x1b8] sm:$0xff]   ;;  %v9271_v57 = vld [vmem:[%s10735_s24 + $0x208] sm:$0xff]  }
 0x405   : > { %v9262_v61 = vld [vmem:[%s10735_s24 + $0x1c0] sm:$0xff]   ;;  %v9297_v42 = vld [vmem:[%s10735_s24 + $0x2d8] sm:$0xff]  }
 0x406   : > { %9673 = vmatpush3.bf16.msra.mxu0 %v9207_v45  ;;  %9705 = vmatpush3.bf16.msra.mxu1 %v9223_v2  ;;  %v6547_v45 = vmax.f32 %v9946_v32, 0.0  ;;  %v6552_v2 = vmax.f32 %v9951_v59, 0.0  ;;  %v9288_v59 = vld [vmem:[%s10735_s24 + $0x290] sm:$0xff]  }
 0x407   : > { %9675 = vmatprep.subr.bf16.mxu0 %v9216_v3  ;;  %9707 = vmatprep.subr.bf16.mxu1 %v9232_v4  ;;  %v9247_v3 = vld [vmem:[%s10735_s24 + $0x148] sm:$0xff]  }
 0x408   : > { %v6048_v9 = vpop.f32.mrb[8].mxu0  ;;  %v6212_v14 = vpop.f32.mrb[8].mxu1  ;;  %v9239_v4 = vld [vmem:[%s10735_s24 + $0x108] sm:$0xff]  }
 0x409   : > { %v11697_v13 = vadd.f32 %v6048_v9, %v1211_v5  ;;  %v6050_v35 = vpop.f32.mrb[9].mxu0  ;;  %v11700_v16 = vadd.f32 %v6212_v14, %v1219_v26  ;;  %v6214_v18 = vpop.f32.mrb[9].mxu1  ;;  %v9255_v5 = vld [vmem:[%s10735_s24 + $0x188] sm:$0xff]   ;;  %v9248_v26 = vld [vmem:[%s10735_s24 + $0x150] sm:$0xff]   ;;  %v9249_v9 = vld [vmem:[%s10735_s24 + $0x158] sm:$0xff]  }
 0x40a   : > { %9677 = vmatpush3.bf16.msra.mxu0 %v9208_v7  ;;  %v11702_v17 = vadd.f32 %v6050_v35, %v1215_v6  ;;  %v6052_v19 = vpop.f32.mrb[10].mxu0  ;;  %9709 = vmatpush3.bf16.msra.mxu1 %v9224_v11  ;;  %v11704_v20 = vadd.f32 %v6214_v18, %v1223_v8  ;;  %v6216_v21 = vpop.f32.mrb[10].mxu1  ;;  %v9264_v6 = vld [vmem:[%s10735_s24 + $0x1d0] sm:$0xff]   ;;  %v9265_v11 = vld [vmem:[%s10735_s24 + $0x1d8] sm:$0xff]   ;;  %v9250_v35 = vld [vmem:[%s10735_s24 + $0x160] sm:$0xff]  }
 0x40b   : > { %v6053_v23 = vpop.f32.mrb[11].mxu0  ;;  %9679 = vmatprep.subr.bf16.mxu0 %v9217_v12  ;;  %v6217_v25 = vpop.f32.mrb[11].mxu1  ;;  %9711 = vmatprep.subr.bf16.mxu1 %v9233_v15  ;;  %v9240_v7 = vld [vmem:[%s10735_s24 + $0x110] sm:$0xff]   ;;  %v9241_v12 = vld [vmem:[%s10735_s24 + $0x118] sm:$0xff]   ;;  %v9266_v15 = vld [vmem:[%s10735_s24 + $0x1e0] sm:$0xff]  }
 0x40c   : > { %v9256_v8 = vld [vmem:[%s10735_s24 + $0x190] sm:$0xff]   ;;  %v9257_v14 = vld [vmem:[%s10735_s24 + $0x198] sm:$0xff]   ;;  %v9242_v18 = vld [vmem:[%s10735_s24 + $0x120] sm:$0xff]   ;;  %v6556_v55 = vmax.f32 %v11702_v17, 0.0  ;;  %v6558_v32 = vmax.f32 %v11704_v20, 0.0 }
 0x40d   : > { %v9258_v19 = vld [vmem:[%s10735_s24 + $0x1a0] sm:$0xff]   ;;  %v9251_v21 = vld [vmem:[%s10735_s24 + $0x168] sm:$0xff]   ;;  %v9296_v17 = vld [vmem:[%s10735_s24 + $0x2d0] sm:$0xff]  }
 0x40e   : > { %9681 = vmatpush3.bf16.msra.mxu0 %v9209_v24  ;;  %9713 = vmatpush3.bf16.msra.mxu1 %v9225_v60  ;;  %v9267_v23 = vld [vmem:[%s10735_s24 + $0x1e8] sm:$0xff]   ;;  %v1194_v24 = vsub.s32 4, %v10773_v44  ;;  %v1202_v60 = vsub.s32 6, %v10773_v44  ;;  %v9272_v20 = vld [vmem:[%s10735_s24 + $0x210] sm:$0xff]  }
 0x40f   : > { %9683 = vmatprep.subr.bf16.mxu0 %v9218_v10  ;;  %9715 = vmatprep.subr.bf16.mxu1 %v9234_v30  ;;  %v9243_v25 = vld [vmem:[%s10735_s24 + $0x128] sm:$0xff]   ;;  %v9252_v30 = vld [vmem:[%s10735_s24 + $0x170] sm:$0xff]  }
 0x410   : > { %v9259_v10 = vld [vmem:[%s10735_s24 + $0x1a8] sm:$0xff]  }
 0x412   : > { %9685 = vmatpush3.bf16.msra.mxu0 %v9210_v31  ;;  %9717 = vmatpush3.bf16.msra.mxu1 %v9226_v33  ;;  %v9268_v31 = vld [vmem:[%s10735_s24 + $0x1f0] sm:$0xff]   ;;  %v1195_v33 = vrot.slane %v11663_v50, %v1194_v24 }
 0x413   : > { %9687 = vmatprep.subr.bf16.mxu0 %v9219_v34  ;;  %9719 = vmatprep.subr.bf16.mxu1 %v9235_v37  ;;  %v9244_v34 = vld [vmem:[%s10735_s24 + $0x130] sm:$0xff]   ;;  %v1203_v37 = vrot.slane %v11663_v50, %v1202_v60  ;;  %v9294_v50 = vld [vmem:[%s10735_s24 + $0x2c0] sm:$0xff]  }
 0x416   : > { %9689 = vmatpush3.bf16.msra.mxu0 %v9211_v38  ;;  %9721 = vmatpush3.bf16.msra.mxu1 %v9227_v41  ;;  %v9260_v38 = vld [vmem:[%s10735_s24 + $0x1b0] sm:$0xff]   ;;  %v9253_v41 = vld [vmem:[%s10735_s24 + $0x178] sm:$0xff]  }
 0x417   : > { %9691 = vmatprep.subr.bf16.mxu0 %v9220_v39  ;;  %9723 = vmatprep.subr.bf16.mxu1 %v9236_v43  ;;  %v9269_v39 = vld [vmem:[%s10735_s24 + $0x1f8] sm:$0xff]   ;;  %v9950_v43 = vadd.f32 %v11460_v22, %v1195_v33  ;;  %v9304_v33 = vld [vmem:[%s10735_s24 + $0x310] sm:$0xff]  }
 0x41a   : > { %9693 = vmatpush3.bf16.msra.mxu0 %v9212_v48  ;;  %9725 = vmatpush3.bf16.msra.mxu1 %v9228_v36  ;;  %v9952_v48 = vadd.f32 %v11464_v27, %v1203_v37  ;;  %v9278_v36 = vld [vmem:[%s10735_s24 + $0x240] sm:$0xff]   ;;  %v9279_v27 = vld [vmem:[%s10735_s24 + $0x248] sm:$0xff]   ;;  %v9313_v37 = vld [vmem:[%s10735_s24 + $0x358] sm:$0xff]  }
 0x41b   : > { %9695 = vmatprep.subr.bf16.mxu0 %v9221_v51  ;;  %9727 = vmatprep.subr.bf16.mxu1 %v9237_v53  ;;  %v6551_v51 = vmax.f32 %v9950_v43, 0.0  ;;  %v9286_v53 = vld [vmem:[%s10735_s24 + $0x280] sm:$0xff]  }
 0x41c   : > { %v6553_v22 = vmax.f32 %v9952_v48, 0.0  ;;  %v9314_v43 = vld [vmem:[%s10735_s24 + $0x360] sm:$0xff]  }
 0x41d   : > { %v9306_v48 = vld [vmem:[%s10735_s24 + $0x320] sm:$0xff]  }
 0x41e   : > { %9697 = vmatpush3.bf16.msra.mxu0 %v9213_v56  ;;  %9729 = vmatpush3.bf16.msra.mxu1 %v9229_v58  ;;  %v9295_v56 = vld [vmem:[%s10735_s24 + $0x2c8] sm:$0xff]  }
 0x41f   : > { %9731 = vmatprep.subr.bf16.mxu0 %v9246_v1  ;;  %9763 = vmatprep.subr.bf16.mxu1 %v9262_v61  ;;  %v9287_v58 = vld [vmem:[%s10735_s24 + $0x288] sm:$0xff]   ;;  %v9280_v1 = vld [vmem:[%s10735_s24 + $0x250] sm:$0xff]   ;;  %v9281_v61 = vld [vmem:[%s10735_s24 + $0x258] sm:$0xff]  }
 0x421   : > { %7141 = vmatmul.mubr.f32.vlgmr.msra.gmra.mrb[16].mxu0 %v6547_v45  ;;  %7211 = vmatmul.mubr.f32.vlgmr.msra.gmra.mrb[16].mxu1 %v6549_v63  ;;  %v9273_v45 = vld [vmem:[%s10735_s24 + $0x218] sm:$0xff]   ;;  %v9282_v63 = vld [vmem:[%s10735_s24 + $0x260] sm:$0xff]  }
 0x422   : > { %9733 = vmatpush3.bf16.msra.mxu0 %v9238_v0  ;;  %7280 = vmatprep.mubr.f32.mxu0 %v6552_v2  ;;  %v9289_v0 = vld [vmem:[%s10735_s24 + $0x298] sm:$0xff]   ;;  %v9274_v2 = vld [vmem:[%s10735_s24 + $0x220] sm:$0xff]  }
 0x423   : > { %9765 = vmatpush3.bf16.msra.mxu1 %v9254_v40  ;;  %7350 = vmatprep.mubr.f32.mxu1 %v6554_v28  ;;  %v9298_v40 = vld [vmem:[%s10735_s24 + $0x2e0] sm:$0xff]   ;;  %v9283_v28 = vld [vmem:[%s10735_s24 + $0x268] sm:$0xff]  }
 0x424   : > { %9735 = vmatprep.subr.bf16.mxu0 %v9247_v3  ;;  %9767 = vmatprep.subr.bf16.mxu1 %v9263_v29  ;;  %v9290_v3 = vld [vmem:[%s10735_s24 + $0x2a0] sm:$0xff]   ;;  %v9299_v29 = vld [vmem:[%s10735_s24 + $0x2e8] sm:$0xff]  }
 0x426   : > { %9737 = vmatpush3.bf16.msra.mxu0 %v9239_v4  ;;  %v9275_v4 = vld [vmem:[%s10735_s24 + $0x228] sm:$0xff]  }
 0x427   : > { %9769 = vmatpush3.bf16.msra.mxu1 %v9255_v5  ;;  %9739 = vmatprep.subr.bf16.mxu0 %v9248_v26  ;;  %v9291_v5 = vld [vmem:[%s10735_s24 + $0x2a8] sm:$0xff]   ;;  %v9284_v26 = vld [vmem:[%s10735_s24 + $0x270] sm:$0xff]  }
 0x428   : > { %9771 = vmatprep.subr.bf16.mxu1 %v9264_v6  ;;  %v9300_v6 = vld [vmem:[%s10735_s24 + $0x2f0] sm:$0xff]  }
 0x42a   : > { %9741 = vmatpush3.bf16.msra.mxu0 %v9240_v7  ;;  %v9276_v7 = vld [vmem:[%s10735_s24 + $0x230] sm:$0xff]  }
 0x42b   : > { %9773 = vmatpush3.bf16.msra.mxu1 %v9256_v8  ;;  %9743 = vmatprep.subr.bf16.mxu0 %v9249_v9  ;;  %v9292_v8 = vld [vmem:[%s10735_s24 + $0x2b0] sm:$0xff]   ;;  %v9285_v9 = vld [vmem:[%s10735_s24 + $0x278] sm:$0xff]  }
 0x42c   : > { %9775 = vmatprep.subr.bf16.mxu1 %v9265_v11  ;;  %v9301_v11 = vld [vmem:[%s10735_s24 + $0x2f8] sm:$0xff]  }
 0x42e   : > { %9745 = vmatpush3.bf16.msra.mxu0 %v9241_v12  ;;  %v9277_v12 = vld [vmem:[%s10735_s24 + $0x238] sm:$0xff]  }
 0x42f   : > { %9777 = vmatpush3.bf16.msra.mxu1 %v9257_v14  ;;  %9747 = vmatprep.subr.bf16.mxu0 %v9250_v35  ;;  %v9293_v14 = vld [vmem:[%s10735_s24 + $0x2b8] sm:$0xff]   ;;  %v9310_v35 = vld [vmem:[%s10735_s24 + $0x340] sm:$0xff]  }
 0x430   : > { %9779 = vmatprep.subr.bf16.mxu1 %v9266_v15  ;;  %v9326_v15 = vld [vmem:[%s10735_s24 + $0x3c0] sm:$0xff]  }
 0x432   : > { %9749 = vmatpush3.bf16.msra.mxu0 %v9242_v18  ;;  %v6555_v18 = vmax.f32 %v11697_v13, 0.0  ;;  %v9303_v13 = vld [vmem:[%s10735_s24 + $0x308] sm:$0xff]  }
 0x433   : > { %9781 = vmatpush3.bf16.msra.mxu1 %v9258_v19  ;;  %9751 = vmatprep.subr.bf16.mxu0 %v9251_v21  ;;  %v9302_v19 = vld [vmem:[%s10735_s24 + $0x300] sm:$0xff]   ;;  %v6557_v21 = vmax.f32 %v11700_v16, 0.0  ;;  %v9328_v16 = vld [vmem:[%s10735_s24 + $0x3d0] sm:$0xff]  }
 0x434   : > { %9783 = vmatprep.subr.bf16.mxu1 %v9267_v23  ;;  %v9318_v23 = vld [vmem:[%s10735_s24 + $0x380] sm:$0xff]  }
 0x436   : > { %9753 = vmatpush3.bf16.msra.mxu0 %v9243_v25  ;;  %v9311_v25 = vld [vmem:[%s10735_s24 + $0x348] sm:$0xff]  }
 0x437   : > { %9785 = vmatpush3.bf16.msra.mxu1 %v9259_v10  ;;  %9755 = vmatprep.subr.bf16.mxu0 %v9252_v30  ;;  %v9327_v10 = vld [vmem:[%s10735_s24 + $0x3c8] sm:$0xff]  }
 0x438   : > { %9787 = vmatprep.subr.bf16.mxu1 %v9268_v31  ;;  %v9319_v30 = vld [vmem:[%s10735_s24 + $0x388] sm:$0xff]   ;;  %v9312_v31 = vld [vmem:[%s10735_s24 + $0x350] sm:$0xff]  }
 0x43a   : > { %9757 = vmatpush3.bf16.msra.mxu0 %v9244_v34  ;;  %v9320_v34 = vld [vmem:[%s10735_s24 + $0x390] sm:$0xff]  }
 0x43b   : > { %9789 = vmatpush3.bf16.msra.mxu1 %v9260_v38  ;;  %9759 = vmatprep.subr.bf16.mxu0 %v9253_v41  ;;  %v9329_v38 = vld [vmem:[%s10735_s24 + $0x3d8] sm:$0xff]  }
 0x43c   : > { %9791 = vmatprep.subr.bf16.mxu1 %v9269_v39  ;;  %v9305_v41 = vld [vmem:[%s10735_s24 + $0x318] sm:$0xff]  }
 0x43d   : > { %v9321_v39 = vld [vmem:[%s10735_s24 + $0x398] sm:$0xff]  }
 0x43e   : > { %9761 = vmatpush3.bf16.msra.mxu0 %v9245_v47  ;;  %v9330_v47 = vld [vmem:[%s10735_s24 + $0x3e0] sm:$0xff]  }
 0x43f   : > { %9793 = vmatpush3.bf16.msra.mxu1 %v9261_v49  ;;  %9795 = vmatprep.subr.bf16.mxu0 %v9278_v36  ;;  %v9322_v49 = vld [vmem:[%s10735_s24 + $0x3a0] sm:$0xff]   ;;  %v9315_v36 = vld [vmem:[%s10735_s24 + $0x368] sm:$0xff]  }
 0x440   : > { %9827 = vmatprep.subr.bf16.mxu1 %v9294_v50  ;;  %v9331_v50 = vld [vmem:[%s10735_s24 + $0x3e8] sm:$0xff]  }
 0x441   : > { %7281 = vmatmul.mubr.f32.vlgmr.msra.gmra.mrb[18].mxu0 %v6551_v51  ;;  %v9307_v51 = vld [vmem:[%s10735_s24 + $0x328] sm:$0xff]  }
 0x442   : > { %7351 = vmatmul.mubr.f32.vlgmr.msra.gmra.mrb[18].mxu1 %v6553_v22  ;;  %9797 = vmatpush3.bf16.msra.mxu0 %v9270_v52  ;;  %v9323_v52 = vld [vmem:[%s10735_s24 + $0x3a8] sm:$0xff]   ;;  %v9316_v22 = vld [vmem:[%s10735_s24 + $0x370] sm:$0xff]  }
 0x443   : > { %7420 = vmatprep.mubr.f32.mxu0 %v6556_v55  ;;  %9829 = vmatpush3.bf16.msra.mxu1 %v9286_v53  ;;  %v9332_v53 = vld [vmem:[%s10735_s24 + $0x3f0] sm:$0xff]  }
 0x444   : > { %7490 = vmatprep.mubr.f32.mxu1 %v6558_v32  ;;  %9799 = vmatprep.subr.bf16.mxu0 %v9279_v27  ;;  %v9308_v55 = vld [vmem:[%s10735_s24 + $0x330] sm:$0xff]   ;;  %v9317_v32 = vld [vmem:[%s10735_s24 + $0x378] sm:$0xff]  }
 0x445   : > { %9831 = vmatprep.subr.bf16.mxu1 %v9295_v56  ;;  %v9324_v27 = vld [vmem:[%s10735_s24 + $0x3b0] sm:$0xff]   ;;  %v9333_v56 = vld [vmem:[%s10735_s24 + $0x3f8] sm:$0xff]  }
 0x446   : > { %9801 = vmatpush3.bf16.msra.mxu0 %v9271_v57  ;;  %v9309_v57 = vld [vmem:[%s10735_s24 + $0x338] sm:$0xff]  }
 0x447   : > { %9833 = vmatpush3.bf16.msra.mxu1 %v9287_v58  ;;  %9803 = vmatprep.subr.bf16.mxu0 %v9280_v1  ;;  %v9325_v58 = vld [vmem:[%s10735_s24 + $0x3b8] sm:$0xff]   ;;  %v1227_v1 = vrot.slane %v11682_v62, %v1194_v24 }
 0x448   : > { %9835 = vmatprep.subr.bf16.mxu1 %v9296_v17  ;;  %v1235_v17 = vrot.slane %v11682_v62, %v1202_v60 }
 0x44a   : > { %9805 = vmatpush3.bf16.msra.mxu0 %v9272_v20  ;;  %v1231_v20 = vrot.slane %v11682_v62, %v1198_v54 }
 0x44b   : > { %9837 = vmatpush3.bf16.msra.mxu1 %v9288_v59  ;;  %9807 = vmatprep.subr.bf16.mxu0 %v9281_v61  ;;  %v1239_v59 = vrot.slane %v11682_v62, %v1206_v46 }
 0x44c   : > { %9839 = vmatprep.subr.bf16.mxu1 %v9297_v42 }
 0x44e   : > { %9809 = vmatpush3.bf16.msra.mxu0 %v9273_v45 }
 0x44f   : > { %9841 = vmatpush3.bf16.msra.mxu1 %v9289_v0  ;;  %9811 = vmatprep.subr.bf16.mxu0 %v9282_v63 }
 0x450   : > { %9843 = vmatprep.subr.bf16.mxu1 %v9298_v40 }
 0x452   : > { %9813 = vmatpush3.bf16.msra.mxu0 %v9274_v2 }
 0x453   : > { %9845 = vmatpush3.bf16.msra.mxu1 %v9290_v3  ;;  %9815 = vmatprep.subr.bf16.mxu0 %v9283_v28 }
 0x454   : > { %9847 = vmatprep.subr.bf16.mxu1 %v9299_v29 }
 0x456   : > { %9817 = vmatpush3.bf16.msra.mxu0 %v9275_v4 }
 0x457   : > { %9849 = vmatpush3.bf16.msra.mxu1 %v9291_v5  ;;  %9819 = vmatprep.subr.bf16.mxu0 %v9284_v26 }
 0x458   : > { %9851 = vmatprep.subr.bf16.mxu1 %v9300_v6 }
 0x45a   : > { %9821 = vmatpush3.bf16.msra.mxu0 %v9276_v7 }
 0x45b   : > { %9853 = vmatpush3.bf16.msra.mxu1 %v9292_v8  ;;  %9823 = vmatprep.subr.bf16.mxu0 %v9285_v9 }
 0x45c   : > { %9855 = vmatprep.subr.bf16.mxu1 %v9301_v11 }
 0x45e   : > { %9825 = vmatpush3.bf16.msra.mxu0 %v9277_v12 }
 0x45f   : > { %9857 = vmatpush3.bf16.msra.mxu1 %v9293_v14  ;;  %9859 = vmatprep.subr.bf16.mxu0 %v9310_v35 }
 0x460   : > { %9891 = vmatprep.subr.bf16.mxu1 %v9326_v15 }
 0x461   : > { %7421 = vmatmul.mubr.f32.vlgmr.msra.gmra.mrb[20].mxu0 %v6555_v18 }
 0x462   : > { %7491 = vmatmul.mubr.f32.vlgmr.msra.gmra.mrb[20].mxu1 %v6557_v21  ;;  %9861 = vmatpush3.bf16.msra.mxu0 %v9302_v19 }
 0x463   : > { %9893 = vmatpush3.bf16.msra.mxu1 %v9318_v23  ;;  %9863 = vmatprep.subr.bf16.mxu0 %v9311_v25 }
 0x464   : > { %9895 = vmatprep.subr.bf16.mxu1 %v9327_v10 }
 0x466   : > { %9865 = vmatpush3.bf16.msra.mxu0 %v9303_v13 }
 0x467   : > { %9897 = vmatpush3.bf16.msra.mxu1 %v9319_v30  ;;  %9867 = vmatprep.subr.bf16.mxu0 %v9312_v31 }
 0x468   : > { %9899 = vmatprep.subr.bf16.mxu1 %v9328_v16 }
 0x46a   : > { %9869 = vmatpush3.bf16.msra.mxu0 %v9304_v33 }
 0x46b   : > { %9901 = vmatpush3.bf16.msra.mxu1 %v9320_v34  ;;  %9871 = vmatprep.subr.bf16.mxu0 %v9313_v37 }
 0x46c   : > { %9903 = vmatprep.subr.bf16.mxu1 %v9329_v38 }
 0x46e   : > { %9873 = vmatpush3.bf16.msra.mxu0 %v9305_v41 }
 0x46f   : > { %9905 = vmatpush3.bf16.msra.mxu1 %v9321_v39  ;;  %9875 = vmatprep.subr.bf16.mxu0 %v9314_v43 }
 0x470   : > { %9907 = vmatprep.subr.bf16.mxu1 %v9330_v47 }
 0x472   : > { %9877 = vmatpush3.bf16.msra.mxu0 %v9306_v48  ;;  %v6563_v48 = vld [vmem:[#allocation2] sm:$0x3] }
 0x473   : > { %9909 = vmatpush3.bf16.msra.mxu1 %v9322_v49  ;;  %9879 = vmatprep.subr.bf16.mxu0 %v9315_v36 }
 0x474   : > { %9911 = vmatprep.subr.bf16.mxu1 %v9331_v50  ;;  %v7652_v50 = vld [vmem:[%s11950_s5] sm:$0xff] (!%p8686_p0) }
 0x476   : > { %9881 = vmatpush3.bf16.msra.mxu0 %v9307_v51  ;;  %v7653_v51 = vld [vmem:[%s11950_s5 + $0x8] sm:$0xff] (!%p8686_p0) }
 0x477   : > { %9913 = vmatpush3.bf16.msra.mxu1 %v9323_v52  ;;  %9883 = vmatprep.subr.bf16.mxu0 %v9316_v22  ;;  %v7654_v52 = vld [vmem:[%s11950_s5 + $0x10] sm:$0xff] (!%p8686_p0)  ;;  %v10438_v22 = vmov (!%p8686_p0), 0.0|0.0  }
 0x478   : > { %9915 = vmatprep.subr.bf16.mxu1 %v9332_v53  ;;  %v9923_v53 = vpack.c.bf16 (!%p8686_p0), %v7653_v51, %v7652_v50 }
 0x47a   : > { %9885 = vmatpush3.bf16.msra.mxu0 %v9308_v55  ;;  %v7655_v55 = vld [vmem:[%s11950_s5 + $0x18] sm:$0xff] (!%p8686_p0) }
 0x47b   : > { %9917 = vmatpush3.bf16.msra.mxu1 %v9324_v27  ;;  %9887 = vmatprep.subr.bf16.mxu0 %v9317_v32  ;;  %v10440_v27 = vmov (!%p8686_p0), 0.0   ;;  %v9926_v32 = vpack.c.bf16 (!%p8686_p0), %v7655_v55, %v7654_v52 }
 0x47c   : > { %9919 = vmatprep.subr.bf16.mxu1 %v9333_v56  ;;  %v7656_v56 = vld [vmem:[%s11950_s5 + $0x20] sm:$0xff] (!%p8686_p0) }
 0x47e   : > { %9889 = vmatpush3.bf16.msra.mxu0 %v9309_v57  ;;  %v7657_v57 = vld [vmem:[%s11950_s5 + $0x28] sm:$0xff] (!%p8686_p0) }
 0x47f   : > { %9921 = vmatpush3.bf16.msra.mxu1 %v9325_v58  ;;  %9922 = vmatprep.subr.bf16.mxu0 (!%p8686_p0), %v10438_v22  ;;  %v9929_v58 = vpack.c.bf16 (!%p8686_p0), %v7657_v57, %v7656_v56 }
 0x4d4   : > { %v6376_v61 = vpop.f32.mrb[12].mxu0  ;;  %v6540_v45 = vpop.f32.mrb[12].mxu1 }
 0x4d5   : > { %v9958_v42 = vadd.f32 %v6376_v61, %v1227_v1  ;;  %v6378_v0 = vpop.f32.mrb[13].mxu0  ;;  %v9960_v63 = vadd.f32 %v6540_v45, %v1235_v17  ;;  %v6542_v2 = vpop.f32.mrb[13].mxu1  ;;  %v7658_v1 = vld [vmem:[%s11950_s5 + $0x30] sm:$0xff] (!%p8686_p0)  ;;  %v7659_v17 = vld [vmem:[%s11950_s5 + $0x38] sm:$0xff] (!%p8686_p0)  ;;  %v7661_v61 = vld [vmem:[%s11950_s5 + $0x48] sm:$0xff] (!%p8686_p0) }
 0x4d6   : > { %v9959_v40 = vadd.f32 %v6378_v0, %v1231_v20  ;;  %v6380_v24 = vpop.f32.mrb[14].mxu0  ;;  %v9961_v3 = vadd.f32 %v6542_v2, %v1239_v59  ;;  %v6544_v28 = vpop.f32.mrb[14].mxu1  ;;  %v9932_v20 = vpack.c.bf16 (!%p8686_p0), %v7659_v17, %v7658_v1  ;;  %v7660_v59 = vld [vmem:[%s11950_s5 + $0x40] sm:$0xff] (!%p8686_p0)  ;;  %v7662_v45 = vld [vmem:[%s11950_s5 + $0x50] sm:$0xff] (!%p8686_p0)  ;;  %v7663_v0 = vld [vmem:[%s11950_s5 + $0x58] sm:$0xff] (!%p8686_p0) }
 0x4d7   : > { %v6381_v29 = vpop.f32.mrb[15].mxu0  ;;  %v6545_v4 = vpop.f32.mrb[15].mxu1  ;;  %v6559_v5 = vmax.f32 %v9958_v42, 0.0  ;;  %v6561_v54 = vmax.f32 %v9960_v63, 0.0  ;;  %v9935_v42 = vpack.c.bf16 (!%p8686_p0), %v7661_v61, %v7660_v59  ;;  %v9938_v63 = vpack.c.bf16 (!%p8686_p0), %v7663_v0, %v7662_v45  ;;  %v7665_v2 = vld [vmem:[%s11950_s5 + $0x68] sm:$0xff] (!%p8686_p0) }
 0x4d8   : > { %v6560_v60 = vmax.f32 %v9959_v40, 0.0  ;;  %v6562_v26 = vmax.f32 %v9961_v3, 0.0  ;;  %v7664_v40 = vld [vmem:[%s11950_s5 + $0x60] sm:$0xff] (!%p8686_p0)  ;;  %v8687_v28 = vld [vmem:[#allocation11] ss:$0 sm:$0xff] (!%p8686_p0)  ;;  %v7666_v29 = vld [vmem:[%s11950_s5 + $0x70] sm:$0xff] (!%p8686_p0) }
 0x4d9   : > { %v9941_v24 = vpack.c.bf16 (!%p8686_p0), %v7665_v2, %v7664_v40 }
 0x4da   : > { %7560 = vmatprep.mubr.f32.mxu0 %v6560_v60  ;;  %7630 = vmatprep.mubr.f32.mxu1 %v6562_v26  ;;  %v7667_v60 = vld [vmem:[%s11950_s5 + $0x78] sm:$0xff] (!%p8686_p0) }
 0x4db   : > { %7561 = vmatmul.mubr.f32.vlgmr.msra.gmra.mrb[22].mxu0 %v6559_v5  ;;  %7631 = vmatmul.mubr.f32.vlgmr.msra.gmra.mrb[22].mxu1 %v6561_v54  ;;  %v9944_v5 = vpack.c.bf16 (!%p8686_p0), %v7667_v60, %v7666_v29  ;;  %v8688_v54 = vld [vmem:[#allocation12] ss:$0 sm:$0xff] (!%p8686_p0) }
 0x4dc   : > { %9663 = vmatprep.mubr.msk.f32.mxu0 (!%p8686_p0), %vm10439_vm1, %v10440_v27  ;;  %9924 = vmatpush3.bf16.msra.mxu0 (!%p8686_p0), %v9923_v53 }
 0x4dd   : > { %9925 = vmatprep.subr.bf16.mxu0 (!%p8686_p0), %v10438_v22 }
 0x4e0   : > { %9927 = vmatpush3.bf16.msra.mxu0 (!%p8686_p0), %v9926_v32 }
 0x4e1   : > { %9928 = vmatprep.subr.bf16.mxu0 (!%p8686_p0), %v10438_v22 }
 0x4e4   : > { %9930 = vmatpush3.bf16.msra.mxu0 (!%p8686_p0), %v9929_v58 }
 0x4e5   : > { %9931 = vmatprep.subr.bf16.mxu0 (!%p8686_p0), %v10438_v22 }
 0x4e8   : > { %9933 = vmatpush3.bf16.msra.mxu0 (!%p8686_p0), %v9932_v20 }
 0x4e9   : > { %9934 = vmatprep.subr.bf16.mxu0 (!%p8686_p0), %v10438_v22 }
 0x4ec   : > { %9936 = vmatpush3.bf16.msra.mxu0 (!%p8686_p0), %v9935_v42 }
 0x4ed   : > { %9937 = vmatprep.subr.bf16.mxu0 (!%p8686_p0), %v10438_v22 }
 0x4f0   : > { %9939 = vmatpush3.bf16.msra.mxu0 (!%p8686_p0), %v9938_v63 }
 0x4f1   : > { %9940 = vmatprep.subr.bf16.mxu0 (!%p8686_p0), %v10438_v22 }
 0x4f4   : > { %v9366_v44 = vpop.f32.mrb[16].mxu0  ;;  %v9401_v62 = vpop.f32.mrb[16].mxu1  ;;  %9942 = vmatpush3.bf16.msra.mxu0 (!%p8686_p0), %v9941_v24 }
 0x4f5   : > { %v9367_v46 = vpop.f32.mrb[17].mxu0  ;;  %v9402_v7 = vpop.f32.mrb[17].mxu1  ;;  %9943 = vmatprep.subr.bf16.mxu0 (!%p8686_p0), %v10438_v22 }
 0x4f6   : > { %v9368_v6 = vadd.f32 %v9367_v46, %v9366_v44  ;;  %v9403_v8 = vadd.f32 %v9402_v7, %v9401_v62 }
 0x4f8   : > { %v7213_v9 = vadd.f32 %v9403_v8, %v9368_v6  ;;  %9945 = vmatpush3.bf16.msra.mxu0 (!%p8686_p0), %v9944_v5 }
 0x514   : > { %v9436_v11 = vpop.f32.mrb[18].mxu0 }
 0x515   : > { %v9471_v12 = vpop.f32.mrb[18].mxu1  ;;  %v9437_v14 = vpop.f32.mrb[19].mxu0 }
 0x516   : > { %v9438_v35 = vadd.f32 %v9437_v14, %v9436_v11  ;;  %v9472_v15 = vpop.f32.mrb[19].mxu1 }
 0x517   : > { %v9473_v18 = vadd.f32 %v9472_v15, %v9471_v12 }
 0x518   : > { %v7283_v19 = vadd.f32 %v9438_v35, %v7213_v9 }
 0x51a   : > { %v7353_v21 = vadd.f32 %v9473_v18, %v7283_v19 }
 0x534   : > { %v9506_v23 = vpop.f32.mrb[20].mxu0 }
 0x535   : > { %v9541_v25 = vpop.f32.mrb[20].mxu1  ;;  %v9507_v10 = vpop.f32.mrb[21].mxu0 }
 0x536   : > { %v9508_v13 = vadd.f32 %v9507_v10, %v9506_v23  ;;  %v9542_v30 = vpop.f32.mrb[21].mxu1 }
 0x537   : > { %v9543_v31 = vadd.f32 %v9542_v30, %v9541_v25 }
 0x538   : > { %v7423_v16 = vadd.f32 %v9508_v13, %v7353_v21 }
 0x53a   : > { %v7493_v33 = vadd.f32 %v9543_v31, %v7423_v16 }
 0x5ae   : > { %v9576_v34 = vpop.f32.mrb[22].mxu0  ;;  %v9611_v37 = vpop.f32.mrb[22].mxu1 }
 0x5af   : > { %v9577_v38 = vpop.f32.mrb[23].mxu0  ;;  %v9612_v39 = vpop.f32.mrb[23].mxu1 }
 0x5b0   : > { %v9578_v41 = vadd.f32 %v9577_v38, %v9576_v34  ;;  %v9613_v43 = vadd.f32 %v9612_v39, %v9611_v37 }
 0x5b2   : > { %v7563_v47 = vadd.f32 %v9578_v41, %v7493_v33  ;;  %7641 = sbr.rel (%p8686_p0) target bundleno = 1719 (0x6b7), region = 80 }
 0x5b4   : > { %v7633_v49 = vadd.f32 %v9613_v43, %v7563_v47 }
 0x5b6   : > { %v7636_v36 = vadd.f32 %v7633_v49, %v6563_v48 }
 0x5b8   : > { %7637 = vst [vmem:[#allocation2] sm:$0x3] %v7636_v36 }
 0x5bf   : > { %v7642_v3 = vld [vmem:[#allocation2] sm:$0x3] }
 0x5c0   : > { %v7650_v4 = vadd.f32 %v8687_v28, %v7642_v3 }
 0x5c2   : > { %v7651_v26 = vmax.f32 %v7650_v4, 0.0 }
 0x5c4   : > { %9664 = vmatmul.mubr.f32.vlgmr.msra.gmra.mrb[0].mxu0 %v7651_v26 }
 0x697   : > { %v7741_v44 = vpop.f32.mrb[0].mxu0 }
 0x698   : > { %v7742_v62 = vadd.f32 %v8688_v54, %v7741_v44  ;;  %v9665_v46 = vpop.f32.mrb[1].mxu0 }
 0x69a   : > { %v7745_v6 = vsub.f32 0.0, %v7742_v62 }
 0x69c   : > { %v7746_v7 = vmul.f32 1.442695, %v7745_v6 }
 0x69e   : > { %10163 = vpow2.f32 %v7746_v7 }
 0x6a8   : > { %v10164_v8 = vpop.eup %10163 }
 0x6a9   : > { %v7748_v9 = vadd.f32 1.0, %v10164_v8 }
 0x6ab   : > { %10165 = vrcp.f32 %v7748_v9 }
 0x6b5   : > { %v10166_v11 = vpop.eup %10165 }
 0x6b6   : > { %7752 = vst.msk [vmem:[#allocation14] sm:$0x3] %vm7751_vm2, %v10166_v11 }
 0x6b7 PF: > { %p10113_p4 = scmp.eq.s32.totalorder %s10501_s28, 1  ;;  %s10441_s30 = smov [#allocation14]  }
 0x6b8   : > { %s7760_s10 = sshll.u32 %s10441_s30, 4  ;;  %s7761_s10 = int_to_ptr.vmem [resolvable:$true] %s7760_s10 }
 0x6b9   : > { %s10339_s12 = scalar_lea.vmem %s7761_s10, 32  ;;  %p10346_p7 = scmp.lt.s32.totalorder %s7761_s10, %s7761_s10 }
 0x6ba   : > { %p10340_p6 = scmp.ne.s32.totalorder %s7761_s10, %s10339_s12  ;;  %p10347_p11 = scmp.lt.s32.totalorder %s10339_s12, %s10339_s12 }
 0x6bc   : > { %p10341_p1 = pnand %p10340_p6, %p10113_p4  ;;  %p10348_p2 = por %p10347_p11, %p10346_p7 }
 0x6be   : > { %p10342_p3 = pneg %p10341_p1 }
 0x6c0   : > { %p10349_p12 = pnand %p10348_p2, %p10342_p3 }
 0x6c2   : > { %10352 = shalt.err (!%p10349_p12)
}
 0x6c3   : > { %s10353_s11 = scalar_lea.hbm %s11952_s7, 32 }
 0x6c4   : > { %p10354_p13 = scmp.ne.s32.totalorder %s11952_s7, %s10353_s11  ;;  %p10359_p10 = scmp.lt.u32.totalorder %s10353_s11, %s11952_s7 }
 0x6c6   : > { %p10355_p5 = pnand %p10354_p13, %p10113_p4 }
 0x6c8   : > { %p10356_p9 = pneg %p10355_p5 }
 0x6ca   : > { %p10361_p8 = pnand %p10359_p10, %p10356_p9 }
 0x6cc   : > { %10364 = shalt.err (!%p10361_p8)
}
 0x6cd   : > { %10081 = dma.vmem_to_hbm [thread:$0]  (%p10113_p4), %s7761_s10, 32, %s11952_s7, [#allocation5]  }
 0x6ce   : > { %10406 = dma.done.wait (%p10113_p4), [#allocation5], 32  }
 0x6cf   : > { %10408 = vsyncadd (%p10113_p4), [#allocation5], 4294967264 }
 0x6d0 PF: > { %s11978_s27 = sld [smem:[#allocation22_spill]]  ;;  %p23_p0 = scmp.ge.s32.totalorder %s10504_s29, 4  }
 0x6d1   : > { %s11979_s24 = smov %s10415_s25  ;;  %s11980_s25 = smov %s10419_s26 }
 0x6d2   :  { %25 = sbr.rel (!%p23_p0) target bundleno = 10 (0xa), region = 124 }
 0x6d6   : > { %s11981_s26 = smov %s11978_s27  ;;  %s11982_s27 = smov %s10504_s29 }
 0x6d9   :  { %7773 = vsyncpa [#allocation4], 1 }
 0x6da   :  { %7775 = vsyncpa [#allocation4 + $0x1], 1 }
 0x6db   :  { %7776 = vsyncpa [#allocation7], 1 }
 0x6dc   :  { %7778 = vsyncpa [#allocation7 + $0x1], 1 }
 0x6dd   :  { %7779 = vsyncpa [#allocation10], 1 }
 0x6de   :  { %7781 = vsyncpa [#allocation10 + $0x1], 1 }
 0x6df   :  { %7782 = vsyncpa [#allocation13], 1 }
 0x6e0   :  { %7783 = vsyncpa [#allocation5], 1 }
 0x6e1   :  { %7785 = vsyncpa [#allocation5 + $0x1], 1 }

</bundles_post_ra>
